<compile_context>
chip_gen: v7x
topology: tpu7x:2x2x1
jax: 0.10.0
libtpu: 0.0.40
codegen_flags: <defaults>
</compile_context>

<pallas_src>
import jax
import jax.numpy as jnp
from jax import lax
from jax.experimental import pallas as pl
from jax.experimental.pallas import tpu as pltpu

# ---------------- small config consistent with the module -------------------
B = 2            # batch
NFEAT = 16       # n_features (module default 81, scaled down)
T = 32           # input time steps
K = 10           # conv kernel size
STRIDE = 2
PAD = 5
DENSE = 128      # hard-coded 128-wide dense block in the module
HIDDEN = 32      # hidden_size (module default 512, scaled down)
NCLASS = 16      # n_classes (module default 20, scaled down)
T_OUT = (T + 2 * PAD - K) // STRIDE + 1   # Conv1d output length
N_ROWS = T_OUT * B                        # time-major row count
CK = NFEAT * K                            # im2col feature width

# ---------------- elementwise helpers (used inside kernel & reference) ------
_ERF_P = 0.3275911
_ERF_A = (0.254829592, -0.284496736, 1.421413741, -1.453152027, 1.061405429)


def _erf(x):
    # Abramowitz & Stegun 7.1.26 rational approximation (|err| < 1.5e-7),
    # built only from exp/mul/add so it lowers cleanly in Mosaic.
    sgn = jnp.where(x >= 0.0, 1.0, -1.0)
    a = jnp.abs(x)
    t = 1.0 / (1.0 + _ERF_P * a)
    poly = t * (_ERF_A[0] + t * (_ERF_A[1] + t * (_ERF_A[2]
                + t * (_ERF_A[3] + t * _ERF_A[4]))))
    return sgn * (1.0 - poly * jnp.exp(-a * a))


def _gelu(x):
    # exact (erf-based) GELU, matching torch.nn.functional.gelu default
    return 0.5 * x * (1.0 + _erf(x * 0.7071067811865475))


def _layernorm(x, g, b, eps=1e-5):
    mu = jnp.mean(x, axis=-1, keepdims=True)
    var = jnp.mean(jnp.square(x - mu), axis=-1, keepdims=True)
    return (x - mu) * lax.rsqrt(var + eps) * g + b


# ---------------- single fused kernel: (conv⊕dense) -> LSTM -> head ----------
def _fused_kernel(xcol_ref, wf_ref, bf_ref, g1_ref, be1_ref,
                  w2_ref, b2_ref, g2_ref, be2_ref,
                  wih_ref, whh_ref, lb_ref, h0_ref, c0_ref,
                  g3_ref, be3_ref, fw_ref, fb_ref,
                  logits_ref, hn_ref, cn_ref,
                  gates_sc, seq_sc):
    # ---- dense block; Conv1d is folded into the first matmul's weights ----
    h = jnp.dot(xcol_ref[...], wf_ref[...],
                preferred_element_type=jnp.float32) + bf_ref[...]
    h = _gelu(_layernorm(h, g1_ref[...], be1_ref[...]))
    h = jnp.dot(h, w2_ref[...], preferred_element_type=jnp.float32) + b2_ref[...]
    h = _gelu(_layernorm(h, g2_ref[...], be2_ref[...]))

    # ---- LSTM input projection hoisted out of the recurrence ----
    # one (T*B, 128) @ (128, 4H) matmul; rows are time-major (t*B + b)
    gates_sc[...] = (jnp.dot(h, wih_ref[...], preferred_element_type=jnp.float32)
                     + lb_ref[...])

    whh = whh_ref[...]
    Hd = HIDDEN
    Bv = B

    # ---- serial recurrence: fully static unroll, static sublane slices ----
    h_prev = h0_ref[...].astype(jnp.float32)
    c_prev = c0_ref[...].astype(jnp.float32)
    for t in range(T_OUT):                          # T_OUT = 17, tiny static unroll
        g = (gates_sc[t * Bv:(t + 1) * Bv, :]
             + jnp.dot(h_prev, whh, preferred_element_type=jnp.float32))
        sig = jax.nn.sigmoid(g)                     # one EUP pass over full (B, 4H)
        i = sig[:, 0 * Hd:1 * Hd]                   # torch gate order: i, f, g, o
        f = sig[:, 1 * Hd:2 * Hd]
        o = sig[:, 3 * Hd:4 * Hd]
        gg = jnp.tanh(g[:, 2 * Hd:3 * Hd])
        c_prev = f * c_prev + i * gg
        h_prev = o * jnp.tanh(c_prev)
        seq_sc[t * Bv:(t + 1) * Bv, :] = h_prev

    hn_ref[...] = h_prev.astype(hn_ref.dtype)       # written exactly once
    cn_ref[...] = c_prev.astype(cn_ref.dtype)

    # ---- head: LayerNorm -> GELU -> Linear on the whole sequence at once ----
    z = _gelu(_layernorm(seq_sc[...], g3_ref[...], be3_ref[...]))
    logits_ref[...] = (jnp.dot(z, fw_ref[...], preferred_element_type=jnp.float32)
                       + fb_ref[...]).astype(logits_ref.dtype)


# ---------------- parameter init (deterministic, PyTorch-style fan-in) ------
def init_params(key):
    ks = jax.random.split(key, 12)

    def u(k, shape, fan_in):
        lim = 1.0 / float(fan_in) ** 0.5
        return jax.random.uniform(k, shape, jnp.float32, -lim, lim)

    p = {}
    p["conv_w"] = u(ks[0], (NFEAT, NFEAT, K), NFEAT * K)      # Conv1d.weight (Cout, Cin, K)
    p["conv_b"] = u(ks[1], (NFEAT,), NFEAT * K)
    p["d_w1"] = u(ks[2], (NFEAT, DENSE), NFEAT)               # Linear weights stored (in, out)
    p["d_b1"] = u(ks[3], (1, DENSE), NFEAT)
    p["d_g1"] = jnp.ones((1, DENSE), jnp.float32)
    p["d_be1"] = jnp.zeros((1, DENSE), jnp.float32)
    p["d_w2"] = u(ks[4], (DENSE, DENSE), DENSE)
    p["d_b2"] = u(ks[5], (1, DENSE), DENSE)
    p["d_g2"] = jnp.ones((1, DENSE), jnp.float32)
    p["d_be2"] = jnp.zeros((1, DENSE), jnp.float32)
    p["l_wih_t"] = u(ks[6], (DENSE, 4 * HIDDEN), HIDDEN)      # W_ih^T
    p["l_whh_t"] = u(ks[7], (HIDDEN, 4 * HIDDEN), HIDDEN)     # W_hh^T
    p["l_b"] = u(ks[8], (1, 4 * HIDDEN), HIDDEN) + u(ks[9], (1, 4 * HIDDEN), HIDDEN)  # b_ih+b_hh
    p["ln2_g"] = jnp.ones((1, HIDDEN), jnp.float32)
    p["ln2_b"] = jnp.zeros((1, HIDDEN), jnp.float32)
    p["f_w"] = u(ks[10], (HIDDEN, NCLASS), HIDDEN)
    p["f_b"] = u(ks[11], (1, NCLASS), HIDDEN)
    return p


# ---------------- full forward: glue (im2col + weight fold) + 1 Pallas call --
@jax.jit
def transcriber_forward(params, x, hidden):
    # x: (B, 1, n_features, T); hidden = (h0, c0), each (1, B, HIDDEN)
    h0, c0 = hidden
    xs = x[:, 0]                                               # squeeze(1) -> (B, C, T)
    Bv, C, Tv = xs.shape
    t_out = (Tv + 2 * PAD - K) // STRIDE + 1

    # glue: im2col gather in time-major row order (layout plumbing only)
    x_pad = jnp.pad(xs, ((0, 0), (0, 0), (PAD, PAD)))
    idx = STRIDE * jnp.arange(t_out)[:, None] + jnp.arange(K)[None, :]   # (T_out, K)
    x_col = x_pad[:, :, idx]                                   # (B, C, T_out, K)
    x_col = jnp.transpose(x_col, (2, 0, 1, 3)).reshape(t_out * Bv, C * K)

    # weight folding: conv (linear) feeds straight into dense Linear #1
    w_conv_flat = params["conv_w"].reshape(C, C * K)           # (Cout, Cin*K)
    w_fused = w_conv_flat.T @ params["d_w1"]                   # (C*K, DENSE)
    b_fused = params["conv_b"] @ params["d_w1"] + params["d_b1"]  # (1, DENSE)

    logits, hn, cn = pl.pallas_call(
        _fused_kernel,
        out_shape=(
            jax.ShapeDtypeStruct((t_out * Bv, NCLASS), x.dtype),
            jax.ShapeDtypeStruct((Bv, HIDDEN), x.dtype),
            jax.ShapeDtypeStruct((Bv, HIDDEN), x.dtype),
        ),
        scratch_shapes=[
            pltpu.VMEM((t_out * Bv, 4 * HIDDEN), jnp.float32),  # hoisted input gates
            pltpu.VMEM((t_out * Bv, HIDDEN), jnp.float32),      # LSTM output sequence
        ],
    )(x_col, w_fused, b_fused,
      params["d_g1"], params["d_be1"],
      params["d_w2"], params["d_b2"], params["d_g2"], params["d_be2"],
      params["l_wih_t"], params["l_whh_t"], params["l_b"],
      h0[0], c0[0],
      params["ln2_g"], params["ln2_b"], params["f_w"], params["f_b"])

    # TODO(synk): nn.Dropout layers are identity in eval mode; training-mode dropout not implemented.
    return logits.reshape(t_out, Bv, NCLASS), (hn[None], cn[None])


# ---------------- pure-JAX reference for validation --------------------------
def transcriber_reference(params, x, hidden):
    h0, c0 = hidden
    xs = x[:, 0]
    xp = jnp.pad(xs, ((0, 0), (0, 0), (PAD, PAD)))
    idx = STRIDE * jnp.arange(T_OUT)[None, :] + jnp.arange(K)[:, None]
    xcol = xp[:, :, idx].reshape(xs.shape[0], NFEAT * K, T_OUT)
    wf = params["conv_w"].reshape(NFEAT, NFEAT * K)
    y = jnp.einsum("of,bft->bot", wf, xcol) + params["conv_b"][None, :, None]
    y = jnp.transpose(y, (0, 2, 1))
    h = _gelu(_layernorm(y @ params["d_w1"] + params["d_b1"], params["d_g1"], params["d_be1"]))
    h = _gelu(_layernorm(h @ params["d_w2"] + params["d_b2"], params["d_g2"], params["d_be2"]))
    seq = jnp.transpose(h, (1, 0, 2))                              # (T_out, B, 128)

    def step(carry, x_t):
        hprev, cprev = carry
        gates = x_t @ params["l_wih_t"] + hprev @ params["l_whh_t"] + params["l_b"]
        i, f, g, o = jnp.split(gates, 4, axis=-1)
        c_new = jax.nn.sigmoid(f) * cprev + jax.nn.sigmoid(i) * jnp.tanh(g)
        h_new = jax.nn.sigmoid(o) * jnp.tanh(c_new)
        return (h_new, c_new), h_new

    (hn, cn), outs = lax.scan(step, (h0[0], c0[0]), seq)
    z = _gelu(_layernorm(outs, params["ln2_g"], params["ln2_b"]))
    logits = z @ params["f_w"] + params["f_b"]
    return logits, (hn[None], cn[None])


if __name__ == "__main__":
    key = jax.random.PRNGKey(0)
    kp, kx, kh, kc = jax.random.split(key, 4)
    params = init_params(kp)
    x = jax.random.normal(kx, (B, 1, NFEAT, T), jnp.float32)
    h0 = 0.1 * jax.random.normal(kh, (1, B, HIDDEN), jnp.float32)
    c0 = 0.1 * jax.random.normal(kc, (1, B, HIDDEN), jnp.float32)

    logits, (hn, cn) = transcriber_forward(params, x, (h0, c0))
    logits = jax.block_until_ready(logits)
    hn = jax.block_until_ready(hn)
    cn = jax.block_until_ready(cn)

    ref_logits, (ref_hn, ref_cn) = transcriber_reference(params, x, (h0, c0))

    assert logits.shape == (T_OUT, B, NCLASS), logits.shape
    assert hn.shape == (1, B, HIDDEN) and cn.shape == (1, B, HIDDEN)
    assert bool(jnp.all(jnp.isfinite(logits)))
    assert jnp.allclose(logits, ref_logits, atol=2e-3, rtol=2e-3)
    assert jnp.allclose(hn, ref_hn, atol=2e-3, rtol=2e-3)
    assert jnp.allclose(cn, ref_cn, atol=2e-3, rtol=2e-3)
    print("KERNEL_OK")
</pallas_src>

<mosaic_0001>
module attributes {stable_mosaic.version = 11 : i64} {
  func.func @_fused_kernel(%arg0: memref<34x160xf32, #tpu.memory_space<vmem>>, %arg1: memref<160x128xf32, #tpu.memory_space<vmem>>, %arg2: memref<1x128xf32, #tpu.memory_space<vmem>>, %arg3: memref<1x128xf32, #tpu.memory_space<vmem>>, %arg4: memref<1x128xf32, #tpu.memory_space<vmem>>, %arg5: memref<128x128xf32, #tpu.memory_space<vmem>>, %arg6: memref<1x128xf32, #tpu.memory_space<vmem>>, %arg7: memref<1x128xf32, #tpu.memory_space<vmem>>, %arg8: memref<1x128xf32, #tpu.memory_space<vmem>>, %arg9: memref<128x128xf32, #tpu.memory_space<vmem>>, %arg10: memref<32x128xf32, #tpu.memory_space<vmem>>, %arg11: memref<1x128xf32, #tpu.memory_space<vmem>>, %arg12: memref<2x32xf32, #tpu.memory_space<vmem>>, %arg13: memref<2x32xf32, #tpu.memory_space<vmem>>, %arg14: memref<1x32xf32, #tpu.memory_space<vmem>>, %arg15: memref<1x32xf32, #tpu.memory_space<vmem>>, %arg16: memref<32x16xf32, #tpu.memory_space<vmem>>, %arg17: memref<1x16xf32, #tpu.memory_space<vmem>>, %arg18: memref<34x16xf32, #tpu.memory_space<vmem>>, %arg19: memref<2x32xf32, #tpu.memory_space<vmem>>, %arg20: memref<2x32xf32, #tpu.memory_space<vmem>>, %arg21: memref<34x128xf32, #tpu.memory_space<vmem>>, %arg22: memref<34x32xf32, #tpu.memory_space<vmem>>) attributes {dimension_semantics = [], scalar_prefetch = 0 : i64, scratch_operands = 2 : i64, tpu.core_type = #tpu.core_type<tc>} {
    %c0 = arith.constant 0 : index
    %c0_0 = arith.constant 0 : index
    %0 = vector.load %arg0[%c0, %c0_0] : memref<34x160xf32, #tpu.memory_space<vmem>>, vector<34x160xf32>
    %c0_1 = arith.constant 0 : index
    %c0_2 = arith.constant 0 : index
    %1 = vector.load %arg1[%c0_1, %c0_2] : memref<160x128xf32, #tpu.memory_space<vmem>>, vector<160x128xf32>
    %cst = arith.constant dense<0.000000e+00> : vector<34x128xf32>
    %2 = tpu.matmul %0, %1, %cst {dimension_numbers = #tpu.dot_dimension_numbers<[1], [0], [0], [1], [0, 0, 1, 1], [], []>} : vector<34x160xf32>, vector<160x128xf32>, vector<34x128xf32> -> vector<34x128xf32>
    %c0_3 = arith.constant 0 : index
    %c0_4 = arith.constant 0 : index
    %3 = vector.load %arg2[%c0_3, %c0_4] : memref<1x128xf32, #tpu.memory_space<vmem>>, vector<1x128xf32>
    %4 = vector.broadcast %3 : vector<1x128xf32> to vector<34x128xf32>
    %5 = arith.addf %2, %4 : vector<34x128xf32>
    %c0_5 = arith.constant 0 : index
    %c0_6 = arith.constant 0 : index
    %6 = vector.load %arg3[%c0_5, %c0_6] : memref<1x128xf32, #tpu.memory_space<vmem>>, vector<1x128xf32>
    %c0_7 = arith.constant 0 : index
    %c0_8 = arith.constant 0 : index
    %7 = vector.load %arg4[%c0_7, %c0_8] : memref<1x128xf32, #tpu.memory_space<vmem>>, vector<1x128xf32>
    %cst_9 = arith.constant dense<0.000000e+00> : vector<34xf32>
    %8 = vector.multi_reduction <add>, %5, %cst_9 [1] : vector<34x128xf32> to vector<34xf32>
    %9 = vector.shape_cast %8 : vector<34xf32> to vector<34x1xf32>
    %cst_10 = arith.constant 1.280000e+02 : f32
    %10 = vector.broadcast %cst_10 : f32 to vector<34x1xf32>
    %11 = arith.divf %9, %10 : vector<34x1xf32>
    %12 = vector.broadcast %11 : vector<34x1xf32> to vector<34x128xf32>
    %13 = arith.subf %5, %12 : vector<34x128xf32>
    %14 = arith.mulf %13, %13 : vector<34x128xf32>
    %cst_11 = arith.constant dense<0.000000e+00> : vector<34xf32>
    %15 = vector.multi_reduction <add>, %14, %cst_11 [1] : vector<34x128xf32> to vector<34xf32>
    %16 = vector.shape_cast %15 : vector<34xf32> to vector<34x1xf32>
    %cst_12 = arith.constant 1.280000e+02 : f32
    %17 = vector.broadcast %cst_12 : f32 to vector<34x1xf32>
    %18 = arith.divf %16, %17 : vector<34x1xf32>
    %19 = vector.broadcast %11 : vector<34x1xf32> to vector<34x128xf32>
    %20 = arith.subf %5, %19 : vector<34x128xf32>
    %cst_13 = arith.constant 9.99999974E-6 : f32
    %21 = vector.broadcast %cst_13 : f32 to vector<34x1xf32>
    %22 = arith.addf %18, %21 : vector<34x1xf32>
    %23 = math.rsqrt %22 : vector<34x1xf32>
    %24 = vector.broadcast %23 : vector<34x1xf32> to vector<34x128xf32>
    %25 = arith.mulf %20, %24 : vector<34x128xf32>
    %26 = vector.broadcast %6 : vector<1x128xf32> to vector<34x128xf32>
    %27 = arith.mulf %25, %26 : vector<34x128xf32>
    %28 = vector.broadcast %7 : vector<1x128xf32> to vector<34x128xf32>
    %29 = arith.addf %27, %28 : vector<34x128xf32>
    %cst_14 = arith.constant 5.000000e-01 : f32
    %30 = vector.broadcast %cst_14 : f32 to vector<34x128xf32>
    %31 = arith.mulf %30, %29 : vector<34x128xf32>
    %cst_15 = arith.constant 0.707106769 : f32
    %32 = vector.broadcast %cst_15 : f32 to vector<34x128xf32>
    %33 = arith.mulf %29, %32 : vector<34x128xf32>
    %cst_16 = arith.constant 0.000000e+00 : f32
    %34 = vector.broadcast %cst_16 : f32 to vector<34x128xf32>
    %35 = arith.cmpf oge, %33, %34 : vector<34x128xf32>
    %cst_17 = arith.constant 1.000000e+00 : f32
    %cst_18 = arith.constant -1.000000e+00 : f32
    %36 = vector.broadcast %cst_17 : f32 to vector<34x128xf32>
    %37 = vector.broadcast %cst_18 : f32 to vector<34x128xf32>
    %38 = arith.select %35, %36, %37 : vector<34x128xi1>, vector<34x128xf32>
    %39 = math.absf %33 : vector<34x128xf32>
    %cst_19 = arith.constant 0.327591091 : f32
    %40 = vector.broadcast %cst_19 : f32 to vector<34x128xf32>
    %41 = arith.mulf %40, %39 : vector<34x128xf32>
    %cst_20 = arith.constant 1.000000e+00 : f32
    %42 = vector.broadcast %cst_20 : f32 to vector<34x128xf32>
    %43 = arith.addf %42, %41 : vector<34x128xf32>
    %cst_21 = arith.constant 1.000000e+00 : f32
    %44 = vector.broadcast %cst_21 : f32 to vector<34x128xf32>
    %45 = arith.divf %44, %43 : vector<34x128xf32>
    %cst_22 = arith.constant 1.06140542 : f32
    %46 = vector.broadcast %cst_22 : f32 to vector<34x128xf32>
    %47 = arith.mulf %45, %46 : vector<34x128xf32>
    %cst_23 = arith.constant -1.45315206 : f32
    %48 = vector.broadcast %cst_23 : f32 to vector<34x128xf32>
    %49 = arith.addf %48, %47 : vector<34x128xf32>
    %50 = arith.mulf %45, %49 : vector<34x128xf32>
    %cst_24 = arith.constant 1.42141378 : f32
    %51 = vector.broadcast %cst_24 : f32 to vector<34x128xf32>
    %52 = arith.addf %51, %50 : vector<34x128xf32>
    %53 = arith.mulf %45, %52 : vector<34x128xf32>
    %cst_25 = arith.constant -0.284496725 : f32
    %54 = vector.broadcast %cst_25 : f32 to vector<34x128xf32>
    %55 = arith.addf %54, %53 : vector<34x128xf32>
    %56 = arith.mulf %45, %55 : vector<34x128xf32>
    %cst_26 = arith.constant 0.254829586 : f32
    %57 = vector.broadcast %cst_26 : f32 to vector<34x128xf32>
    %58 = arith.addf %57, %56 : vector<34x128xf32>
    %59 = arith.mulf %45, %58 : vector<34x128xf32>
    %cst_27 = arith.constant 0.000000e+00 : f32
    %60 = vector.broadcast %cst_27 : f32 to vector<34x128xf32>
    %61 = arith.subf %60, %39 : vector<34x128xf32>
    %62 = arith.mulf %61, %39 : vector<34x128xf32>
    %63 = math.exp %62 : vector<34x128xf32>
    %64 = arith.mulf %59, %63 : vector<34x128xf32>
    %cst_28 = arith.constant 1.000000e+00 : f32
    %65 = vector.broadcast %cst_28 : f32 to vector<34x128xf32>
    %66 = arith.subf %65, %64 : vector<34x128xf32>
    %67 = arith.mulf %38, %66 : vector<34x128xf32>
    %cst_29 = arith.constant 1.000000e+00 : f32
    %68 = vector.broadcast %cst_29 : f32 to vector<34x128xf32>
    %69 = arith.addf %68, %67 : vector<34x128xf32>
    %70 = arith.mulf %31, %69 : vector<34x128xf32>
    %c0_30 = arith.constant 0 : index
    %c0_31 = arith.constant 0 : index
    %71 = vector.load %arg5[%c0_30, %c0_31] : memref<128x128xf32, #tpu.memory_space<vmem>>, vector<128x128xf32>
    %cst_32 = arith.constant dense<0.000000e+00> : vector<34x128xf32>
    %72 = tpu.matmul %70, %71, %cst_32 {dimension_numbers = #tpu.dot_dimension_numbers<[1], [0], [0], [1], [0, 0, 1, 1], [], []>} : vector<34x128xf32>, vector<128x128xf32>, vector<34x128xf32> -> vector<34x128xf32>
    %c0_33 = arith.constant 0 : index
    %c0_34 = arith.constant 0 : index
    %73 = vector.load %arg6[%c0_33, %c0_34] : memref<1x128xf32, #tpu.memory_space<vmem>>, vector<1x128xf32>
    %74 = vector.broadcast %73 : vector<1x128xf32> to vector<34x128xf32>
    %75 = arith.addf %72, %74 : vector<34x128xf32>
    %c0_35 = arith.constant 0 : index
    %c0_36 = arith.constant 0 : index
    %76 = vector.load %arg7[%c0_35, %c0_36] : memref<1x128xf32, #tpu.memory_space<vmem>>, vector<1x128xf32>
    %c0_37 = arith.constant 0 : index
    %c0_38 = arith.constant 0 : index
    %77 = vector.load %arg8[%c0_37, %c0_38] : memref<1x128xf32, #tpu.memory_space<vmem>>, vector<1x128xf32>
    %cst_39 = arith.constant dense<0.000000e+00> : vector<34xf32>
    %78 = vector.multi_reduction <add>, %75, %cst_39 [1] : vector<34x128xf32> to vector<34xf32>
    %79 = vector.shape_cast %78 : vector<34xf32> to vector<34x1xf32>
    %cst_40 = arith.constant 1.280000e+02 : f32
    %80 = vector.broadcast %cst_40 : f32 to vector<34x1xf32>
    %81 = arith.divf %79, %80 : vector<34x1xf32>
    %82 = vector.broadcast %81 : vector<34x1xf32> to vector<34x128xf32>
    %83 = arith.subf %75, %82 : vector<34x128xf32>
    %84 = arith.mulf %83, %83 : vector<34x128xf32>
    %cst_41 = arith.constant dense<0.000000e+00> : vector<34xf32>
    %85 = vector.multi_reduction <add>, %84, %cst_41 [1] : vector<34x128xf32> to vector<34xf32>
    %86 = vector.shape_cast %85 : vector<34xf32> to vector<34x1xf32>
    %cst_42 = arith.constant 1.280000e+02 : f32
    %87 = vector.broadcast %cst_42 : f32 to vector<34x1xf32>
    %88 = arith.divf %86, %87 : vector<34x1xf32>
    %89 = vector.broadcast %81 : vector<34x1xf32> to vector<34x128xf32>
    %90 = arith.subf %75, %89 : vector<34x128xf32>
    %cst_43 = arith.constant 9.99999974E-6 : f32
    %91 = vector.broadcast %cst_43 : f32 to vector<34x1xf32>
    %92 = arith.addf %88, %91 : vector<34x1xf32>
    %93 = math.rsqrt %92 : vector<34x1xf32>
    %94 = vector.broadcast %93 : vector<34x1xf32> to vector<34x128xf32>
    %95 = arith.mulf %90, %94 : vector<34x128xf32>
    %96 = vector.broadcast %76 : vector<1x128xf32> to vector<34x128xf32>
    %97 = arith.mulf %95, %96 : vector<34x128xf32>
    %98 = vector.broadcast %77 : vector<1x128xf32> to vector<34x128xf32>
    %99 = arith.addf %97, %98 : vector<34x128xf32>
    %cst_44 = arith.constant 5.000000e-01 : f32
    %100 = vector.broadcast %cst_44 : f32 to vector<34x128xf32>
    %101 = arith.mulf %100, %99 : vector<34x128xf32>
    %cst_45 = arith.constant 0.707106769 : f32
    %102 = vector.broadcast %cst_45 : f32 to vector<34x128xf32>
    %103 = arith.mulf %99, %102 : vector<34x128xf32>
    %cst_46 = arith.constant 0.000000e+00 : f32
    %104 = vector.broadcast %cst_46 : f32 to vector<34x128xf32>
    %105 = arith.cmpf oge, %103, %104 : vector<34x128xf32>
    %cst_47 = arith.constant 1.000000e+00 : f32
    %cst_48 = arith.constant -1.000000e+00 : f32
    %106 = vector.broadcast %cst_47 : f32 to vector<34x128xf32>
    %107 = vector.broadcast %cst_48 : f32 to vector<34x128xf32>
    %108 = arith.select %105, %106, %107 : vector<34x128xi1>, vector<34x128xf32>
    %109 = math.absf %103 : vector<34x128xf32>
    %cst_49 = arith.constant 0.327591091 : f32
    %110 = vector.broadcast %cst_49 : f32 to vector<34x128xf32>
    %111 = arith.mulf %110, %109 : vector<34x128xf32>
    %cst_50 = arith.constant 1.000000e+00 : f32
    %112 = vector.broadcast %cst_50 : f32 to vector<34x128xf32>
    %113 = arith.addf %112, %111 : vector<34x128xf32>
    %cst_51 = arith.constant 1.000000e+00 : f32
    %114 = vector.broadcast %cst_51 : f32 to vector<34x128xf32>
    %115 = arith.divf %114, %113 : vector<34x128xf32>
    %cst_52 = arith.constant 1.06140542 : f32
    %116 = vector.broadcast %cst_52 : f32 to vector<34x128xf32>
    %117 = arith.mulf %115, %116 : vector<34x128xf32>
    %cst_53 = arith.constant -1.45315206 : f32
    %118 = vector.broadcast %cst_53 : f32 to vector<34x128xf32>
    %119 = arith.addf %118, %117 : vector<34x128xf32>
    %120 = arith.mulf %115, %119 : vector<34x128xf32>
    %cst_54 = arith.constant 1.42141378 : f32
    %121 = vector.broadcast %cst_54 : f32 to vector<34x128xf32>
    %122 = arith.addf %121, %120 : vector<34x128xf32>
    %123 = arith.mulf %115, %122 : vector<34x128xf32>
    %cst_55 = arith.constant -0.284496725 : f32
    %124 = vector.broadcast %cst_55 : f32 to vector<34x128xf32>
    %125 = arith.addf %124, %123 : vector<34x128xf32>
    %126 = arith.mulf %115, %125 : vector<34x128xf32>
    %cst_56 = arith.constant 0.254829586 : f32
    %127 = vector.broadcast %cst_56 : f32 to vector<34x128xf32>
    %128 = arith.addf %127, %126 : vector<34x128xf32>
    %129 = arith.mulf %115, %128 : vector<34x128xf32>
    %cst_57 = arith.constant 0.000000e+00 : f32
    %130 = vector.broadcast %cst_57 : f32 to vector<34x128xf32>
    %131 = arith.subf %130, %109 : vector<34x128xf32>
    %132 = arith.mulf %131, %109 : vector<34x128xf32>
    %133 = math.exp %132 : vector<34x128xf32>
    %134 = arith.mulf %129, %133 : vector<34x128xf32>
    %cst_58 = arith.constant 1.000000e+00 : f32
    %135 = vector.broadcast %cst_58 : f32 to vector<34x128xf32>
    %136 = arith.subf %135, %134 : vector<34x128xf32>
    %137 = arith.mulf %108, %136 : vector<34x128xf32>
    %cst_59 = arith.constant 1.000000e+00 : f32
    %138 = vector.broadcast %cst_59 : f32 to vector<34x128xf32>
    %139 = arith.addf %138, %137 : vector<34x128xf32>
    %140 = arith.mulf %101, %139 : vector<34x128xf32>
    %c0_60 = arith.constant 0 : index
    %c0_61 = arith.constant 0 : index
    %141 = vector.load %arg9[%c0_60, %c0_61] : memref<128x128xf32, #tpu.memory_space<vmem>>, vector<128x128xf32>
    %cst_62 = arith.constant dense<0.000000e+00> : vector<34x128xf32>
    %142 = tpu.matmul %140, %141, %cst_62 {dimension_numbers = #tpu.dot_dimension_numbers<[1], [0], [0], [1], [0, 0, 1, 1], [], []>} : vector<34x128xf32>, vector<128x128xf32>, vector<34x128xf32> -> vector<34x128xf32>
    %c0_63 = arith.constant 0 : index
    %c0_64 = arith.constant 0 : index
    %143 = vector.load %arg11[%c0_63, %c0_64] : memref<1x128xf32, #tpu.memory_space<vmem>>, vector<1x128xf32>
    %144 = vector.broadcast %143 : vector<1x128xf32> to vector<34x128xf32>
    %145 = arith.addf %142, %144 : vector<34x128xf32>
    %c0_65 = arith.constant 0 : index
    %c0_66 = arith.constant 0 : index
    %146 = vector.load %arg21[%c0_65, %c0_66] : memref<34x128xf32, #tpu.memory_space<vmem>>, vector<34x128xf32>
    tpu.vector_store %arg21[%c0_65, %c0_66], %145 {strides = array<i32>} : memref<34x128xf32, #tpu.memory_space<vmem>>, vector<34x128xf32>,
    %c0_67 = arith.constant 0 : index
    %c0_68 = arith.constant 0 : index
    %147 = vector.load %arg10[%c0_67, %c0_68] : memref<32x128xf32, #tpu.memory_space<vmem>>, vector<32x128xf32>
    %c0_69 = arith.constant 0 : index
    %c0_70 = arith.constant 0 : index
    %148 = vector.load %arg12[%c0_69, %c0_70] : memref<2x32xf32, #tpu.memory_space<vmem>>, vector<2x32xf32>
    %c0_71 = arith.constant 0 : index
    %c0_72 = arith.constant 0 : index
    %149 = vector.load %arg13[%c0_71, %c0_72] : memref<2x32xf32, #tpu.memory_space<vmem>>, vector<2x32xf32>
    %c0_73 = arith.constant 0 : index
    %c0_74 = arith.constant 0 : index
    %150 = vector.load %arg21[%c0_73, %c0_74] : memref<34x128xf32, #tpu.memory_space<vmem>>, vector<2x128xf32>
    %cst_75 = arith.constant dense<0.000000e+00> : vector<2x128xf32>
    %151 = tpu.matmul %148, %147, %cst_75 {dimension_numbers = #tpu.dot_dimension_numbers<[1], [0], [0], [1], [0, 0, 1, 1], [], []>} : vector<2x32xf32>, vector<32x128xf32>, vector<2x128xf32> -> vector<2x128xf32>
    %152 = arith.addf %150, %151 : vector<2x128xf32>
    %153 = arith.negf %152 : vector<2x128xf32>
    %154 = math.exp %153 : vector<2x128xf32>
    %cst_76 = arith.constant 1.000000e+00 : f32
    %155 = vector.broadcast %cst_76 : f32 to vector<2x128xf32>
    %156 = arith.addf %155, %154 : vector<2x128xf32>
    %157 = arith.divf %155, %156 : vector<2x128xf32>
    %158 = vector.extract_strided_slice %157 {offsets = [0, 0], sizes = [2, 32], strides = [1, 1]} : vector<2x128xf32> to vector<2x32xf32>
    %159 = vector.extract_strided_slice %157 {offsets = [0, 32], sizes = [2, 32], strides = [1, 1]} : vector<2x128xf32> to vector<2x32xf32>
    %160 = vector.extract_strided_slice %157 {offsets = [0, 96], sizes = [2, 32], strides = [1, 1]} : vector<2x128xf32> to vector<2x32xf32>
    %161 = vector.extract_strided_slice %152 {offsets = [0, 64], sizes = [2, 32], strides = [1, 1]} : vector<2x128xf32> to vector<2x32xf32>
    %162 = math.tanh %161 : vector<2x32xf32>
    %163 = arith.mulf %159, %149 : vector<2x32xf32>
    %164 = arith.mulf %158, %162 : vector<2x32xf32>
    %165 = arith.addf %163, %164 : vector<2x32xf32>
    %166 = math.tanh %165 : vector<2x32xf32>
    %167 = arith.mulf %160, %166 : vector<2x32xf32>
    %c0_77 = arith.constant 0 : index
    %c0_78 = arith.constant 0 : index
    %168 = vector.load %arg22[%c0_77, %c0_78] : memref<34x32xf32, #tpu.memory_space<vmem>>, vector<2x32xf32>
    tpu.vector_store %arg22[%c0_77, %c0_78], %167 {strides = array<i32>} : memref<34x32xf32, #tpu.memory_space<vmem>>, vector<2x32xf32>,
    %c2 = arith.constant 2 : index
    %c0_79 = arith.constant 0 : index
    %169 = vector.load %arg21[%c2, %c0_79] : memref<34x128xf32, #tpu.memory_space<vmem>>, vector<2x128xf32>
    %cst_80 = arith.constant dense<0.000000e+00> : vector<2x128xf32>
    %170 = tpu.matmul %167, %147, %cst_80 {dimension_numbers = #tpu.dot_dimension_numbers<[1], [0], [0], [1], [0, 0, 1, 1], [], []>} : vector<2x32xf32>, vector<32x128xf32>, vector<2x128xf32> -> vector<2x128xf32>
    %171 = arith.addf %169, %170 : vector<2x128xf32>
    %172 = arith.negf %171 : vector<2x128xf32>
    %173 = math.exp %172 : vector<2x128xf32>
    %cst_81 = arith.constant 1.000000e+00 : f32
    %174 = vector.broadcast %cst_81 : f32 to vector<2x128xf32>
    %175 = arith.addf %174, %173 : vector<2x128xf32>
    %176 = arith.divf %174, %175 : vector<2x128xf32>
    %177 = vector.extract_strided_slice %176 {offsets = [0, 0], sizes = [2, 32], strides = [1, 1]} : vector<2x128xf32> to vector<2x32xf32>
    %178 = vector.extract_strided_slice %176 {offsets = [0, 32], sizes = [2, 32], strides = [1, 1]} : vector<2x128xf32> to vector<2x32xf32>
    %179 = vector.extract_strided_slice %176 {offsets = [0, 96], sizes = [2, 32], strides = [1, 1]} : vector<2x128xf32> to vector<2x32xf32>
    %180 = vector.extract_strided_slice %171 {offsets = [0, 64], sizes = [2, 32], strides = [1, 1]} : vector<2x128xf32> to vector<2x32xf32>
    %181 = math.tanh %180 : vector<2x32xf32>
    %182 = arith.mulf %178, %165 : vector<2x32xf32>
    %183 = arith.mulf %177, %181 : vector<2x32xf32>
    %184 = arith.addf %182, %183 : vector<2x32xf32>
    %185 = math.tanh %184 : vector<2x32xf32>
    %186 = arith.mulf %179, %185 : vector<2x32xf32>
    %c2_82 = arith.constant 2 : index
    %c0_83 = arith.constant 0 : index
    %187 = vector.load %arg22[%c2_82, %c0_83] : memref<34x32xf32, #tpu.memory_space<vmem>>, vector<2x32xf32>
    tpu.vector_store %arg22[%c2_82, %c0_83], %186 {strides = array<i32>} : memref<34x32xf32, #tpu.memory_space<vmem>>, vector<2x32xf32>,
    %c4 = arith.constant 4 : index
    %c0_84 = arith.constant 0 : index
    %188 = vector.load %arg21[%c4, %c0_84] : memref<34x128xf32, #tpu.memory_space<vmem>>, vector<2x128xf32>
    %cst_85 = arith.constant dense<0.000000e+00> : vector<2x128xf32>
    %189 = tpu.matmul %186, %147, %cst_85 {dimension_numbers = #tpu.dot_dimension_numbers<[1], [0], [0], [1], [0, 0, 1, 1], [], []>} : vector<2x32xf32>, vector<32x128xf32>, vector<2x128xf32> -> vector<2x128xf32>
    %190 = arith.addf %188, %189 : vector<2x128xf32>
    %191 = arith.negf %190 : vector<2x128xf32>
    %192 = math.exp %191 : vector<2x128xf32>
    %cst_86 = arith.constant 1.000000e+00 : f32
    %193 = vector.broadcast %cst_86 : f32 to vector<2x128xf32>
    %194 = arith.addf %193, %192 : vector<2x128xf32>
    %195 = arith.divf %193, %194 : vector<2x128xf32>
    %196 = vector.extract_strided_slice %195 {offsets = [0, 0], sizes = [2, 32], strides = [1, 1]} : vector<2x128xf32> to vector<2x32xf32>
    %197 = vector.extract_strided_slice %195 {offsets = [0, 32], sizes = [2, 32], strides = [1, 1]} : vector<2x128xf32> to vector<2x32xf32>
    %198 = vector.extract_strided_slice %195 {offsets = [0, 96], sizes = [2, 32], strides = [1, 1]} : vector<2x128xf32> to vector<2x32xf32>
    %199 = vector.extract_strided_slice %190 {offsets = [0, 64], sizes = [2, 32], strides = [1, 1]} : vector<2x128xf32> to vector<2x32xf32>
    %200 = math.tanh %199 : vector<2x32xf32>
    %201 = arith.mulf %197, %184 : vector<2x32xf32>
    %202 = arith.mulf %196, %200 : vector<2x32xf32>
    %203 = arith.addf %201, %202 : vector<2x32xf32>
    %204 = math.tanh %203 : vector<2x32xf32>
    %205 = arith.mulf %198, %204 : vector<2x32xf32>
    %c4_87 = arith.constant 4 : index
    %c0_88 = arith.constant 0 : index
    %206 = vector.load %arg22[%c4_87, %c0_88] : memref<34x32xf32, #tpu.memory_space<vmem>>, vector<2x32xf32>
    tpu.vector_store %arg22[%c4_87, %c0_88], %205 {strides = array<i32>} : memref<34x32xf32, #tpu.memory_space<vmem>>, vector<2x32xf32>,
    %c6 = arith.constant 6 : index
    %c0_89 = arith.constant 0 : index
    %207 = vector.load %arg21[%c6, %c0_89] : memref<34x128xf32, #tpu.memory_space<vmem>>, vector<2x128xf32>
    %cst_90 = arith.constant dense<0.000000e+00> : vector<2x128xf32>
    %208 = tpu.matmul %205, %147, %cst_90 {dimension_numbers = #tpu.dot_dimension_numbers<[1], [0], [0], [1], [0, 0, 1, 1], [], []>} : vector<2x32xf32>, vector<32x128xf32>, vector<2x128xf32> -> vector<2x128xf32>
    %209 = arith.addf %207, %208 : vector<2x128xf32>
    %210 = arith.negf %209 : vector<2x128xf32>
    %211 = math.exp %210 : vector<2x128xf32>
    %cst_91 = arith.constant 1.000000e+00 : f32
    %212 = vector.broadcast %cst_91 : f32 to vector<2x128xf32>
    %213 = arith.addf %212, %211 : vector<2x128xf32>
    %214 = arith.divf %212, %213 : vector<2x128xf32>
    %215 = vector.extract_strided_slice %214 {offsets = [0, 0], sizes = [2, 32], strides = [1, 1]} : vector<2x128xf32> to vector<2x32xf32>
    %216 = vector.extract_strided_slice %214 {offsets = [0, 32], sizes = [2, 32], strides = [1, 1]} : vector<2x128xf32> to vector<2x32xf32>
    %217 = vector.extract_strided_slice %214 {offsets = [0, 96], sizes = [2, 32], strides = [1, 1]} : vector<2x128xf32> to vector<2x32xf32>
    %218 = vector.extract_strided_slice %209 {offsets = [0, 64], sizes = [2, 32], strides = [1, 1]} : vector<2x128xf32> to vector<2x32xf32>
    %219 = math.tanh %218 : vector<2x32xf32>
    %220 = arith.mulf %216, %203 : vector<2x32xf32>
    %221 = arith.mulf %215, %219 : vector<2x32xf32>
    %222 = arith.addf %220, %221 : vector<2x32xf32>
    %223 = math.tanh %222 : vector<2x32xf32>
    %224 = arith.mulf %217, %223 : vector<2x32xf32>
    %c6_92 = arith.constant 6 : index
    %c0_93 = arith.constant 0 : index
    %225 = vector.load %arg22[%c6_92, %c0_93] : memref<34x32xf32, #tpu.memory_space<vmem>>, vector<2x32xf32>
    tpu.vector_store %arg22[%c6_92, %c0_93], %224 {strides = array<i32>} : memref<34x32xf32, #tpu.memory_space<vmem>>, vector<2x32xf32>,
    %c8 = arith.constant 8 : index
    %c0_94 = arith.constant 0 : index
    %226 = vector.load %arg21[%c8, %c0_94] : memref<34x128xf32, #tpu.memory_space<vmem>>, vector<2x128xf32>
    %cst_95 = arith.constant dense<0.000000e+00> : vector<2x128xf32>
    %227 = tpu.matmul %224, %147, %cst_95 {dimension_numbers = #tpu.dot_dimension_numbers<[1], [0], [0], [1], [0, 0, 1, 1], [], []>} : vector<2x32xf32>, vector<32x128xf32>, vector<2x128xf32> -> vector<2x128xf32>
    %228 = arith.addf %226, %227 : vector<2x128xf32>
    %229 = arith.negf %228 : vector<2x128xf32>
    %230 = math.exp %229 : vector<2x128xf32>
    %cst_96 = arith.constant 1.000000e+00 : f32
    %231 = vector.broadcast %cst_96 : f32 to vector<2x128xf32>
    %232 = arith.addf %231, %230 : vector<2x128xf32>
    %233 = arith.divf %231, %232 : vector<2x128xf32>
    %234 = vector.extract_strided_slice %233 {offsets = [0, 0], sizes = [2, 32], strides = [1, 1]} : vector<2x128xf32> to vector<2x32xf32>
    %235 = vector.extract_strided_slice %233 {offsets = [0, 32], sizes = [2, 32], strides = [1, 1]} : vector<2x128xf32> to vector<2x32xf32>
    %236 = vector.extract_strided_slice %233 {offsets = [0, 96], sizes = [2, 32], strides = [1, 1]} : vector<2x128xf32> to vector<2x32xf32>
    %237 = vector.extract_strided_slice %228 {offsets = [0, 64], sizes = [2, 32], strides = [1, 1]} : vector<2x128xf32> to vector<2x32xf32>
    %238 = math.tanh %237 : vector<2x32xf32>
    %239 = arith.mulf %235, %222 : vector<2x32xf32>
    %240 = arith.mulf %234, %238 : vector<2x32xf32>
    %241 = arith.addf %239, %240 : vector<2x32xf32>
    %242 = math.tanh %241 : vector<2x32xf32>
    %243 = arith.mulf %236, %242 : vector<2x32xf32>
    %c8_97 = arith.constant 8 : index
    %c0_98 = arith.constant 0 : index
    %244 = vector.load %arg22[%c8_97, %c0_98] : memref<34x32xf32, #tpu.memory_space<vmem>>, vector<2x32xf32>
    tpu.vector_store %arg22[%c8_97, %c0_98], %243 {strides = array<i32>} : memref<34x32xf32, #tpu.memory_space<vmem>>, vector<2x32xf32>,
    %c10 = arith.constant 10 : index
    %c0_99 = arith.constant 0 : index
    %245 = vector.load %arg21[%c10, %c0_99] : memref<34x128xf32, #tpu.memory_space<vmem>>, vector<2x128xf32>
    %cst_100 = arith.constant dense<0.000000e+00> : vector<2x128xf32>
    %246 = tpu.matmul %243, %147, %cst_100 {dimension_numbers = #tpu.dot_dimension_numbers<[1], [0], [0], [1], [0, 0, 1, 1], [], []>} : vector<2x32xf32>, vector<32x128xf32>, vector<2x128xf32> -> vector<2x128xf32>
    %247 = arith.addf %245, %246 : vector<2x128xf32>
    %248 = arith.negf %247 : vector<2x128xf32>
    %249 = math.exp %248 : vector<2x128xf32>
    %cst_101 = arith.constant 1.000000e+00 : f32
    %250 = vector.broadcast %cst_101 : f32 to vector<2x128xf32>
    %251 = arith.addf %250, %249 : vector<2x128xf32>
    %252 = arith.divf %250, %251 : vector<2x128xf32>
    %253 = vector.extract_strided_slice %252 {offsets = [0, 0], sizes = [2, 32], strides = [1, 1]} : vector<2x128xf32> to vector<2x32xf32>
    %254 = vector.extract_strided_slice %252 {offsets = [0, 32], sizes = [2, 32], strides = [1, 1]} : vector<2x128xf32> to vector<2x32xf32>
    %255 = vector.extract_strided_slice %252 {offsets = [0, 96], sizes = [2, 32], strides = [1, 1]} : vector<2x128xf32> to vector<2x32xf32>
    %256 = vector.extract_strided_slice %247 {offsets = [0, 64], sizes = [2, 32], strides = [1, 1]} : vector<2x128xf32> to vector<2x32xf32>
    %257 = math.tanh %256 : vector<2x32xf32>
    %258 = arith.mulf %254, %241 : vector<2x32xf32>
    %259 = arith.mulf %253, %257 : vector<2x32xf32>
    %260 = arith.addf %258, %259 : vector<2x32xf32>
    %261 = math.tanh %260 : vector<2x32xf32>
    %262 = arith.mulf %255, %261 : vector<2x32xf32>
    %c10_102 = arith.constant 10 : index
    %c0_103 = arith.constant 0 : index
    %263 = vector.load %arg22[%c10_102, %c0_103] : memref<34x32xf32, #tpu.memory_space<vmem>>, vector<2x32xf32>
    tpu.vector_store %arg22[%c10_102, %c0_103], %262 {strides = array<i32>} : memref<34x32xf32, #tpu.memory_space<vmem>>, vector<2x32xf32>,
    %c12 = arith.constant 12 : index
    %c0_104 = arith.constant 0 : index
    %264 = vector.load %arg21[%c12, %c0_104] : memref<34x128xf32, #tpu.memory_space<vmem>>, vector<2x128xf32>
    %cst_105 = arith.constant dense<0.000000e+00> : vector<2x128xf32>
    %265 = tpu.matmul %262, %147, %cst_105 {dimension_numbers = #tpu.dot_dimension_numbers<[1], [0], [0], [1], [0, 0, 1, 1], [], []>} : vector<2x32xf32>, vector<32x128xf32>, vector<2x128xf32> -> vector<2x128xf32>
    %266 = arith.addf %264, %265 : vector<2x128xf32>
    %267 = arith.negf %266 : vector<2x128xf32>
    %268 = math.exp %267 : vector<2x128xf32>
    %cst_106 = arith.constant 1.000000e+00 : f32
    %269 = vector.broadcast %cst_106 : f32 to vector<2x128xf32>
    %270 = arith.addf %269, %268 : vector<2x128xf32>
    %271 = arith.divf %269, %270 : vector<2x128xf32>
    %272 = vector.extract_strided_slice %271 {offsets = [0, 0], sizes = [2, 32], strides = [1, 1]} : vector<2x128xf32> to vector<2x32xf32>
    %273 = vector.extract_strided_slice %271 {offsets = [0, 32], sizes = [2, 32], strides = [1, 1]} : vector<2x128xf32> to vector<2x32xf32>
    %274 = vector.extract_strided_slice %271 {offsets = [0, 96], sizes = [2, 32], strides = [1, 1]} : vector<2x128xf32> to vector<2x32xf32>
    %275 = vector.extract_strided_slice %266 {offsets = [0, 64], sizes = [2, 32], strides = [1, 1]} : vector<2x128xf32> to vector<2x32xf32>
    %276 = math.tanh %275 : vector<2x32xf32>
    %277 = arith.mulf %273, %260 : vector<2x32xf32>
    %278 = arith.mulf %272, %276 : vector<2x32xf32>
    %279 = arith.addf %277, %278 : vector<2x32xf32>
    %280 = math.tanh %279 : vector<2x32xf32>
    %281 = arith.mulf %274, %280 : vector<2x32xf32>
    %c12_107 = arith.constant 12 : index
    %c0_108 = arith.constant 0 : index
    %282 = vector.load %arg22[%c12_107, %c0_108] : memref<34x32xf32, #tpu.memory_space<vmem>>, vector<2x32xf32>
    tpu.vector_store %arg22[%c12_107, %c0_108], %281 {strides = array<i32>} : memref<34x32xf32, #tpu.memory_space<vmem>>, vector<2x32xf32>,
    %c14 = arith.constant 14 : index
    %c0_109 = arith.constant 0 : index
    %283 = vector.load %arg21[%c14, %c0_109] : memref<34x128xf32, #tpu.memory_space<vmem>>, vector<2x128xf32>
    %cst_110 = arith.constant dense<0.000000e+00> : vector<2x128xf32>
    %284 = tpu.matmul %281, %147, %cst_110 {dimension_numbers = #tpu.dot_dimension_numbers<[1], [0], [0], [1], [0, 0, 1, 1], [], []>} : vector<2x32xf32>, vector<32x128xf32>, vector<2x128xf32> -> vector<2x128xf32>
    %285 = arith.addf %283, %284 : vector<2x128xf32>
    %286 = arith.negf %285 : vector<2x128xf32>
    %287 = math.exp %286 : vector<2x128xf32>
    %cst_111 = arith.constant 1.000000e+00 : f32
    %288 = vector.broadcast %cst_111 : f32 to vector<2x128xf32>
    %289 = arith.addf %288, %287 : vector<2x128xf32>
    %290 = arith.divf %288, %289 : vector<2x128xf32>
    %291 = vector.extract_strided_slice %290 {offsets = [0, 0], sizes = [2, 32], strides = [1, 1]} : vector<2x128xf32> to vector<2x32xf32>
    %292 = vector.extract_strided_slice %290 {offsets = [0, 32], sizes = [2, 32], strides = [1, 1]} : vector<2x128xf32> to vector<2x32xf32>
    %293 = vector.extract_strided_slice %290 {offsets = [0, 96], sizes = [2, 32], strides = [1, 1]} : vector<2x128xf32> to vector<2x32xf32>
    %294 = vector.extract_strided_slice %285 {offsets = [0, 64], sizes = [2, 32], strides = [1, 1]} : vector<2x128xf32> to vector<2x32xf32>
    %295 = math.tanh %294 : vector<2x32xf32>
    %296 = arith.mulf %292, %279 : vector<2x32xf32>
    %297 = arith.mulf %291, %295 : vector<2x32xf32>
    %298 = arith.addf %296, %297 : vector<2x32xf32>
    %299 = math.tanh %298 : vector<2x32xf32>
    %300 = arith.mulf %293, %299 : vector<2x32xf32>
    %c14_112 = arith.constant 14 : index
    %c0_113 = arith.constant 0 : index
    %301 = vector.load %arg22[%c14_112, %c0_113] : memref<34x32xf32, #tpu.memory_space<vmem>>, vector<2x32xf32>
    tpu.vector_store %arg22[%c14_112, %c0_113], %300 {strides = array<i32>} : memref<34x32xf32, #tpu.memory_space<vmem>>, vector<2x32xf32>,
    %c16 = arith.constant 16 : index
    %c0_114 = arith.constant 0 : index
    %302 = vector.load %arg21[%c16, %c0_114] : memref<34x128xf32, #tpu.memory_space<vmem>>, vector<2x128xf32>
    %cst_115 = arith.constant dense<0.000000e+00> : vector<2x128xf32>
    %303 = tpu.matmul %300, %147, %cst_115 {dimension_numbers = #tpu.dot_dimension_numbers<[1], [0], [0], [1], [0, 0, 1, 1], [], []>} : vector<2x32xf32>, vector<32x128xf32>, vector<2x128xf32> -> vector<2x128xf32>
    %304 = arith.addf %302, %303 : vector<2x128xf32>
    %305 = arith.negf %304 : vector<2x128xf32>
    %306 = math.exp %305 : vector<2x128xf32>
    %cst_116 = arith.constant 1.000000e+00 : f32
    %307 = vector.broadcast %cst_116 : f32 to vector<2x128xf32>
    %308 = arith.addf %307, %306 : vector<2x128xf32>
    %309 = arith.divf %307, %308 : vector<2x128xf32>
    %310 = vector.extract_strided_slice %309 {offsets = [0, 0], sizes = [2, 32], strides = [1, 1]} : vector<2x128xf32> to vector<2x32xf32>
    %311 = vector.extract_strided_slice %309 {offsets = [0, 32], sizes = [2, 32], strides = [1, 1]} : vector<2x128xf32> to vector<2x32xf32>
    %312 = vector.extract_strided_slice %309 {offsets = [0, 96], sizes = [2, 32], strides = [1, 1]} : vector<2x128xf32> to vector<2x32xf32>
    %313 = vector.extract_strided_slice %304 {offsets = [0, 64], sizes = [2, 32], strides = [1, 1]} : vector<2x128xf32> to vector<2x32xf32>
    %314 = math.tanh %313 : vector<2x32xf32>
    %315 = arith.mulf %311, %298 : vector<2x32xf32>
    %316 = arith.mulf %310, %314 : vector<2x32xf32>
    %317 = arith.addf %315, %316 : vector<2x32xf32>
    %318 = math.tanh %317 : vector<2x32xf32>
    %319 = arith.mulf %312, %318 : vector<2x32xf32>
    %c16_117 = arith.constant 16 : index
    %c0_118 = arith.constant 0 : index
    %320 = vector.load %arg22[%c16_117, %c0_118] : memref<34x32xf32, #tpu.memory_space<vmem>>, vector<2x32xf32>
    tpu.vector_store %arg22[%c16_117, %c0_118], %319 {strides = array<i32>} : memref<34x32xf32, #tpu.memory_space<vmem>>, vector<2x32xf32>,
    %c18 = arith.constant 18 : index
    %c0_119 = arith.constant 0 : index
    %321 = vector.load %arg21[%c18, %c0_119] : memref<34x128xf32, #tpu.memory_space<vmem>>, vector<2x128xf32>
    %cst_120 = arith.constant dense<0.000000e+00> : vector<2x128xf32>
    %322 = tpu.matmul %319, %147, %cst_120 {dimension_numbers = #tpu.dot_dimension_numbers<[1], [0], [0], [1], [0, 0, 1, 1], [], []>} : vector<2x32xf32>, vector<32x128xf32>, vector<2x128xf32> -> vector<2x128xf32>
    %323 = arith.addf %321, %322 : vector<2x128xf32>
    %324 = arith.negf %323 : vector<2x128xf32>
    %325 = math.exp %324 : vector<2x128xf32>
    %cst_121 = arith.constant 1.000000e+00 : f32
    %326 = vector.broadcast %cst_121 : f32 to vector<2x128xf32>
    %327 = arith.addf %326, %325 : vector<2x128xf32>
    %328 = arith.divf %326, %327 : vector<2x128xf32>
    %329 = vector.extract_strided_slice %328 {offsets = [0, 0], sizes = [2, 32], strides = [1, 1]} : vector<2x128xf32> to vector<2x32xf32>
    %330 = vector.extract_strided_slice %328 {offsets = [0, 32], sizes = [2, 32], strides = [1, 1]} : vector<2x128xf32> to vector<2x32xf32>
    %331 = vector.extract_strided_slice %328 {offsets = [0, 96], sizes = [2, 32], strides = [1, 1]} : vector<2x128xf32> to vector<2x32xf32>
    %332 = vector.extract_strided_slice %323 {offsets = [0, 64], sizes = [2, 32], strides = [1, 1]} : vector<2x128xf32> to vector<2x32xf32>
    %333 = math.tanh %332 : vector<2x32xf32>
    %334 = arith.mulf %330, %317 : vector<2x32xf32>
    %335 = arith.mulf %329, %333 : vector<2x32xf32>
    %336 = arith.addf %334, %335 : vector<2x32xf32>
    %337 = math.tanh %336 : vector<2x32xf32>
    %338 = arith.mulf %331, %337 : vector<2x32xf32>
    %c18_122 = arith.constant 18 : index
    %c0_123 = arith.constant 0 : index
    %339 = vector.load %arg22[%c18_122, %c0_123] : memref<34x32xf32, #tpu.memory_space<vmem>>, vector<2x32xf32>
    tpu.vector_store %arg22[%c18_122, %c0_123], %338 {strides = array<i32>} : memref<34x32xf32, #tpu.memory_space<vmem>>, vector<2x32xf32>,
    %c20 = arith.constant 20 : index
    %c0_124 = arith.constant 0 : index
    %340 = vector.load %arg21[%c20, %c0_124] : memref<34x128xf32, #tpu.memory_space<vmem>>, vector<2x128xf32>
    %cst_125 = arith.constant dense<0.000000e+00> : vector<2x128xf32>
    %341 = tpu.matmul %338, %147, %cst_125 {dimension_numbers = #tpu.dot_dimension_numbers<[1], [0], [0], [1], [0, 0, 1, 1], [], []>} : vector<2x32xf32>, vector<32x128xf32>, vector<2x128xf32> -> vector<2x128xf32>
    %342 = arith.addf %340, %341 : vector<2x128xf32>
    %343 = arith.negf %342 : vector<2x128xf32>
    %344 = math.exp %343 : vector<2x128xf32>
    %cst_126 = arith.constant 1.000000e+00 : f32
    %345 = vector.broadcast %cst_126 : f32 to vector<2x128xf32>
    %346 = arith.addf %345, %344 : vector<2x128xf32>
    %347 = arith.divf %345, %346 : vector<2x128xf32>
    %348 = vector.extract_strided_slice %347 {offsets = [0, 0], sizes = [2, 32], strides = [1, 1]} : vector<2x128xf32> to vector<2x32xf32>
    %349 = vector.extract_strided_slice %347 {offsets = [0, 32], sizes = [2, 32], strides = [1, 1]} : vector<2x128xf32> to vector<2x32xf32>
    %350 = vector.extract_strided_slice %347 {offsets = [0, 96], sizes = [2, 32], strides = [1, 1]} : vector<2x128xf32> to vector<2x32xf32>
    %351 = vector.extract_strided_slice %342 {offsets = [0, 64], sizes = [2, 32], strides = [1, 1]} : vector<2x128xf32> to vector<2x32xf32>
    %352 = math.tanh %351 : vector<2x32xf32>
    %353 = arith.mulf %349, %336 : vector<2x32xf32>
    %354 = arith.mulf %348, %352 : vector<2x32xf32>
    %355 = arith.addf %353, %354 : vector<2x32xf32>
    %356 = math.tanh %355 : vector<2x32xf32>
    %357 = arith.mulf %350, %356 : vector<2x32xf32>
    %c20_127 = arith.constant 20 : index
    %c0_128 = arith.constant 0 : index
    %358 = vector.load %arg22[%c20_127, %c0_128] : memref<34x32xf32, #tpu.memory_space<vmem>>, vector<2x32xf32>
    tpu.vector_store %arg22[%c20_127, %c0_128], %357 {strides = array<i32>} : memref<34x32xf32, #tpu.memory_space<vmem>>, vector<2x32xf32>,
    %c22 = arith.constant 22 : index
    %c0_129 = arith.constant 0 : index
    %359 = vector.load %arg21[%c22, %c0_129] : memref<34x128xf32, #tpu.memory_space<vmem>>, vector<2x128xf32>
    %cst_130 = arith.constant dense<0.000000e+00> : vector<2x128xf32>
    %360 = tpu.matmul %357, %147, %cst_130 {dimension_numbers = #tpu.dot_dimension_numbers<[1], [0], [0], [1], [0, 0, 1, 1], [], []>} : vector<2x32xf32>, vector<32x128xf32>, vector<2x128xf32> -> vector<2x128xf32>
    %361 = arith.addf %359, %360 : vector<2x128xf32>
    %362 = arith.negf %361 : vector<2x128xf32>
    %363 = math.exp %362 : vector<2x128xf32>
    %cst_131 = arith.constant 1.000000e+00 : f32
    %364 = vector.broadcast %cst_131 : f32 to vector<2x128xf32>
    %365 = arith.addf %364, %363 : vector<2x128xf32>
    %366 = arith.divf %364, %365 : vector<2x128xf32>
    %367 = vector.extract_strided_slice %366 {offsets = [0, 0], sizes = [2, 32], strides = [1, 1]} : vector<2x128xf32> to vector<2x32xf32>
    %368 = vector.extract_strided_slice %366 {offsets = [0, 32], sizes = [2, 32], strides = [1, 1]} : vector<2x128xf32> to vector<2x32xf32>
    %369 = vector.extract_strided_slice %366 {offsets = [0, 96], sizes = [2, 32], strides = [1, 1]} : vector<2x128xf32> to vector<2x32xf32>
    %370 = vector.extract_strided_slice %361 {offsets = [0, 64], sizes = [2, 32], strides = [1, 1]} : vector<2x128xf32> to vector<2x32xf32>
    %371 = math.tanh %370 : vector<2x32xf32>
    %372 = arith.mulf %368, %355 : vector<2x32xf32>
    %373 = arith.mulf %367, %371 : vector<2x32xf32>
    %374 = arith.addf %372, %373 : vector<2x32xf32>
    %375 = math.tanh %374 : vector<2x32xf32>
    %376 = arith.mulf %369, %375 : vector<2x32xf32>
    %c22_132 = arith.constant 22 : index
    %c0_133 = arith.constant 0 : index
    %377 = vector.load %arg22[%c22_132, %c0_133] : memref<34x32xf32, #tpu.memory_space<vmem>>, vector<2x32xf32>
    tpu.vector_store %arg22[%c22_132, %c0_133], %376 {strides = array<i32>} : memref<34x32xf32, #tpu.memory_space<vmem>>, vector<2x32xf32>,
    %c24 = arith.constant 24 : index
    %c0_134 = arith.constant 0 : index
    %378 = vector.load %arg21[%c24, %c0_134] : memref<34x128xf32, #tpu.memory_space<vmem>>, vector<2x128xf32>
    %cst_135 = arith.constant dense<0.000000e+00> : vector<2x128xf32>
    %379 = tpu.matmul %376, %147, %cst_135 {dimension_numbers = #tpu.dot_dimension_numbers<[1], [0], [0], [1], [0, 0, 1, 1], [], []>} : vector<2x32xf32>, vector<32x128xf32>, vector<2x128xf32> -> vector<2x128xf32>
    %380 = arith.addf %378, %379 : vector<2x128xf32>
    %381 = arith.negf %380 : vector<2x128xf32>
    %382 = math.exp %381 : vector<2x128xf32>
    %cst_136 = arith.constant 1.000000e+00 : f32
    %383 = vector.broadcast %cst_136 : f32 to vector<2x128xf32>
    %384 = arith.addf %383, %382 : vector<2x128xf32>
    %385 = arith.divf %383, %384 : vector<2x128xf32>
    %386 = vector.extract_strided_slice %385 {offsets = [0, 0], sizes = [2, 32], strides = [1, 1]} : vector<2x128xf32> to vector<2x32xf32>
    %387 = vector.extract_strided_slice %385 {offsets = [0, 32], sizes = [2, 32], strides = [1, 1]} : vector<2x128xf32> to vector<2x32xf32>
    %388 = vector.extract_strided_slice %385 {offsets = [0, 96], sizes = [2, 32], strides = [1, 1]} : vector<2x128xf32> to vector<2x32xf32>
    %389 = vector.extract_strided_slice %380 {offsets = [0, 64], sizes = [2, 32], strides = [1, 1]} : vector<2x128xf32> to vector<2x32xf32>
    %390 = math.tanh %389 : vector<2x32xf32>
    %391 = arith.mulf %387, %374 : vector<2x32xf32>
    %392 = arith.mulf %386, %390 : vector<2x32xf32>
    %393 = arith.addf %391, %392 : vector<2x32xf32>
    %394 = math.tanh %393 : vector<2x32xf32>
    %395 = arith.mulf %388, %394 : vector<2x32xf32>
    %c24_137 = arith.constant 24 : index
    %c0_138 = arith.constant 0 : index
    %396 = vector.load %arg22[%c24_137, %c0_138] : memref<34x32xf32, #tpu.memory_space<vmem>>, vector<2x32xf32>
    tpu.vector_store %arg22[%c24_137, %c0_138], %395 {strides = array<i32>} : memref<34x32xf32, #tpu.memory_space<vmem>>, vector<2x32xf32>,
    %c26 = arith.constant 26 : index
    %c0_139 = arith.constant 0 : index
    %397 = vector.load %arg21[%c26, %c0_139] : memref<34x128xf32, #tpu.memory_space<vmem>>, vector<2x128xf32>
    %cst_140 = arith.constant dense<0.000000e+00> : vector<2x128xf32>
    %398 = tpu.matmul %395, %147, %cst_140 {dimension_numbers = #tpu.dot_dimension_numbers<[1], [0], [0], [1], [0, 0, 1, 1], [], []>} : vector<2x32xf32>, vector<32x128xf32>, vector<2x128xf32> -> vector<2x128xf32>
    %399 = arith.addf %397, %398 : vector<2x128xf32>
    %400 = arith.negf %399 : vector<2x128xf32>
    %401 = math.exp %400 : vector<2x128xf32>
    %cst_141 = arith.constant 1.000000e+00 : f32
    %402 = vector.broadcast %cst_141 : f32 to vector<2x128xf32>
    %403 = arith.addf %402, %401 : vector<2x128xf32>
    %404 = arith.divf %402, %403 : vector<2x128xf32>
    %405 = vector.extract_strided_slice %404 {offsets = [0, 0], sizes = [2, 32], strides = [1, 1]} : vector<2x128xf32> to vector<2x32xf32>
    %406 = vector.extract_strided_slice %404 {offsets = [0, 32], sizes = [2, 32], strides = [1, 1]} : vector<2x128xf32> to vector<2x32xf32>
    %407 = vector.extract_strided_slice %404 {offsets = [0, 96], sizes = [2, 32], strides = [1, 1]} : vector<2x128xf32> to vector<2x32xf32>
    %408 = vector.extract_strided_slice %399 {offsets = [0, 64], sizes = [2, 32], strides = [1, 1]} : vector<2x128xf32> to vector<2x32xf32>
    %409 = math.tanh %408 : vector<2x32xf32>
    %410 = arith.mulf %406, %393 : vector<2x32xf32>
    %411 = arith.mulf %405, %409 : vector<2x32xf32>
    %412 = arith.addf %410, %411 : vector<2x32xf32>
    %413 = math.tanh %412 : vector<2x32xf32>
    %414 = arith.mulf %407, %413 : vector<2x32xf32>
    %c26_142 = arith.constant 26 : index
    %c0_143 = arith.constant 0 : index
    %415 = vector.load %arg22[%c26_142, %c0_143] : memref<34x32xf32, #tpu.memory_space<vmem>>, vector<2x32xf32>
    tpu.vector_store %arg22[%c26_142, %c0_143], %414 {strides = array<i32>} : memref<34x32xf32, #tpu.memory_space<vmem>>, vector<2x32xf32>,
    %c28 = arith.constant 28 : index
    %c0_144 = arith.constant 0 : index
    %416 = vector.load %arg21[%c28, %c0_144] : memref<34x128xf32, #tpu.memory_space<vmem>>, vector<2x128xf32>
    %cst_145 = arith.constant dense<0.000000e+00> : vector<2x128xf32>
    %417 = tpu.matmul %414, %147, %cst_145 {dimension_numbers = #tpu.dot_dimension_numbers<[1], [0], [0], [1], [0, 0, 1, 1], [], []>} : vector<2x32xf32>, vector<32x128xf32>, vector<2x128xf32> -> vector<2x128xf32>
    %418 = arith.addf %416, %417 : vector<2x128xf32>
    %419 = arith.negf %418 : vector<2x128xf32>
    %420 = math.exp %419 : vector<2x128xf32>
    %cst_146 = arith.constant 1.000000e+00 : f32
    %421 = vector.broadcast %cst_146 : f32 to vector<2x128xf32>
    %422 = arith.addf %421, %420 : vector<2x128xf32>
    %423 = arith.divf %421, %422 : vector<2x128xf32>
    %424 = vector.extract_strided_slice %423 {offsets = [0, 0], sizes = [2, 32], strides = [1, 1]} : vector<2x128xf32> to vector<2x32xf32>
    %425 = vector.extract_strided_slice %423 {offsets = [0, 32], sizes = [2, 32], strides = [1, 1]} : vector<2x128xf32> to vector<2x32xf32>
    %426 = vector.extract_strided_slice %423 {offsets = [0, 96], sizes = [2, 32], strides = [1, 1]} : vector<2x128xf32> to vector<2x32xf32>
    %427 = vector.extract_strided_slice %418 {offsets = [0, 64], sizes = [2, 32], strides = [1, 1]} : vector<2x128xf32> to vector<2x32xf32>
    %428 = math.tanh %427 : vector<2x32xf32>
    %429 = arith.mulf %425, %412 : vector<2x32xf32>
    %430 = arith.mulf %424, %428 : vector<2x32xf32>
    %431 = arith.addf %429, %430 : vector<2x32xf32>
    %432 = math.tanh %431 : vector<2x32xf32>
    %433 = arith.mulf %426, %432 : vector<2x32xf32>
    %c28_147 = arith.constant 28 : index
    %c0_148 = arith.constant 0 : index
    %434 = vector.load %arg22[%c28_147, %c0_148] : memref<34x32xf32, #tpu.memory_space<vmem>>, vector<2x32xf32>
    tpu.vector_store %arg22[%c28_147, %c0_148], %433 {strides = array<i32>} : memref<34x32xf32, #tpu.memory_space<vmem>>, vector<2x32xf32>,
    %c30 = arith.constant 30 : index
    %c0_149 = arith.constant 0 : index
    %435 = vector.load %arg21[%c30, %c0_149] : memref<34x128xf32, #tpu.memory_space<vmem>>, vector<2x128xf32>
    %cst_150 = arith.constant dense<0.000000e+00> : vector<2x128xf32>
    %436 = tpu.matmul %433, %147, %cst_150 {dimension_numbers = #tpu.dot_dimension_numbers<[1], [0], [0], [1], [0, 0, 1, 1], [], []>} : vector<2x32xf32>, vector<32x128xf32>, vector<2x128xf32> -> vector<2x128xf32>
    %437 = arith.addf %435, %436 : vector<2x128xf32>
    %438 = arith.negf %437 : vector<2x128xf32>
    %439 = math.exp %438 : vector<2x128xf32>
    %cst_151 = arith.constant 1.000000e+00 : f32
    %440 = vector.broadcast %cst_151 : f32 to vector<2x128xf32>
    %441 = arith.addf %440, %439 : vector<2x128xf32>
    %442 = arith.divf %440, %441 : vector<2x128xf32>
    %443 = vector.extract_strided_slice %442 {offsets = [0, 0], sizes = [2, 32], strides = [1, 1]} : vector<2x128xf32> to vector<2x32xf32>
    %444 = vector.extract_strided_slice %442 {offsets = [0, 32], sizes = [2, 32], strides = [1, 1]} : vector<2x128xf32> to vector<2x32xf32>
    %445 = vector.extract_strided_slice %442 {offsets = [0, 96], sizes = [2, 32], strides = [1, 1]} : vector<2x128xf32> to vector<2x32xf32>
    %446 = vector.extract_strided_slice %437 {offsets = [0, 64], sizes = [2, 32], strides = [1, 1]} : vector<2x128xf32> to vector<2x32xf32>
    %447 = math.tanh %446 : vector<2x32xf32>
    %448 = arith.mulf %444, %431 : vector<2x32xf32>
    %449 = arith.mulf %443, %447 : vector<2x32xf32>
    %450 = arith.addf %448, %449 : vector<2x32xf32>
    %451 = math.tanh %450 : vector<2x32xf32>
    %452 = arith.mulf %445, %451 : vector<2x32xf32>
    %c30_152 = arith.constant 30 : index
    %c0_153 = arith.constant 0 : index
    %453 = vector.load %arg22[%c30_152, %c0_153] : memref<34x32xf32, #tpu.memory_space<vmem>>, vector<2x32xf32>
    tpu.vector_store %arg22[%c30_152, %c0_153], %452 {strides = array<i32>} : memref<34x32xf32, #tpu.memory_space<vmem>>, vector<2x32xf32>,
    %c32 = arith.constant 32 : index
    %c0_154 = arith.constant 0 : index
    %454 = vector.load %arg21[%c32, %c0_154] : memref<34x128xf32, #tpu.memory_space<vmem>>, vector<2x128xf32>
    %cst_155 = arith.constant dense<0.000000e+00> : vector<2x128xf32>
    %455 = tpu.matmul %452, %147, %cst_155 {dimension_numbers = #tpu.dot_dimension_numbers<[1], [0], [0], [1], [0, 0, 1, 1], [], []>} : vector<2x32xf32>, vector<32x128xf32>, vector<2x128xf32> -> vector<2x128xf32>
    %456 = arith.addf %454, %455 : vector<2x128xf32>
    %457 = arith.negf %456 : vector<2x128xf32>
    %458 = math.exp %457 : vector<2x128xf32>
    %cst_156 = arith.constant 1.000000e+00 : f32
    %459 = vector.broadcast %cst_156 : f32 to vector<2x128xf32>
    %460 = arith.addf %459, %458 : vector<2x128xf32>
    %461 = arith.divf %459, %460 : vector<2x128xf32>
    %462 = vector.extract_strided_slice %461 {offsets = [0, 0], sizes = [2, 32], strides = [1, 1]} : vector<2x128xf32> to vector<2x32xf32>
    %463 = vector.extract_strided_slice %461 {offsets = [0, 32], sizes = [2, 32], strides = [1, 1]} : vector<2x128xf32> to vector<2x32xf32>
    %464 = vector.extract_strided_slice %461 {offsets = [0, 96], sizes = [2, 32], strides = [1, 1]} : vector<2x128xf32> to vector<2x32xf32>
    %465 = vector.extract_strided_slice %456 {offsets = [0, 64], sizes = [2, 32], strides = [1, 1]} : vector<2x128xf32> to vector<2x32xf32>
    %466 = math.tanh %465 : vector<2x32xf32>
    %467 = arith.mulf %463, %450 : vector<2x32xf32>
    %468 = arith.mulf %462, %466 : vector<2x32xf32>
    %469 = arith.addf %467, %468 : vector<2x32xf32>
    %470 = math.tanh %469 : vector<2x32xf32>
    %471 = arith.mulf %464, %470 : vector<2x32xf32>
    %c32_157 = arith.constant 32 : index
    %c0_158 = arith.constant 0 : index
    %472 = vector.load %arg22[%c32_157, %c0_158] : memref<34x32xf32, #tpu.memory_space<vmem>>, vector<2x32xf32>
    tpu.vector_store %arg22[%c32_157, %c0_158], %471 {strides = array<i32>} : memref<34x32xf32, #tpu.memory_space<vmem>>, vector<2x32xf32>,
    %c0_159 = arith.constant 0 : index
    %c0_160 = arith.constant 0 : index
    %473 = vector.load %arg19[%c0_159, %c0_160] : memref<2x32xf32, #tpu.memory_space<vmem>>, vector<2x32xf32>
    tpu.vector_store %arg19[%c0_159, %c0_160], %471 {strides = array<i32>} : memref<2x32xf32, #tpu.memory_space<vmem>>, vector<2x32xf32>,
    %c0_161 = arith.constant 0 : index
    %c0_162 = arith.constant 0 : index
    %474 = vector.load %arg20[%c0_161, %c0_162] : memref<2x32xf32, #tpu.memory_space<vmem>>, vector<2x32xf32>
    tpu.vector_store %arg20[%c0_161, %c0_162], %469 {strides = array<i32>} : memref<2x32xf32, #tpu.memory_space<vmem>>, vector<2x32xf32>,
    %c0_163 = arith.constant 0 : index
    %c0_164 = arith.constant 0 : index
    %475 = vector.load %arg22[%c0_163, %c0_164] : memref<34x32xf32, #tpu.memory_space<vmem>>, vector<34x32xf32>
    %c0_165 = arith.constant 0 : index
    %c0_166 = arith.constant 0 : index
    %476 = vector.load %arg14[%c0_165, %c0_166] : memref<1x32xf32, #tpu.memory_space<vmem>>, vector<1x32xf32>
    %c0_167 = arith.constant 0 : index
    %c0_168 = arith.constant 0 : index
    %477 = vector.load %arg15[%c0_167, %c0_168] : memref<1x32xf32, #tpu.memory_space<vmem>>, vector<1x32xf32>
    %cst_169 = arith.constant dense<0.000000e+00> : vector<34xf32>
    %478 = vector.multi_reduction <add>, %475, %cst_169 [1] : vector<34x32xf32> to vector<34xf32>
    %479 = vector.shape_cast %478 : vector<34xf32> to vector<34x1xf32>
    %cst_170 = arith.constant 3.200000e+01 : f32
    %480 = vector.broadcast %cst_170 : f32 to vector<34x1xf32>
    %481 = arith.divf %479, %480 : vector<34x1xf32>
    %482 = vector.broadcast %481 : vector<34x1xf32> to vector<34x32xf32>
    %483 = arith.subf %475, %482 : vector<34x32xf32>
    %484 = arith.mulf %483, %483 : vector<34x32xf32>
    %cst_171 = arith.constant dense<0.000000e+00> : vector<34xf32>
    %485 = vector.multi_reduction <add>, %484, %cst_171 [1] : vector<34x32xf32> to vector<34xf32>
    %486 = vector.shape_cast %485 : vector<34xf32> to vector<34x1xf32>
    %cst_172 = arith.constant 3.200000e+01 : f32
    %487 = vector.broadcast %cst_172 : f32 to vector<34x1xf32>
    %488 = arith.divf %486, %487 : vector<34x1xf32>
    %489 = vector.broadcast %481 : vector<34x1xf32> to vector<34x32xf32>
    %490 = arith.subf %475, %489 : vector<34x32xf32>
    %cst_173 = arith.constant 9.99999974E-6 : f32
    %491 = vector.broadcast %cst_173 : f32 to vector<34x1xf32>
    %492 = arith.addf %488, %491 : vector<34x1xf32>
    %493 = math.rsqrt %492 : vector<34x1xf32>
    %494 = vector.broadcast %493 : vector<34x1xf32> to vector<34x32xf32>
    %495 = arith.mulf %490, %494 : vector<34x32xf32>
    %496 = vector.broadcast %476 : vector<1x32xf32> to vector<34x32xf32>
    %497 = arith.mulf %495, %496 : vector<34x32xf32>
    %498 = vector.broadcast %477 : vector<1x32xf32> to vector<34x32xf32>
    %499 = arith.addf %497, %498 : vector<34x32xf32>
    %cst_174 = arith.constant 5.000000e-01 : f32
    %500 = vector.broadcast %cst_174 : f32 to vector<34x32xf32>
    %501 = arith.mulf %500, %499 : vector<34x32xf32>
    %cst_175 = arith.constant 0.707106769 : f32
    %502 = vector.broadcast %cst_175 : f32 to vector<34x32xf32>
    %503 = arith.mulf %499, %502 : vector<34x32xf32>
    %cst_176 = arith.constant 0.000000e+00 : f32
    %504 = vector.broadcast %cst_176 : f32 to vector<34x32xf32>
    %505 = arith.cmpf oge, %503, %504 : vector<34x32xf32>
    %cst_177 = arith.constant 1.000000e+00 : f32
    %cst_178 = arith.constant -1.000000e+00 : f32
    %506 = vector.broadcast %cst_177 : f32 to vector<34x32xf32>
    %507 = vector.broadcast %cst_178 : f32 to vector<34x32xf32>
    %508 = arith.select %505, %506, %507 : vector<34x32xi1>, vector<34x32xf32>
    %509 = math.absf %503 : vector<34x32xf32>
    %cst_179 = arith.constant 0.327591091 : f32
    %510 = vector.broadcast %cst_179 : f32 to vector<34x32xf32>
    %511 = arith.mulf %510, %509 : vector<34x32xf32>
    %cst_180 = arith.constant 1.000000e+00 : f32
    %512 = vector.broadcast %cst_180 : f32 to vector<34x32xf32>
    %513 = arith.addf %512, %511 : vector<34x32xf32>
    %cst_181 = arith.constant 1.000000e+00 : f32
    %514 = vector.broadcast %cst_181 : f32 to vector<34x32xf32>
    %515 = arith.divf %514, %513 : vector<34x32xf32>
    %cst_182 = arith.constant 1.06140542 : f32
    %516 = vector.broadcast %cst_182 : f32 to vector<34x32xf32>
    %517 = arith.mulf %515, %516 : vector<34x32xf32>
    %cst_183 = arith.constant -1.45315206 : f32
    %518 = vector.broadcast %cst_183 : f32 to vector<34x32xf32>
    %519 = arith.addf %518, %517 : vector<34x32xf32>
    %520 = arith.mulf %515, %519 : vector<34x32xf32>
    %cst_184 = arith.constant 1.42141378 : f32
    %521 = vector.broadcast %cst_184 : f32 to vector<34x32xf32>
    %522 = arith.addf %521, %520 : vector<34x32xf32>
    %523 = arith.mulf %515, %522 : vector<34x32xf32>
    %cst_185 = arith.constant -0.284496725 : f32
    %524 = vector.broadcast %cst_185 : f32 to vector<34x32xf32>
    %525 = arith.addf %524, %523 : vector<34x32xf32>
    %526 = arith.mulf %515, %525 : vector<34x32xf32>
    %cst_186 = arith.constant 0.254829586 : f32
    %527 = vector.broadcast %cst_186 : f32 to vector<34x32xf32>
    %528 = arith.addf %527, %526 : vector<34x32xf32>
    %529 = arith.mulf %515, %528 : vector<34x32xf32>
    %cst_187 = arith.constant 0.000000e+00 : f32
    %530 = vector.broadcast %cst_187 : f32 to vector<34x32xf32>
    %531 = arith.subf %530, %509 : vector<34x32xf32>
    %532 = arith.mulf %531, %509 : vector<34x32xf32>
    %533 = math.exp %532 : vector<34x32xf32>
    %534 = arith.mulf %529, %533 : vector<34x32xf32>
    %cst_188 = arith.constant 1.000000e+00 : f32
    %535 = vector.broadcast %cst_188 : f32 to vector<34x32xf32>
    %536 = arith.subf %535, %534 : vector<34x32xf32>
    %537 = arith.mulf %508, %536 : vector<34x32xf32>
    %cst_189 = arith.constant 1.000000e+00 : f32
    %538 = vector.broadcast %cst_189 : f32 to vector<34x32xf32>
    %539 = arith.addf %538, %537 : vector<34x32xf32>
    %540 = arith.mulf %501, %539 : vector<34x32xf32>
    %c0_190 = arith.constant 0 : index
    %c0_191 = arith.constant 0 : index
    %541 = vector.load %arg16[%c0_190, %c0_191] : memref<32x16xf32, #tpu.memory_space<vmem>>, vector<32x16xf32>
    %cst_192 = arith.constant dense<0.000000e+00> : vector<34x16xf32>
    %542 = tpu.matmul %540, %541, %cst_192 {dimension_numbers = #tpu.dot_dimension_numbers<[1], [0], [0], [1], [0, 0, 1, 1], [], []>} : vector<34x32xf32>, vector<32x16xf32>, vector<34x16xf32> -> vector<34x16xf32>
    %c0_193 = arith.constant 0 : index
    %c0_194 = arith.constant 0 : index
    %543 = vector.load %arg17[%c0_193, %c0_194] : memref<1x16xf32, #tpu.memory_space<vmem>>, vector<1x16xf32>
    %544 = vector.broadcast %543 : vector<1x16xf32> to vector<34x16xf32>
    %545 = arith.addf %542, %544 : vector<34x16xf32>
    %c0_195 = arith.constant 0 : index
    %c0_196 = arith.constant 0 : index
    %546 = vector.load %arg18[%c0_195, %c0_196] : memref<34x16xf32, #tpu.memory_space<vmem>>, vector<34x16xf32>
    tpu.vector_store %arg18[%c0_195, %c0_196], %545 {strides = array<i32>} : memref<34x16xf32, #tpu.memory_space<vmem>>, vector<34x16xf32>,
    return
  }
}

</mosaic_0001>

<bundles_post_ra>
// kernel: transcriber_forward.1
= control target key start
LH: loop header
LB: loop body
LE: loop exit
PB: predicated region body
PF: predicated region fallthrough
CT: control target
= control target key end

     0   :  { %s4906_s0 = inlined_call_operand.vmem [shape: f32[34,160], index: 0, kind: input, shape index: {}]   ;;  %s4907_s1 = inlined_call_operand.vmem [shape: f32[160,128], index: 1, kind: input, shape index: {}]   ;;  %s4908_s2 = inlined_call_operand.vmem [shape: f32[1,128], index: 2, kind: input, shape index: {}]   ;;  %s4909_s3 = inlined_call_operand.vmem [shape: f32[1,128], index: 3, kind: input, shape index: {}]   ;;  %s4910_s4 = inlined_call_operand.vmem [shape: f32[1,128], index: 4, kind: input, shape index: {}]   ;;  %s4911_s5 = inlined_call_operand.vmem [shape: f32[128,128], index: 5, kind: input, shape index: {}]   ;;  %s4912_s6 = inlined_call_operand.vmem [shape: f32[1,128], index: 6, kind: input, shape index: {}]   ;;  %s4913_s7 = inlined_call_operand.vmem [shape: f32[1,128], index: 7, kind: input, shape index: {}]   ;;  %s4914_s8 = inlined_call_operand.vmem [shape: f32[1,128], index: 8, kind: input, shape index: {}]   ;;  %s4915_s9 = inlined_call_operand.vmem [shape: f32[128,128], index: 9, kind: input, shape index: {}]   ;;  %s4916_s10 = inlined_call_operand.vmem [shape: f32[32,128], index: 10, kind: input, shape index: {}]   ;;  %s4917_s11 = inlined_call_operand.vmem [shape: f32[1,128], index: 11, kind: input, shape index: {}]   ;;  %s4918_s12 = inlined_call_operand.vmem [shape: f32[2,32], index: 12, kind: input, shape index: {}]   ;;  %s4919_s13 = inlined_call_operand.vmem [shape: f32[2,32], index: 13, kind: input, shape index: {}]   ;;  %s4920_s14 = inlined_call_operand.vmem [shape: f32[1,32], index: 14, kind: input, shape index: {}]   ;;  %s4921_s15 = inlined_call_operand.vmem [shape: f32[1,32], index: 15, kind: input, shape index: {}]   ;;  %s4922_s16 = inlined_call_operand.vmem [shape: f32[32,16], index: 16, kind: input, shape index: {}]   ;;  %s4923_s17 = inlined_call_operand.vmem [shape: f32[1,16], index: 17, kind: input, shape index: {}]   ;;  %s4924_s18 = inlined_call_operand.vmem [shape: f32[34,16], index: 18, kind: output, shape index: {0}]   ;;  %s4925_s19 = inlined_call_operand.hbm [shape: f32[2,32], index: 19, kind: output, shape index: {1}]   ;;  %s4926_s20 = inlined_call_operand.hbm [shape: f32[2,32], index: 20, kind: output, shape index: {2}]  }
   0x1   :  { %4929 = sst [smem:[#allocation10_spill]] %s4906_s0 }
   0x2   :  { %4930 = sst [smem:[#allocation11_spill]] %s4907_s1 }
   0x3   :  { %4931 = sst [smem:[#allocation12_spill]] %s4908_s2 }
   0x4   :  { %4932 = sst [smem:[#allocation13_spill]] %s4909_s3 }
   0x5   :  { %4933 = sst [smem:[#allocation14_spill]] %s4910_s4 }
   0x6   :  { %26 = vsyncpa [#allocation5], 0  ;;  %s4934_s23 = sld [smem:[#allocation11_spill]]  ;;  %v3989_v3 = vmov 0.0|0.0   ;;  %vm101_vm0 = vcmask 261120   ;;  %s4935_s1 = sld [smem:[#allocation10_spill]] }
   0x7   :  { %3520 = vmatprep.subr.bf16.mxu0 %v3989_v3  ;;  %3550 = vmatprep.subr.bf16.mxu1 %v3989_v3 }
   0xc   :  { %v74_v0 = vld [vmem:[%s4934_s23] sm:$0xff]  ;;  %v75_v1 = vld [vmem:[%s4934_s23 + $0x8] sm:$0xff]  ;;  %v76_v2 = vld [vmem:[%s4934_s23 + $0x10] sm:$0xff] }
   0xd   :  { %v3521_v4 = vpack.c.bf16 %v75_v1, %v74_v0  ;;  %v77_v5 = vld [vmem:[%s4934_s23 + $0x18] sm:$0xff]  ;;  %v78_v7 = vld [vmem:[%s4934_s23 + $0x20] sm:$0xff]  ;;  %v79_v8 = vld [vmem:[%s4934_s23 + $0x28] sm:$0xff] }
   0xe   :  { %v3524_v6 = vpack.c.bf16 %v77_v5, %v76_v2  ;;  %v65_v9 = vld [vmem:[%s4935_s1 + $0x8] sm:$0xff]  ;;  %v3527_v10 = vpack.c.bf16 %v79_v8, %v78_v7  ;;  %v80_v11 = vld [vmem:[%s4934_s23 + $0x30] sm:$0xff]  ;;  %v81_v12 = vld [vmem:[%s4934_s23 + $0x38] sm:$0xff] }
   0xf   :  { %3522 = vmatpush1.bf16.msra.mxu0 %v3521_v4  ;;  %3027 = vmatprep.mubr.msk.f32.mxu0 %vm101_vm0, %v65_v9 }
  0x10   :  { %3523 = vmatprep.subr.bf16.mxu0 %v3989_v3 }
  0x13   :  { %3525 = vmatpush1.bf16.msra.mxu0 %v3524_v6 }
  0x14   :  { %3526 = vmatprep.subr.bf16.mxu0 %v3989_v3 }
  0x15   :  { %27 = vsyncpa [#allocation7], 0  ;;  %v3530_v13 = vpack.c.bf16 %v81_v12, %v80_v11  ;;  %v82_v14 = vld [vmem:[%s4934_s23 + $0x40] sm:$0xff]  ;;  %v83_v15 = vld [vmem:[%s4934_s23 + $0x48] sm:$0xff]  ;;  %s4936_s28 = sld [smem:[#allocation12_spill]]  ;;  %vm217_vm1 = vcmask 1041408  }
  0x16   :  { %v3533_v16 = vpack.c.bf16 %v83_v15, %v82_v14  ;;  %v84_v17 = vld [vmem:[%s4934_s23 + $0x50] sm:$0xff]  ;;  %v85_v18 = vld [vmem:[%s4934_s23 + $0x58] sm:$0xff]  ;;  %v86_v20 = vld [vmem:[%s4934_s23 + $0x60] sm:$0xff]  ;;  %vm3990_vm2 = vmmov 0   ;;  %s4937_s30 = sld [smem:[#allocation13_spill]]  ;;  %s4938_s22 = sld [smem:[#allocation14_spill]] }
  0x17   :  { %3528 = vmatpush1.bf16.msra.mxu0 %v3527_v10  ;;  %v3536_v19 = vpack.c.bf16 %v85_v18, %v84_v17  ;;  %v87_v21 = vld [vmem:[%s4934_s23 + $0x68] sm:$0xff]  ;;  %v88_v23 = vld [vmem:[%s4934_s23 + $0x70] sm:$0xff]  ;;  %v89_v24 = vld [vmem:[%s4934_s23 + $0x78] sm:$0xff]  ;;  %vm985_vm13 = vcmask 254976  }
  0x18   :  { %3529 = vmatprep.subr.bf16.mxu0 %v3989_v3  ;;  %v3539_v22 = vpack.c.bf16 %v87_v21, %v86_v20  ;;  %v3542_v25 = vpack.c.bf16 %v89_v24, %v88_v23  ;;  %v90_v26 = vld [vmem:[%s4934_s23 + $0x80] sm:$0xff]  ;;  %v91_v27 = vld [vmem:[%s4934_s23 + $0x88] sm:$0xff]  ;;  %v92_v29 = vld [vmem:[%s4934_s23 + $0x90] sm:$0xff]  ;;  %v3991_v21 = vmov 0.0  }
  0x19   :  { %v3545_v28 = vpack.c.bf16 %v91_v27, %v90_v26  ;;  %v93_v30 = vld [vmem:[%s4934_s23 + $0x98] sm:$0xff]  ;;  %v64_v32 = vld [vmem:[%s4935_s1] sm:$0xff]  ;;  %v66_v34 = vld [vmem:[%s4935_s1 + $0x10] sm:$0xff]  ;;  %3248 = vmatprep.mubr.msk.f32.mxu1 %vm3990_vm2, %v3991_v21 }
  0x1a   :  { %v3548_v31 = vpack.c.bf16 %v93_v30, %v92_v29  ;;  %v67_v33 = vld [vmem:[%s4935_s1 + $0x18] sm:$0xff]  ;;  %v69_v35 = vld [vmem:[%s4935_s1 + $0x28] sm:$0xff]  ;;  %v68_v36 = vld [vmem:[%s4935_s1 + $0x20] sm:$0xff] }
  0x1b   :  { %3531 = vmatpush1.bf16.msra.mxu0 %v3530_v13  ;;  %v71_v37 = vld [vmem:[%s4935_s1 + $0x38] sm:$0xff]  ;;  %v70_v38 = vld [vmem:[%s4935_s1 + $0x30] sm:$0xff]  ;;  %v73_v39 = vld [vmem:[%s4935_s1 + $0x48] sm:$0x3] }
  0x1c   :  { %3532 = vmatprep.subr.bf16.mxu0 %v3989_v3  ;;  %v72_v40 = vld [vmem:[%s4935_s1 + $0x40] sm:$0x3]  ;;  %v426_v17 = vld [vmem:[%s4911_s5 + $0x8] sm:$0xff]  ;;  %v427_v18 = vld [vmem:[%s4911_s5 + $0x10] sm:$0xff]  ;;  %s3993_s1 = smov 32  }
  0x1d   :  { %v3026_v41 = vld [vmem:[%s4936_s28] ss:$0 sm:$0xff]  ;;  %v428_v20 = vld [vmem:[%s4911_s5 + $0x18] sm:$0xff]  ;;  %v430_v24 = vld [vmem:[%s4911_s5 + $0x28] sm:$0xff] }
  0x1e   :  { %v429_v23 = vld [vmem:[%s4911_s5 + $0x20] sm:$0xff]  ;;  %v431_v26 = vld [vmem:[%s4911_s5 + $0x30] sm:$0xff]  ;;  %v432_v27 = vld [vmem:[%s4911_s5 + $0x38] sm:$0xff] }
  0x1f   :  { %3534 = vmatpush1.bf16.msra.mxu0 %v3533_v16  ;;  %v425_v16 = vld [vmem:[%s4911_s5] sm:$0xff]  ;;  %v434_v30 = vld [vmem:[%s4911_s5 + $0x48] sm:$0xff] }
  0x20   :  { %3535 = vmatprep.subr.bf16.mxu0 %v3989_v3  ;;  %v433_v29 = vld [vmem:[%s4911_s5 + $0x40] sm:$0xff] }
  0x23   :  { %3537 = vmatpush1.bf16.msra.mxu0 %v3536_v19  ;;  %v3551_v19 = vpack.c.bf16 %v426_v17, %v425_v16 }
  0x24   :  { %3538 = vmatprep.subr.bf16.mxu0 %v3989_v3 }
  0x25   :  { %3552 = vmatpush3.bf16.msra.mxu1 %v3551_v19 }
  0x26   :  { %3553 = vmatprep.subr.bf16.mxu1 %v3989_v3 }
  0x27   :  { %3540 = vmatpush1.bf16.msra.mxu0 %v3539_v22  ;;  %v3554_v22 = vpack.c.bf16 %v428_v20, %v427_v18 }
  0x28   :  { %3541 = vmatprep.subr.bf16.mxu0 %v3989_v3 }
  0x29   :  { %3555 = vmatpush3.bf16.msra.mxu1 %v3554_v22 }
  0x2a   :  { %3556 = vmatprep.subr.bf16.mxu1 %v3989_v3 }
  0x2b   :  { %3543 = vmatpush1.bf16.msra.mxu0 %v3542_v25  ;;  %v3557_v25 = vpack.c.bf16 %v430_v24, %v429_v23 }
  0x2c   :  { %3544 = vmatprep.subr.bf16.mxu0 %v3989_v3 }
  0x2d   :  { %3558 = vmatpush3.bf16.msra.mxu1 %v3557_v25 }
  0x2e   :  { %3559 = vmatprep.subr.bf16.mxu1 %v3989_v3 }
  0x2f   :  { %3546 = vmatpush1.bf16.msra.mxu0 %v3545_v28  ;;  %v3560_v28 = vpack.c.bf16 %v432_v27, %v431_v26 }
  0x30   :  { %3547 = vmatprep.subr.bf16.mxu0 %v3989_v3 }
  0x31   :  { %3561 = vmatpush3.bf16.msra.mxu1 %v3560_v28 }
  0x32   :  { %3562 = vmatprep.subr.bf16.mxu1 %v3989_v3 }
  0x33   :  { %3549 = vmatpush1.bf16.msra.mxu0 %v3548_v31  ;;  %v3563_v31 = vpack.c.bf16 %v434_v30, %v433_v29 }
  0x34   :  { %3604 = vmatprep.subr.bf16.mxu0 %v3989_v3 }
  0x35   :  { %3564 = vmatpush3.bf16.msra.mxu1 %v3563_v31 }
  0x36   :  { %182 = vmatmul.mubr.f32.vlgmr.msra.gmra.mrb[0].mxu0 %v64_v32  ;;  %v435_v32 = vld [vmem:[%s4911_s5 + $0x50] sm:$0xff]  ;;  %3565 = vmatprep.subr.bf16.mxu1 %v3989_v3 }
  0x37   :  { %3028 = vmatprep.mubr.msk.f32.mxu0 %vm101_vm0, %v67_v33  ;;  %v436_v33 = vld [vmem:[%s4911_s5 + $0x58] sm:$0xff] }
  0x3a   :  { %187 = vmatmul.mubr.f32.gmra.mrb[2].mxu0 %v66_v34  ;;  %v3566_v34 = vpack.c.bf16 %v436_v33, %v435_v32 }
  0x3b   :  { %3029 = vmatprep.mubr.msk.f32.mxu0 %vm101_vm0, %v69_v35  ;;  %v437_v35 = vld [vmem:[%s4911_s5 + $0x60] sm:$0xff] }
  0x3c   :  { %3567 = vmatpush3.bf16.msra.mxu1 %v3566_v34 }
  0x3d   :  { %3568 = vmatprep.subr.bf16.mxu1 %v3989_v3 }
  0x3e   :  { %192 = vmatmul.mubr.f32.gmra.mrb[4].mxu0 %v68_v36  ;;  %v438_v36 = vld [vmem:[%s4911_s5 + $0x68] sm:$0xff] }
  0x3f   :  { %3030 = vmatprep.mubr.msk.f32.mxu0 %vm101_vm0, %v71_v37  ;;  %v3569_v37 = vpack.c.bf16 %v438_v36, %v437_v35 }
  0x41   :  { %3570 = vmatpush3.bf16.msra.mxu1 %v3569_v37 }
  0x42   :  { %197 = vmatmul.mubr.f32.gmra.mrb[6].mxu0 %v70_v38  ;;  %v439_v38 = vld [vmem:[%s4911_s5 + $0x70] sm:$0xff]  ;;  %3571 = vmatprep.subr.bf16.mxu1 %v3989_v3 }
  0x43   :  { %3031 = vmatprep.mubr.msk.f32.mxu0 %vm101_vm0, %v73_v39  ;;  %v440_v39 = vld [vmem:[%s4911_s5 + $0x78] sm:$0xff] }
  0x46   :  { %202 = vmatmul.mubr.f32.gmra.mrb[8].mxu0 %v72_v40  ;;  %v3572_v40 = vpack.c.bf16 %v440_v39, %v439_v38 }
  0x47   :  { %3329 = vmatprep.mubr.msk.f32.mxu0 %vm3990_vm2, %v3991_v21 }
  0x48   :  { %3573 = vmatpush3.bf16.msra.mxu1 %v3572_v40 }
  0x49   :  { %3574 = vmatprep.subr.bf16.mxu1 %v3989_v3 }
 0x109   :  { %v183_v42 = vpop.f32.mrb[0].mxu0 }
 0x10a   :  { %v184_v43 = vadd.f32 %v3026_v41, %v183_v42  ;;  %v185_v44 = vpop.f32.mrb[1].mxu0 }
 0x10c   :  { %209 = vadd.xlane.f32.xlu0 %v184_v43 }
 0x10d   :  { %v188_v45 = vpop.f32.mrb[2].mxu0 }
 0x10e   :  { %v189_v46 = vadd.f32 %v3026_v41, %v188_v45  ;;  %v190_v47 = vpop.f32.mrb[3].mxu0 }
 0x110   :  { %211 = vadd.xlane.f32.xlu0 %v189_v46 }
 0x111   :  { %v193_v48 = vpop.f32.mrb[4].mxu0 }
 0x112   :  { %v194_v49 = vadd.f32 %v3026_v41, %v193_v48  ;;  %v195_v50 = vpop.f32.mrb[5].mxu0 }
 0x114   :  { %213 = vadd.xlane.f32.xlu1 %v194_v49 }
 0x115   :  { %v198_v51 = vpop.f32.mrb[6].mxu0 }
 0x116   :  { %v199_v52 = vadd.f32 %v3026_v41, %v198_v51  ;;  %v200_v53 = vpop.f32.mrb[7].mxu0 }
 0x118   :  { %215 = vadd.xlane.f32.xlu1 %v199_v52 }
 0x119   :  { %v203_v54 = vpop.f32.mrb[8].mxu0 }
 0x11a   :  { %v204_v55 = vadd.f32 %v3026_v41, %v203_v54  ;;  %v205_v56 = vpop.f32.mrb[9].mxu0  ;;  %v3032_v54 = vld [vmem:[%s4937_s30] ss:$0 sm:$0xff] }
 0x11b   :  { %v3033_v56 = vld [vmem:[%s4938_s22] ss:$0 sm:$0xff] }
 0x11c   :  { %v218_v57 = vsel %vm217_vm1, %v204_v55, 0.0 }
 0x11d   :  { %219 = vadd.xlane.f32.xlu0 %v218_v57 }
 0x199   :  { %v210_v58 = vpop.xlane.xlu0 %209 }
 0x19a   :  { %v222_v59 = vmul.f32 0.0078125, %v210_v58 }
 0x19c   :  { %v4214_v60 = vsub.f32 %v184_v43, %v222_v59 }
 0x19d   :  { %v212_v61 = vpop.xlane.xlu0 %211 }
 0x19e   :  { %v223_v62 = vmul.f32 0.0078125, %v212_v61  ;;  %v232_v63 = vmul.f32 %v4214_v60, %v4214_v60 }
 0x1a0   :  { %v4218_v0 = vsub.f32 %v189_v46, %v223_v62  ;;  %237 = vadd.xlane.f32.xlu1 %v232_v63 }
 0x1a1   :  { %v214_v1 = vpop.xlane.xlu1 %213 }
 0x1a2   :  { %v224_v2 = vmul.f32 0.0078125, %v214_v1  ;;  %v233_v4 = vmul.f32 %v4218_v0, %v4218_v0 }
 0x1a4   :  { %239 = vadd.xlane.f32.xlu0 %v233_v4  ;;  %v4222_v5 = vsub.f32 %v194_v49, %v224_v2 }
 0x1a5   :  { %v216_v6 = vpop.xlane.xlu1 %215 }
 0x1a6   :  { %v225_v7 = vmul.f32 0.0078125, %v216_v6  ;;  %v234_v8 = vmul.f32 %v4222_v5, %v4222_v5 }
 0x1a8   :  { %v4226_v9 = vsub.f32 %v199_v52, %v225_v7  ;;  %241 = vadd.xlane.f32.xlu1 %v234_v8 }
 0x1aa   :  { %v220_v10 = vpop.xlane.xlu0 %219  ;;  %v235_v11 = vmul.f32 %v4226_v9, %v4226_v9 }
 0x1ab   :  { %v226_v12 = vmul.f32 0.0078125, %v220_v10 }
 0x1ac   :  { %243 = vadd.xlane.f32.xlu0 %v235_v11 }
 0x1ad   :  { %v4230_v13 = vsub.f32 %v204_v55, %v226_v12 }
 0x1af   :  { %v236_v14 = vmul.f32 %v4230_v13, %v4230_v13 }
 0x1b1   :  { %v245_v15 = vsel %vm217_vm1, %v236_v14, 0.0 }
 0x1b2   :  { %246 = vadd.xlane.f32.xlu1 %v245_v15 }
 0x22d   :  { %v238_v41 = vpop.xlane.xlu1 %237 }
 0x22e   :  { %v248_v42 = vmul.f32 0.0078125, %v238_v41 }
 0x230   :  { %v253_v43 = vadd.f32 1e-05, %v248_v42 }
 0x231   :  { %v240_v44 = vpop.xlane.xlu0 %239 }
 0x232   :  { %3715 = vrsqrt.f32 %v253_v43  ;;  %v249_v45 = vmul.f32 0.0078125, %v240_v44 }
 0x234   :  { %v254_v46 = vadd.f32 1e-05, %v249_v45 }
 0x235   :  { %v242_v47 = vpop.xlane.xlu1 %241 }
 0x236   :  { %3717 = vrsqrt.f32 %v254_v46  ;;  %v250_v48 = vmul.f32 0.0078125, %v242_v47 }
 0x238   :  { %v255_v49 = vadd.f32 1e-05, %v250_v48 }
 0x239   :  { %v244_v50 = vpop.xlane.xlu0 %243 }
 0x23a   :  { %3719 = vrsqrt.f32 %v255_v49  ;;  %v251_v51 = vmul.f32 0.0078125, %v244_v50 }
 0x23c   :  { %v3716_v52 = vpop.eup %3715  ;;  %v256_v53 = vadd.f32 1e-05, %v251_v51 }
 0x23d   :  { %v263_v55 = vmul.f32 %v3716_v52, %v4214_v60 }
 0x23e   :  { %3721 = vrsqrt.f32 %v256_v53 }
 0x23f   :  { %v247_v57 = vpop.xlane.xlu1 %246  ;;  %v274_v58 = vmul.f32 %v3032_v54, %v263_v55 }
 0x240   :  { %v3718_v59 = vpop.eup %3717  ;;  %v252_v61 = vmul.f32 0.0078125, %v247_v57 }
 0x241   :  { %v4302_v62 = vadd.f32 %v3033_v56, %v274_v58  ;;  %v264_v63 = vmul.f32 %v3718_v59, %v4218_v0 }
 0x242   :  { %v257_v1 = vadd.f32 1e-05, %v252_v61 }
 0x243   :  { %v4306_v2 = vmul.f32 0.70710677, %v4302_v62  ;;  %v275_v4 = vmul.f32 %v3032_v54, %v264_v63 }
 0x244   :  { %v3720_v6 = vpop.eup %3719  ;;  %3723 = vrsqrt.f32 %v257_v1 }
 0x245   :  { %v310_v60 = vand.u32 2147483647, %v4306_v2  ;;  %v4309_v7 = vadd.f32 %v3033_v56, %v275_v4  ;;  %v265_v8 = vmul.f32 %v3720_v6, %v4222_v5  ;;  %vm300_vm3 = vcmp.ge.f32.partialorder %v4306_v2, 0.0 }
 0x247   :  { %v315_v10 = vmul.f32 0.3275911, %v310_v60  ;;  %v4313_v11 = vmul.f32 0.70710677, %v4309_v7  ;;  %v276_v14 = vmul.f32 %v3032_v54, %v265_v8  ;;  %v380_v26 = vsub.f32 0.0, %v310_v60 }
 0x248   :  { %v3722_v12 = vpop.eup %3721 }
 0x249   :  { %v320_v0 = vadd.f32 1.0, %v315_v10  ;;  %v311_v15 = vand.u32 2147483647, %v4313_v11  ;;  %v4316_v16 = vadd.f32 %v3033_v56, %v276_v14  ;;  %v266_v17 = vmul.f32 %v3722_v12, %v4226_v9 }
 0x24a   :  { %v385_v32 = vmul.f32 %v380_v26, %v310_v60  ;;  %vm301_vm4 = vcmp.ge.f32.partialorder %v4313_v11, 0.0 }
 0x24b   :  { %3725 = vrcp.f32 %v320_v0  ;;  %v316_v18 = vmul.f32 0.3275911, %v311_v15  ;;  %v4320_v19 = vmul.f32 0.70710677, %v4316_v16  ;;  %v277_v20 = vmul.f32 %v3032_v54, %v266_v17 }
 0x24c   :  { %v381_v35 = vsub.f32 0.0, %v311_v15  ;;  %v390_v40 = vmul.f32 1.442695, %v385_v32 }
 0x24d   :  { %v321_v5 = vadd.f32 1.0, %v316_v18  ;;  %v312_v23 = vand.u32 2147483647, %v4320_v19  ;;  %v4323_v24 = vadd.f32 %v3033_v56, %v277_v20  ;;  %vm302_vm5 = vcmp.ge.f32.partialorder %v4320_v19, 0.0 }
 0x24e   :  { %v3724_v22 = vpop.eup %3723  ;;  %v386_v42 = vmul.f32 %v381_v35, %v311_v15 }
 0x24f   :  { %3727 = vrcp.f32 %v321_v5  ;;  %v267_v25 = vmul.f32 %v3724_v22, %v4230_v13  ;;  %v317_v27 = vmul.f32 0.3275911, %v312_v23  ;;  %v4327_v28 = vmul.f32 0.70710677, %v4323_v24 }
 0x250   :  { %v382_v46 = vsub.f32 0.0, %v312_v23  ;;  %v392_v50 = vmul.f32 1.442695, %v386_v42 }
 0x251   :  { %v278_v9 = vmul.f32 %v3032_v54, %v267_v25  ;;  %v322_v29 = vadd.f32 1.0, %v317_v27  ;;  %v313_v30 = vand.u32 2147483647, %v4327_v28  ;;  %vm303_vm6 = vcmp.ge.f32.partialorder %v4327_v28, 0.0 }
 0x252   :  { %v387_v54 = vmul.f32 %v382_v46, %v312_v23  ;;  %v293_v28 = vmul.f32 0.5, %v4323_v24  ;;  %v3034_v24 = vld [vmem:[%s4912_s6] ss:$0 sm:$0xff] }
 0x253   :  { %v4330_v31 = vadd.f32 %v3033_v56, %v278_v9  ;;  %3729 = vrcp.f32 %v322_v29  ;;  %v318_v33 = vmul.f32 0.3275911, %v313_v30  ;;  %v383_v55 = vsub.f32 0.0, %v313_v30 }
 0x254   :  { %v394_v4 = vmul.f32 1.442695, %v387_v54 }
 0x255   :  { %v3726_v34 = vpop.eup %3725  ;;  %v4333_v36 = vmul.f32 0.70710677, %v4330_v31  ;;  %v323_v37 = vadd.f32 1.0, %v318_v33  ;;  %v388_v6 = vmul.f32 %v383_v55, %v313_v30 }
 0x256   :  { %v335_v13 = vmul.f32 1.0614054, %v3726_v34 }
 0x257   :  { %v314_v38 = vand.u32 2147483647, %v4333_v36  ;;  %3731 = vrcp.f32 %v323_v37  ;;  %v396_v5 = vmul.f32 1.442695, %v388_v6  ;;  %v3992_v37 = vmov -1.0  }
 0x258   :  { %v340_v39 = vadd.f32 -1.4531521, %v335_v13  ;;  %3733 = vpow2.f32 %v390_v40  ;;  %vm304_vm7 = vcmp.ge.f32.partialorder %v4333_v36, 0.0 }
 0x259   :  { %v3728_v41 = vpop.eup %3727  ;;  %v319_v43 = vmul.f32 0.3275911, %v314_v38  ;;  %v384_v10 = vsub.f32 0.0, %v314_v38 }
 0x25a   :  { %v345_v44 = vmul.f32 %v3726_v34, %v340_v39  ;;  %v336_v45 = vmul.f32 1.0614054, %v3728_v41  ;;  %v305_v39 = vsel %vm300_vm3, 1.0, %v3992_v37 }
 0x25b   :  { %v324_v47 = vadd.f32 1.0, %v319_v43  ;;  %v389_v26 = vmul.f32 %v384_v10, %v314_v38 }
 0x25c   :  { %v350_v48 = vadd.f32 1.4214138, %v345_v44  ;;  %v341_v49 = vadd.f32 -1.4531521, %v336_v45 }
 0x25d   :  { %3735 = vrcp.f32 %v324_v47  ;;  %v3730_v51 = vpop.eup %3729  ;;  %v398_v43 = vmul.f32 1.442695, %v389_v26  ;;  %v290_v47 = vmul.f32 0.5, %v4302_v62  ;;  %v291_v62 = vmul.f32 0.5, %v4309_v7 }
 0x25e   :  { %v355_v52 = vmul.f32 %v3726_v34, %v350_v48  ;;  %v346_v53 = vmul.f32 %v3728_v41, %v341_v49  ;;  %v337_v56 = vmul.f32 1.0614054, %v3730_v51  ;;  %3737 = vpow2.f32 %v392_v50 }
 0x25f   :  { %3739 = vpow2.f32 %v394_v4  ;;  %v306_v50 = vsel %vm301_vm4, 1.0, %v3992_v37  ;;  %v292_v7 = vmul.f32 0.5, %v4316_v16  ;;  %v309_v26 = vsel %vm304_vm7, 1.0, %v3992_v37 }
 0x260   :  { %v360_v57 = vadd.f32 -0.28449672, %v355_v52  ;;  %v351_v58 = vadd.f32 1.4214138, %v346_v53  ;;  %v342_v59 = vadd.f32 -1.4531521, %v337_v56  ;;  %3741 = vpow2.f32 %v396_v5 }
 0x261   :  { %v4336_v61 = vpop.eup %3731  ;;  %3743 = vpow2.f32 %v398_v43  ;;  %vm2987_vm4 = vcmask 130048  }
 0x262   :  { %v365_v63 = vmul.f32 %v3726_v34, %v360_v57  ;;  %v356_v1 = vmul.f32 %v3728_v41, %v351_v58  ;;  %v347_v60 = vmul.f32 %v3730_v51, %v342_v59  ;;  %v338_v8 = vmul.f32 1.0614054, %v4336_v61  ;;  %v3734_v17 = vpop.eup %3733 }
 0x264   :  { %v370_v12 = vadd.f32 0.2548296, %v365_v63  ;;  %v361_v14 = vadd.f32 -0.28449672, %v356_v1  ;;  %v352_v0 = vadd.f32 1.4214138, %v347_v60 }
 0x265   :  { %v343_v15 = vadd.f32 -1.4531521, %v338_v8  ;;  %v307_v60 = vsel %vm302_vm5, 1.0, %v3992_v37 }
 0x266   :  { %v375_v18 = vmul.f32 %v3726_v34, %v370_v12  ;;  %v366_v20 = vmul.f32 %v3728_v41, %v361_v14  ;;  %v357_v23 = vmul.f32 %v3730_v51, %v352_v0 }
 0x267   :  { %v3736_v22 = vpop.eup %3735  ;;  %v348_v25 = vmul.f32 %v4336_v61, %v343_v15 }
 0x268   :  { %v400_v27 = vmul.f32 %v3734_v17, %v375_v18  ;;  %v371_v9 = vadd.f32 0.2548296, %v366_v20  ;;  %v339_v29 = vmul.f32 1.0614054, %v3736_v22  ;;  %v362_v30 = vadd.f32 -0.28449672, %v357_v23  ;;  %v3738_v34 = vpop.eup %3737 }
 0x269   :  { %v353_v32 = vadd.f32 1.4214138, %v348_v25  ;;  %v3740_v54 = vpop.eup %3739 }
 0x26a   :  { %v405_v33 = vsub.f32 1.0, %v400_v27  ;;  %v376_v35 = vmul.f32 %v3728_v41, %v371_v9  ;;  %v344_v13 = vadd.f32 -1.4531521, %v339_v29  ;;  %v367_v40 = vmul.f32 %v3730_v51, %v362_v30  ;;  %v3742_v4 = vpop.eup %3741 }
 0x26b   :  { %v358_v42 = vmul.f32 %v4336_v61, %v353_v32  ;;  %v3744_v17 = vpop.eup %3743 }
 0x26c   :  { %v410_v38 = vmul.f32 %v405_v33, %v305_v39  ;;  %v401_v2 = vmul.f32 %v3738_v34, %v376_v35  ;;  %v349_v44 = vmul.f32 %v3736_v22, %v344_v13  ;;  %v372_v45 = vadd.f32 0.2548296, %v367_v40 }
 0x26d   :  { %v363_v46 = vadd.f32 -0.28449672, %v358_v42 }
 0x26e   :  { %v415_v41 = vadd.f32 1.0, %v410_v38  ;;  %v406_v48 = vsub.f32 1.0, %v401_v2  ;;  %v354_v49 = vadd.f32 1.4214138, %v349_v44  ;;  %v377_v52 = vmul.f32 %v3730_v51, %v372_v45 }
 0x26f   :  { %v368_v53 = vmul.f32 %v4336_v61, %v363_v46 }
 0x270   :  { %v420_v55 = vmul.f32 %v415_v41, %v290_v47  ;;  %v411_v56 = vmul.f32 %v406_v48, %v306_v50  ;;  %v359_v57 = vmul.f32 %v3736_v22, %v354_v49  ;;  %v402_v11 = vmul.f32 %v3740_v54, %v377_v52 }
 0x271   :  { %v373_v58 = vadd.f32 0.2548296, %v368_v53 }
 0x272   :  { %3249 = vmatmul.mubr.f32.vlgmr.msra.gmra.mrb[0].mxu1 %v420_v55  ;;  %v416_v59 = vadd.f32 1.0, %v411_v56  ;;  %v364_v63 = vadd.f32 -0.28449672, %v359_v57  ;;  %v407_v51 = vsub.f32 1.0, %v402_v11 }
 0x273   :  { %3251 = vmatprep.mubr.msk.f32.mxu1 %vm3990_vm2, %v3991_v21  ;;  %v378_v1 = vmul.f32 %v4336_v61, %v373_v58  ;;  %v308_v61 = vsel %vm303_vm6, 1.0, %v3992_v37 }
 0x274   :  { %v421_v6 = vmul.f32 %v416_v59, %v291_v62  ;;  %v369_v8 = vmul.f32 %v3736_v22, %v364_v63  ;;  %v412_v10 = vmul.f32 %v407_v51, %v307_v60  ;;  %v754_v60 = vld [vmem:[%s4915_s9] sm:$0xff] }
 0x275   :  { %v403_v19 = vmul.f32 %v3742_v4, %v378_v1 }
 0x276   :  { %3252 = vmatmul.mubr.f32.gmra.mrb[2].mxu1 %v421_v6  ;;  %v374_v12 = vadd.f32 0.2548296, %v369_v8  ;;  %v417_v14 = vadd.f32 1.0, %v412_v10  ;;  %v755_v8 = vld [vmem:[%s4915_s9 + $0x8] sm:$0xff]  ;;  %v756_v10 = vld [vmem:[%s4915_s9 + $0x10] sm:$0xff] }
 0x277   :  { %3254 = vmatprep.mubr.msk.f32.mxu1 %vm3990_vm2, %v3991_v21  ;;  %v408_v0 = vsub.f32 1.0, %v403_v19  ;;  %v3575_v19 = vpack.c.bf16 %v755_v8, %v754_v60 }
 0x278   :  { %v379_v15 = vmul.f32 %v3736_v22, %v374_v12  ;;  %v422_v18 = vmul.f32 %v417_v14, %v292_v7  ;;  %v294_v22 = vmul.f32 0.5, %v4330_v31  ;;  %v757_v12 = vld [vmem:[%s4915_s9 + $0x18] sm:$0xff]  ;;  %v758_v14 = vld [vmem:[%s4915_s9 + $0x20] sm:$0xff] }
 0x279   :  { %v413_v20 = vmul.f32 %v408_v0, %v308_v61  ;;  %3576 = vmatpush3.bf16.msra.mxu1 %v3575_v19  ;;  %v3578_v7 = vpack.c.bf16 %v757_v12, %v756_v10  ;;  %v759_v0 = vld [vmem:[%s4915_s9 + $0x28] sm:$0xff] }
 0x27a   :  { %v404_v5 = vmul.f32 %v3744_v17, %v379_v15  ;;  %3255 = vmatmul.mubr.f32.gmra.mrb[4].mxu1 %v422_v18  ;;  %3577 = vmatprep.subr.bf16.mxu1 %v3989_v3  ;;  %v3581_v61 = vpack.c.bf16 %v759_v0, %v758_v14  ;;  %v760_v15 = vld [vmem:[%s4915_s9 + $0x30] sm:$0xff]  ;;  %v761_v17 = vld [vmem:[%s4915_s9 + $0x38] sm:$0xff] }
 0x27b   :  { %v418_v23 = vadd.f32 1.0, %v413_v20  ;;  %3257 = vmatprep.mubr.msk.f32.mxu1 %vm3990_vm2, %v3991_v21  ;;  %v3584_v18 = vpack.c.bf16 %v761_v17, %v760_v15  ;;  %v762_v20 = vld [vmem:[%s4915_s9 + $0x40] sm:$0xff] }
 0x27c   :  { %v409_v25 = vsub.f32 1.0, %v404_v5  ;;  %v763_v5 = vld [vmem:[%s4915_s9 + $0x48] sm:$0xff] }
 0x27d   :  { %v423_v16 = vmul.f32 %v418_v23, %v293_v28  ;;  %3579 = vmatpush3.bf16.msra.mxu1 %v3578_v7  ;;  %v3587_v28 = vpack.c.bf16 %v763_v5, %v762_v20  ;;  %v764_v23 = vld [vmem:[%s4915_s9 + $0x50] sm:$0xff] }
 0x27e   :  { %v414_v27 = vmul.f32 %v409_v25, %v309_v26  ;;  %3580 = vmatprep.subr.bf16.mxu1 %v3989_v3  ;;  %v765_v25 = vld [vmem:[%s4915_s9 + $0x58] sm:$0xff]  ;;  %v766_v26 = vld [vmem:[%s4915_s9 + $0x60] sm:$0xff] }
 0x27f   :  { %3258 = vmatmul.mubr.f32.gmra.mrb[6].mxu1 %v423_v16  ;;  %v3590_v16 = vpack.c.bf16 %v765_v25, %v764_v23 }
 0x280   :  { %3260 = vmatprep.mubr.msk.f32.mxu1 %vm3990_vm2, %v3991_v21  ;;  %v419_v36 = vadd.f32 1.0, %v414_v27  ;;  %v767_v27 = vld [vmem:[%s4915_s9 + $0x68] sm:$0xff] }
 0x281   :  { %3582 = vmatpush3.bf16.msra.mxu1 %v3581_v61 }
 0x282   :  { %v424_v9 = vmul.f32 %v419_v36, %v294_v22  ;;  %3583 = vmatprep.subr.bf16.mxu1 %v3989_v3  ;;  %v3593_v22 = vpack.c.bf16 %v767_v27, %v766_v26  ;;  %v768_v36 = vld [vmem:[%s4915_s9 + $0x70] sm:$0xff] }
 0x284   :  { %3261 = vmatmul.mubr.f32.gmra.mrb[8].mxu1 %v424_v9  ;;  %v769_v9 = vld [vmem:[%s4915_s9 + $0x78] sm:$0xff] }
 0x285   :  { %3295 = vmatprep.mubr.msk.f32.mxu1 %vm3990_vm2, %v3991_v21  ;;  %3585 = vmatpush3.bf16.msra.mxu1 %v3584_v18 }
 0x286   :  { %3586 = vmatprep.subr.bf16.mxu1 %v3989_v3 }
 0x289   :  { %3588 = vmatpush3.bf16.msra.mxu1 %v3587_v28 }
 0x28a   :  { %3589 = vmatprep.subr.bf16.mxu1 %v3989_v3 }
 0x28d   :  { %3591 = vmatpush3.bf16.msra.mxu1 %v3590_v16 }
 0x28e   :  { %3592 = vmatprep.subr.bf16.mxu1 %v3989_v3 }
 0x291   :  { %3594 = vmatpush3.bf16.msra.mxu1 %v3593_v22 }
 0x292   :  { %3595 = vmatprep.subr.bf16.mxu1 %v3989_v3 }
 0x345   :  { %v514_v29 = vpop.f32.mrb[0].mxu1 }
 0x346   :  { %v515_v30 = vadd.f32 %v3034_v24, %v514_v29  ;;  %v3250_v32 = vpop.f32.mrb[1].mxu1  ;;  %v872_v29 = vld [vmem:[%s4916_s10] sm:$0xff] }
 0x348   :  { %540 = vadd.xlane.f32.xlu0 %v515_v30 }
 0x349   :  { %v519_v33 = vpop.f32.mrb[2].mxu1 }
 0x34a   :  { %v520_v35 = vadd.f32 %v3034_v24, %v519_v33  ;;  %v3253_v13 = vpop.f32.mrb[3].mxu1  ;;  %v874_v33 = vld [vmem:[%s4916_s10 + $0x10] sm:$0xff] }
 0x34c   :  { %542 = vadd.xlane.f32.xlu1 %v520_v35 }
 0x34d   :  { %v524_v34 = vpop.f32.mrb[4].mxu1 }
 0x34e   :  { %v525_v31 = vadd.f32 %v3034_v24, %v524_v34  ;;  %v3256_v39 = vpop.f32.mrb[5].mxu1  ;;  %v877_v34 = vld [vmem:[%s4919_s13] sm:$0x3]  ;;  %s3997_s13 = smov [#allocation6]  }
 0x34f   :  { %s3012_s4 = sshll.u32 %s3997_s13, 4  ;;  %s3013_s4 = int_to_ptr.vmem [resolvable:$true] %s3012_s4 }
 0x350   :  { %544 = vadd.xlane.f32.xlu0 %v525_v31 }
 0x352   :  { %v529_v40 = vpop.f32.mrb[6].mxu1 }
 0x353   :  { %v530_v42 = vadd.f32 %v3034_v24, %v529_v40  ;;  %v3259_v43 = vpop.f32.mrb[7].mxu1 }
 0x355   :  { %546 = vadd.xlane.f32.xlu1 %v530_v42 }
 0x357   :  { %v534_v38 = vpop.f32.mrb[8].mxu1 }
 0x358   :  { %v535_v2 = vadd.f32 %v3034_v24, %v534_v38  ;;  %v3262_v44 = vpop.f32.mrb[9].mxu1  ;;  %v3596_v24 = vpack.c.bf16 %v769_v9, %v768_v36 }
 0x35a   :  { %v548_v45 = vsel %vm217_vm1, %v535_v2, 0.0  ;;  %3597 = vmatpush3.bf16.msra.mxu1 %v3596_v24 }
 0x35b   :  { %549 = vadd.xlane.f32.xlu0 %v548_v45  ;;  %3598 = vmatprep.subr.bf16.mxu1 %v3989_v3 }
 0x3d5   :  { %v541_v46 = vpop.xlane.xlu0 %540 }
 0x3d6   :  { %v551_v47 = vmul.f32 0.0078125, %v541_v46 }
 0x3d8   :  { %v4372_v41 = vsub.f32 %v515_v30, %v551_v47  ;;  %v873_v30 = vld [vmem:[%s4916_s10 + $0x8] sm:$0xff] }
 0x3d9   :  { %v543_v48 = vpop.xlane.xlu1 %542  ;;  %v4455_v32 = vpack.c.bf16 %v873_v30, %v872_v29 }
 0x3da   :  { %v552_v49 = vmul.f32 0.0078125, %v543_v48  ;;  %v561_v50 = vmul.f32 %v4372_v41, %v4372_v41 }
 0x3db   :  { %3606 = vmatpush3.bf16.msra.mxu0 %v4455_v32 }
 0x3dc   :  { %v4376_v52 = vsub.f32 %v520_v35, %v552_v49  ;;  %566 = vadd.xlane.f32.xlu1 %v561_v50  ;;  %3607 = vmatprep.subr.bf16.mxu0 %v3989_v3  ;;  %v875_v35 = vld [vmem:[%s4916_s10 + $0x18] sm:$0xff]  ;;  %v3035_v49 = vld [vmem:[%s4913_s7] ss:$0 sm:$0xff] }
 0x3dd   :  { %v545_v53 = vpop.xlane.xlu0 %544  ;;  %v4465_v13 = vpack.c.bf16 %v875_v35, %v874_v33 }
 0x3de   :  { %v562_v54 = vmul.f32 %v4376_v52, %v4376_v52  ;;  %v553_v55 = vmul.f32 0.0078125, %v545_v53 }
 0x3df   :  { %3609 = vmatpush3.bf16.msra.mxu0 %v4465_v13 }
 0x3e0   :  { %568 = vadd.xlane.f32.xlu0 %v562_v54  ;;  %v4380_v56 = vsub.f32 %v525_v31, %v553_v55  ;;  %3610 = vmatprep.subr.bf16.mxu0 %v3989_v3  ;;  %v3036_v54 = vld [vmem:[%s4914_s8] ss:$0 sm:$0xff] }
 0x3e2   :  { %v547_v57 = vpop.xlane.xlu1 %546  ;;  %v563_v58 = vmul.f32 %v4380_v56, %v4380_v56 }
 0x3e3   :  { %v554_v11 = vmul.f32 0.0078125, %v547_v57 }
 0x3e4   :  { %570 = vadd.xlane.f32.xlu1 %v563_v58 }
 0x3e5   :  { %v4384_v62 = vsub.f32 %v530_v42, %v554_v11 }
 0x3e7   :  { %v564_v59 = vmul.f32 %v4384_v62, %v4384_v62 }
 0x3e8   :  { %v550_v63 = vpop.xlane.xlu0 %549 }
 0x3e9   :  { %572 = vadd.xlane.f32.xlu0 %v564_v59  ;;  %v555_v51 = vmul.f32 0.0078125, %v550_v63 }
 0x3eb   :  { %v4388_v1 = vsub.f32 %v535_v2, %v555_v51 }
 0x3ed   :  { %v565_v4 = vmul.f32 %v4388_v1, %v4388_v1 }
 0x3ef   :  { %v574_v6 = vsel %vm217_vm1, %v565_v4, 0.0 }
 0x3f0   :  { %575 = vadd.xlane.f32.xlu1 %v574_v6 }
 0x401   :  { %961 = vrot.lane.b32.xlu1 %v877_v34, %s3993_s1 }
 0x469   :  { %v567_v31 = vpop.xlane.xlu1 %566 }
 0x46a   :  { %v577_v39 = vmul.f32 0.0078125, %v567_v31 }
 0x46c   :  { %v582_v40 = vadd.f32 1e-05, %v577_v39 }
 0x46d   :  { %v569_v42 = vpop.xlane.xlu0 %568 }
 0x46e   :  { %3745 = vrsqrt.f32 %v582_v40  ;;  %v578_v43 = vmul.f32 0.0078125, %v569_v42 }
 0x470   :  { %v583_v38 = vadd.f32 1e-05, %v578_v43 }
 0x471   :  { %v571_v2 = vpop.xlane.xlu1 %570 }
 0x472   :  { %3747 = vrsqrt.f32 %v583_v38  ;;  %v579_v44 = vmul.f32 0.0078125, %v571_v2 }
 0x474   :  { %v584_v45 = vadd.f32 1e-05, %v579_v44 }
 0x476   :  { %v573_v46 = vpop.xlane.xlu0 %572  ;;  %3749 = vrsqrt.f32 %v584_v45 }
 0x477   :  { %v580_v47 = vmul.f32 0.0078125, %v573_v46 }
 0x478   :  { %v3746_v48 = vpop.eup %3745 }
 0x479   :  { %v592_v50 = vmul.f32 %v3746_v48, %v4372_v41  ;;  %v585_v53 = vadd.f32 1e-05, %v580_v47 }
 0x47b   :  { %v603_v55 = vmul.f32 %v3035_v49, %v592_v50  ;;  %3751 = vrsqrt.f32 %v585_v53 }
 0x47c   :  { %v3748_v57 = vpop.eup %3747 }
 0x47d   :  { %v576_v11 = vpop.xlane.xlu1 %575  ;;  %v4480_v58 = vadd.f32 %v3036_v54, %v603_v55  ;;  %v593_v59 = vmul.f32 %v3748_v57, %v4376_v52 }
 0x47e   :  { %v581_v63 = vmul.f32 0.0078125, %v576_v11 }
 0x47f   :  { %v4484_v51 = vmul.f32 0.70710677, %v4480_v58  ;;  %v604_v4 = vmul.f32 %v3035_v49, %v593_v59 }
 0x480   :  { %v586_v6 = vadd.f32 1e-05, %v581_v63  ;;  %v3750_v41 = vpop.eup %3749 }
 0x481   :  { %v639_v60 = vand.u32 2147483647, %v4484_v51  ;;  %v4487_v8 = vadd.f32 %v3036_v54, %v604_v4  ;;  %v594_v10 = vmul.f32 %v3750_v41, %v4380_v56  ;;  %vm629_vm8 = vcmp.ge.f32.partialorder %v4484_v51, 0.0 }
 0x482   :  { %3753 = vrsqrt.f32 %v586_v6 }
 0x483   :  { %v644_v19 = vmul.f32 0.3275911, %v639_v60  ;;  %v4491_v12 = vmul.f32 0.70710677, %v4487_v8  ;;  %v605_v7 = vmul.f32 %v3035_v49, %v594_v10  ;;  %v709_v26 = vsub.f32 0.0, %v639_v60 }
 0x485   :  { %v3752_v52 = vpop.eup %3751  ;;  %v649_v14 = vadd.f32 1.0, %v644_v19  ;;  %v640_v0 = vand.u32 2147483647, %v4491_v12  ;;  %v4494_v61 = vadd.f32 %v3036_v54, %v605_v7  ;;  %v714_v29 = vmul.f32 %v709_v26, %v639_v60 }
 0x486   :  { %v595_v15 = vmul.f32 %v3752_v52, %v4384_v62  ;;  %vm630_vm9 = vcmp.ge.f32.partialorder %v4491_v12, 0.0 }
 0x487   :  { %3755 = vrcp.f32 %v649_v14  ;;  %v645_v17 = vmul.f32 0.3275911, %v640_v0  ;;  %v4498_v18 = vmul.f32 0.70710677, %v4494_v61  ;;  %v710_v30 = vsub.f32 0.0, %v640_v0 }
 0x488   :  { %v606_v20 = vmul.f32 %v3035_v49, %v595_v15 }
 0x489   :  { %v650_v56 = vadd.f32 1.0, %v645_v17  ;;  %v641_v5 = vand.u32 2147483647, %v4498_v18  ;;  %v715_v42 = vmul.f32 %v710_v30, %v640_v0  ;;  %vm631_vm10 = vcmp.ge.f32.partialorder %v4498_v18, 0.0 }
 0x48a   :  { %v4501_v28 = vadd.f32 %v3036_v54, %v606_v20  ;;  %v636_v18 = vsel %vm631_vm10, 1.0, %v3992_v37 }
 0x48b   :  { %3757 = vrcp.f32 %v650_v56  ;;  %v646_v25 = vmul.f32 0.3275911, %v641_v5  ;;  %v711_v44 = vsub.f32 0.0, %v641_v5  ;;  %v721_v48 = vmul.f32 1.442695, %v715_v42 }
 0x48c   :  { %v3754_v23 = vpop.eup %3753  ;;  %v4504_v16 = vmul.f32 0.70710677, %v4501_v28 }
 0x48d   :  { %v596_v62 = vmul.f32 %v3754_v23, %v4388_v1  ;;  %v651_v27 = vadd.f32 1.0, %v646_v25  ;;  %v719_v1 = vmul.f32 1.442695, %v714_v29  ;;  %v716_v55 = vmul.f32 %v711_v44, %v641_v5 }
 0x48e   :  { %v642_v22 = vand.u32 2147483647, %v4504_v16  ;;  %vm632_vm11 = vcmp.ge.f32.partialorder %v4504_v16, 0.0 }
 0x48f   :  { %v607_v36 = vmul.f32 %v3035_v49, %v596_v62  ;;  %3759 = vrcp.f32 %v651_v27  ;;  %v723_v10 = vmul.f32 1.442695, %v716_v55 }
 0x490   :  { %v647_v9 = vmul.f32 0.3275911, %v642_v22  ;;  %v712_v57 = vsub.f32 0.0, %v642_v22 }
 0x491   :  { %v3756_v24 = vpop.eup %3755  ;;  %v4508_v33 = vadd.f32 %v3036_v54, %v607_v36 }
 0x492   :  { %v664_v35 = vmul.f32 1.0614054, %v3756_v24  ;;  %v652_v34 = vadd.f32 1.0, %v647_v9  ;;  %v717_v19 = vmul.f32 %v712_v57, %v642_v22 }
 0x493   :  { %v4511_v31 = vmul.f32 0.70710677, %v4508_v33 }
 0x494   :  { %v669_v39 = vadd.f32 -1.4531521, %v664_v35  ;;  %3761 = vrcp.f32 %v652_v34  ;;  %v725_v23 = vmul.f32 1.442695, %v717_v19 }
 0x495   :  { %v3758_v40 = vpop.eup %3757  ;;  %v643_v43 = vand.u32 2147483647, %v4511_v31  ;;  %3763 = vpow2.f32 %v719_v1  ;;  %v634_v1 = vsel %vm629_vm8, 1.0, %v3992_v37  ;;  %vm633_vm12 = vcmp.ge.f32.partialorder %v4511_v31, 0.0  ;;  %v876_v31 = vld [vmem:[%s4918_s12] sm:$0x3] }
 0x496   :  { %v674_v38 = vmul.f32 %v3756_v24, %v669_v39  ;;  %v665_v2 = vmul.f32 1.0614054, %v3758_v40 }
 0x497   :  { %v648_v45 = vmul.f32 0.3275911, %v643_v43  ;;  %v713_v20 = vsub.f32 0.0, %v643_v43 }
 0x498   :  { %v679_v46 = vadd.f32 1.4214138, %v674_v38  ;;  %v670_v47 = vadd.f32 -1.4531521, %v665_v2 }
 0x499   :  { %v653_v49 = vadd.f32 1.0, %v648_v45  ;;  %v3760_v50 = vpop.eup %3759  ;;  %v718_v30 = vmul.f32 %v713_v20, %v643_v43  ;;  %v619_v43 = vmul.f32 0.5, %v4480_v58  ;;  %v620_v58 = vmul.f32 0.5, %v4487_v8 }
 0x49a   :  { %v684_v53 = vmul.f32 %v3756_v24, %v679_v46  ;;  %v675_v54 = vmul.f32 %v3758_v40, %v670_v47  ;;  %v666_v11 = vmul.f32 1.0614054, %v3760_v50  ;;  %v637_v20 = vsel %vm632_vm11, 1.0, %v3992_v37 }
 0x49b   :  { %3765 = vrcp.f32 %v653_v49  ;;  %v727_v47 = vmul.f32 1.442695, %v718_v30 }
 0x49c   :  { %v689_v59 = vadd.f32 -0.28449672, %v684_v53  ;;  %v680_v63 = vadd.f32 1.4214138, %v675_v54  ;;  %3767 = vpow2.f32 %v721_v48  ;;  %v671_v4 = vadd.f32 -1.4531521, %v666_v11 }
 0x49d   :  { %3769 = vpow2.f32 %v723_v10  ;;  %v635_v53 = vsel %vm630_vm9, 1.0, %v3992_v37 }
 0x49e   :  { %v4514_v6 = vpop.eup %3761  ;;  %v694_v41 = vmul.f32 %v3756_v24, %v689_v59  ;;  %v685_v60 = vmul.f32 %v3758_v40, %v680_v63  ;;  %v676_v7 = vmul.f32 %v3760_v50, %v671_v4  ;;  %3771 = vpow2.f32 %v725_v23 }
 0x49f   :  { %v667_v52 = vmul.f32 1.0614054, %v4514_v6  ;;  %v3764_v25 = vpop.eup %3763  ;;  %3773 = vpow2.f32 %v727_v47 }
 0x4a0   :  { %v699_v14 = vadd.f32 0.2548296, %v694_v41  ;;  %v690_v0 = vadd.f32 -0.28449672, %v685_v60  ;;  %v681_v15 = vadd.f32 1.4214138, %v676_v7 }
 0x4a1   :  { %v672_v17 = vadd.f32 -1.4531521, %v667_v52 }
 0x4a2   :  { %v704_v56 = vmul.f32 %v3756_v24, %v699_v14  ;;  %v695_v5 = vmul.f32 %v3758_v40, %v690_v0  ;;  %v686_v26 = vmul.f32 %v3760_v50, %v681_v15  ;;  %v621_v15 = vmul.f32 0.5, %v4494_v61 }
 0x4a3   :  { %v677_v62 = vmul.f32 %v4514_v6, %v672_v17 }
 0x4a4   :  { %v729_v27 = vmul.f32 %v3764_v25, %v704_v56  ;;  %v700_v22 = vadd.f32 0.2548296, %v695_v5  ;;  %v691_v9 = vadd.f32 -0.28449672, %v686_v26  ;;  %v622_v26 = vmul.f32 0.5, %v4501_v28 }
 0x4a5   :  { %v3766_v36 = vpop.eup %3765  ;;  %v682_v29 = vadd.f32 1.4214138, %v677_v62 }
 0x4a6   :  { %v734_v35 = vsub.f32 1.0, %v729_v27  ;;  %v705_v34 = vmul.f32 %v3758_v40, %v700_v22  ;;  %v668_v39 = vmul.f32 1.0614054, %v3766_v36  ;;  %v3768_v24 = vpop.eup %3767  ;;  %v696_v42 = vmul.f32 %v3760_v50, %v691_v9 }
 0x4a7   :  { %v687_v38 = vmul.f32 %v4514_v6, %v682_v29  ;;  %v3770_v57 = vpop.eup %3769  ;;  %v638_v9 = vsel %vm633_vm12, 1.0, %v3992_v37  ;;  %v623_v29 = vmul.f32 0.5, %v4508_v33  ;;  %v3037_v33 = vld [vmem:[%s4917_s11] ss:$0 sm:$0xff]  ;;  %s3994_s11 = smov 64  }
 0x4a8   :  { %v739_v2 = vmul.f32 %v734_v35, %v634_v1  ;;  %v730_v51 = vmul.f32 %v3768_v24, %v705_v34  ;;  %v673_v44 = vadd.f32 -1.4531521, %v668_v39  ;;  %v701_v45 = vadd.f32 0.2548296, %v696_v42  ;;  %v3772_v19 = vpop.eup %3771 }
 0x4a9   :  { %v692_v46 = vadd.f32 -0.28449672, %v687_v38  ;;  %v3774_v25 = vpop.eup %3773 }
 0x4aa   :  { %v744_v48 = vadd.f32 1.0, %v739_v2  ;;  %v735_v40 = vsub.f32 1.0, %v730_v51  ;;  %v678_v49 = vmul.f32 %v3766_v36, %v673_v44  ;;  %v706_v54 = vmul.f32 %v3760_v50, %v701_v45 }
 0x4ab   :  { %v697_v55 = vmul.f32 %v4514_v6, %v692_v46 }
 0x4ac   :  { %v749_v11 = vmul.f32 %v744_v48, %v619_v43  ;;  %v740_v59 = vmul.f32 %v735_v40, %v635_v53  ;;  %v683_v63 = vadd.f32 1.4214138, %v678_v49  ;;  %v731_v12 = vmul.f32 %v3770_v57, %v706_v54 }
 0x4ad   :  { %v702_v4 = vadd.f32 0.2548296, %v697_v55 }
 0x4ae   :  { %3296 = vmatmul.mubr.f32.vlgmr.msra.gmra.mrb[10].mxu1 %v749_v11  ;;  %v745_v41 = vadd.f32 1.0, %v740_v59  ;;  %v688_v60 = vmul.f32 %v3766_v36, %v683_v63  ;;  %v736_v50 = vsub.f32 1.0, %v731_v12 }
 0x4af   :  { %3298 = vmatprep.mubr.msk.f32.mxu1 %vm3990_vm2, %v3991_v21  ;;  %3600 = vmatpush3.bf16.msra.mxu1 %v4455_v32  ;;  %v707_v10 = vmul.f32 %v4514_v6, %v702_v4 }
 0x4b0   :  { %v750_v7 = vmul.f32 %v745_v41, %v620_v58  ;;  %3601 = vmatprep.subr.bf16.mxu1 %v3989_v3  ;;  %v693_v52 = vadd.f32 -0.28449672, %v688_v60  ;;  %v741_v14 = vmul.f32 %v736_v50, %v636_v18  ;;  %v962_v58 = vpop.permute.xlu1 %961 }
 0x4b1   :  { %v732_v8 = vmul.f32 %v3772_v19, %v707_v10 }
 0x4b2   :  { %3299 = vmatmul.mubr.f32.gmra.mrb[12].mxu1 %v750_v7  ;;  %v698_v0 = vmul.f32 %v3766_v36, %v693_v52  ;;  %v746_v17 = vadd.f32 1.0, %v741_v14 }
 0x4b3   :  { %3301 = vmatprep.mubr.msk.f32.mxu1 %vm3990_vm2, %v3991_v21  ;;  %v737_v6 = vsub.f32 1.0, %v732_v8  ;;  %3603 = vmatpush3.bf16.msra.mxu1 %v4465_v13 }
 0x4b4   :  { %v703_v56 = vadd.f32 0.2548296, %v698_v0  ;;  %3622 = vmatprep.subr.bf16.mxu1 %v3989_v3  ;;  %v751_v5 = vmul.f32 %v746_v17, %v621_v15 }
 0x4b5   :  { %v742_v23 = vmul.f32 %v737_v6, %v637_v20 }
 0x4b6   :  { %v708_v16 = vmul.f32 %v3766_v36, %v703_v56  ;;  %3302 = vmatmul.mubr.f32.gmra.mrb[14].mxu1 %v751_v5 }
 0x4b7   :  { %v747_v62 = vadd.f32 1.0, %v742_v23  ;;  %3304 = vmatprep.mubr.msk.f32.mxu1 %vm3990_vm2, %v3991_v21 }
 0x4b8   :  { %v733_v61 = vmul.f32 %v3774_v25, %v708_v16 }
 0x4b9   :  { %v752_v27 = vmul.f32 %v747_v62, %v622_v26 }
 0x4ba   :  { %v738_v22 = vsub.f32 1.0, %v733_v61 }
 0x4bb   :  { %3305 = vmatmul.mubr.f32.gmra.mrb[16].mxu1 %v752_v27 }
 0x4bc   :  { %3307 = vmatprep.mubr.msk.f32.mxu1 %vm3990_vm2, %v3991_v21  ;;  %v743_v36 = vmul.f32 %v738_v22, %v638_v9 }
 0x4be   :  { %v748_v30 = vadd.f32 1.0, %v743_v36 }
 0x4c0   :  { %v753_v28 = vmul.f32 %v748_v30, %v623_v29 }
 0x4c2   :  { %3308 = vmatmul.mubr.f32.gmra.mrb[18].mxu1 %v753_v28 }
 0x4c3   :  { %3318 = vmatprep.mubr.msk.f32.mxu1 %vm3990_vm2, %v3991_v21 }
 0x4c6   :  { %3319 = vmatmul.mubr.msk.f32.vlgmr.msra.gmra.mrb[20].mxu1 %vm101_vm0, %v876_v31 }
 0x4c7   :  { %3624 = vmatpush3.bf16.msra.mxu1 %v4455_v32  ;;  %3362 = vmatprep.mubr.msk.f32.mxu1 %vm3990_vm2, %v3991_v21 }
 0x4c8   :  { %3625 = vmatprep.subr.bf16.mxu1 %v3989_v3 }
 0x4cb   :  { %3627 = vmatpush3.bf16.msra.mxu1 %v4465_v13 }
 0x4cc   :  { %3634 = vmatprep.subr.bf16.mxu1 %v3989_v3 }
 0x581   :  { %v843_v35 = vpop.f32.mrb[10].mxu1 }
 0x582   :  { %v844_v34 = vadd.f32 %v3037_v33, %v843_v35  ;;  %v3297_v39 = vpop.f32.mrb[11].mxu1 }
 0x584   :  { %867 = vst [vmem:[#allocation2] sm:$0xff] %v844_v34 }
 0x585   :  { %v848_v24 = vpop.f32.mrb[12].mxu1 }
 0x586   :  { %v849_v1 = vadd.f32 %v3037_v33, %v848_v24  ;;  %v3300_v42 = vpop.f32.mrb[13].mxu1 }
 0x588   :  { %868 = vst [vmem:[#allocation2 + $0x8] sm:$0xff] %v849_v1 }
 0x589   :  { %v853_v38 = vpop.f32.mrb[14].mxu1 }
 0x58a   :  { %v854_v2 = vadd.f32 %v3037_v33, %v853_v38  ;;  %v3303_v51 = vpop.f32.mrb[15].mxu1 }
 0x58b   :  { %v878_v40 = vld [vmem:[#allocation2] sm:$0x3]  ;;  %v987_v52 = vld [vmem:[#allocation2 + $0x2] sm:$0x3]  ;;  %v1090_v9 = vld [vmem:[#allocation2 + $0x4] sm:$0x3] }
 0x58c   :  { %869 = vst [vmem:[#allocation2 + $0x10] sm:$0xff] %v854_v2 }
 0x58e   :  { %v858_v44 = vpop.f32.mrb[16].mxu1 }
 0x58f   :  { %v859_v45 = vadd.f32 %v3037_v33, %v858_v44  ;;  %v3306_v46 = vpop.f32.mrb[17].mxu1 }
 0x590   :  { %v1193_v46 = vld [vmem:[#allocation2 + $0x6] sm:$0x3] }
 0x591   :  { %870 = vst [vmem:[#allocation2 + $0x18] sm:$0xff] %v859_v45 }
 0x595   :  { %v863_v47 = vpop.f32.mrb[18].mxu1 }
 0x596   :  { %v864_v43 = vadd.f32 %v3037_v33, %v863_v47  ;;  %v3309_v48 = vpop.f32.mrb[19].mxu1 }
 0x598   :  { %871 = vst [vmem:[#allocation2 + $0x20] sm:$0x3] %v864_v43 }
 0x599   :  { %v948_v49 = vpop.f32.mrb[20].mxu1 }
 0x59a   :  { %v952_v53 = vadd.f32 %v948_v49, %v878_v40  ;;  %v3320_v54 = vpop.f32.mrb[21].mxu1 }
 0x59c   :  { %3775 = vtanh.f32 %v952_v53  ;;  %v3039_v57 = vmul.f32 -1.442695, %v952_v53 }
 0x59e   :  { %3777 = vpow2.f32 %v3039_v57 }
 0x5a6   :  { %v3776_v55 = vpop.eup %3775 }
 0x5a7   :  { %966 = vrot.lane.b32.xlu0 %v3776_v55, %s3994_s11 }
 0x5a8   :  { %v3778_v11 = vpop.eup %3777 }
 0x5a9   :  { %v956_v59 = vadd.f32 1.0, %v3778_v11 }
 0x5ab   :  { %3779 = vrcp.f32 %v956_v59 }
 0x5b5   :  { %v3780_v63 = vpop.eup %3779 }
 0x5b6   :  { %v964_v41 = vmul.f32 %v3780_v63, %v962_v58 }
 0x619   :  { %v967_v12 = vpop.permute.xlu0 %966 }
 0x61a   :  { %v969_v4 = vmul.f32 %v3780_v63, %v967_v12 }
 0x61c   :  { %971 = vrot.lane.b32.xlu1 %v969_v4, %s3993_s1 }
 0x68e   :  { %v972_v60 = vpop.permute.xlu1 %971 }
 0x68f   :  { %v974_v50 = vadd.f32 %v972_v60, %v964_v41 }
 0x691   :  { %3781 = vtanh.f32 %v974_v50 }
 0x69b   :  { %v3782_v10 = vpop.eup %3781 }
 0x69c   :  { %977 = vrot.lane.b32.xlu1 %v3782_v10, %s3994_s11 }
 0x70e   :  { %v978_v19 = vpop.permute.xlu1 %977 }
 0x70f   :  { %v980_v7 = vmul.f32 %v3780_v63, %v978_v19 }
 0x711   :  { %982 = vrot.lane.b32.xlu0 %v980_v7, %s3993_s1 }
 0x783   :  { %v983_v18 = vpop.permute.xlu0 %982 }
 0x784   :  { %986 = vst.msk [vmem:[#allocation3] sm:$0x3] %vm985_vm13, %v983_v18  ;;  %3330 = vmatmul.mubr.msk.f32.vlgmr.msra.gmra.mrb[10].mxu0 %vm101_vm0, %v983_v18 }
 0x785   :  { %3612 = vmatpush3.bf16.msra.mxu0 %v4455_v32  ;;  %3340 = vmatprep.mubr.msk.f32.mxu0 %vm3990_vm2, %v3991_v21 }
 0x786   :  { %3613 = vmatprep.subr.bf16.mxu0 %v3989_v3 }
 0x789   :  { %3615 = vmatpush3.bf16.msra.mxu0 %v4465_v13 }
 0x78a   :  { %3616 = vmatprep.subr.bf16.mxu0 %v3989_v3 }
 0x857   :  { %v1056_v14 = vpop.f32.mrb[10].mxu0 }
 0x858   :  { %v1060_v8 = vadd.f32 %v1056_v14, %v987_v52  ;;  %v3331_v0 = vpop.f32.mrb[11].mxu0 }
 0x85a   :  { %3783 = vtanh.f32 %v1060_v8  ;;  %v3041_v17 = vmul.f32 -1.442695, %v1060_v8 }
 0x85c   :  { %3785 = vpow2.f32 %v3041_v17 }
 0x864   :  { %v3784_v15 = vpop.eup %3783 }
 0x865   :  { %1070 = vrot.lane.b32.xlu1 %v3784_v15, %s3994_s11 }
 0x866   :  { %v3786_v6 = vpop.eup %3785 }
 0x867   :  { %v1064_v20 = vadd.f32 1.0, %v3786_v6 }
 0x869   :  { %3787 = vrcp.f32 %v1064_v20 }
 0x873   :  { %v3788_v56 = vpop.eup %3787 }
 0x874   :  { %v1068_v16 = vmul.f32 %v3788_v56, %v974_v50  ;;  %v1296_v50 = vld [vmem:[#allocation2 + $0x8] sm:$0x3] }
 0x8d7   :  { %v1071_v5 = vpop.permute.xlu1 %1070 }
 0x8d8   :  { %v1073_v23 = vmul.f32 %v3788_v56, %v1071_v5 }
 0x8da   :  { %1075 = vrot.lane.b32.xlu0 %v1073_v23, %s3993_s1 }
 0x94c   :  { %v1076_v25 = vpop.permute.xlu0 %1075 }
 0x94d   :  { %v1078_v26 = vadd.f32 %v1076_v25, %v1068_v16 }
 0x94f   :  { %3789 = vtanh.f32 %v1078_v26 }
 0x959   :  { %v3790_v62 = vpop.eup %3789 }
 0x95a   :  { %1081 = vrot.lane.b32.xlu1 %v3790_v62, %s3994_s11 }
 0x9cc   :  { %v1082_v61 = vpop.permute.xlu1 %1081 }
 0x9cd   :  { %v1084_v27 = vmul.f32 %v3788_v56, %v1082_v61 }
 0x9cf   :  { %1086 = vrot.lane.b32.xlu0 %v1084_v27, %s3993_s1 }
 0xa41   :  { %v1087_v22 = vpop.permute.xlu0 %1086 }
 0xa42   :  { %1089 = vst.msk [vmem:[#allocation3 + $0x2] sm:$0x3] %vm985_vm13, %v1087_v22  ;;  %3341 = vmatmul.mubr.msk.f32.vlgmr.msra.gmra.mrb[12].mxu0 %vm101_vm0, %v1087_v22 }
 0xa43   :  { %3618 = vmatpush3.bf16.msra.mxu0 %v4455_v32  ;;  %3351 = vmatprep.mubr.msk.f32.mxu0 %vm3990_vm2, %v3991_v21 }
 0xa44   :  { %3619 = vmatprep.subr.bf16.mxu0 %v3989_v3 }
 0xa47   :  { %3621 = vmatpush3.bf16.msra.mxu0 %v4465_v13 }
 0xa48   :  { %3628 = vmatprep.subr.bf16.mxu0 %v3989_v3 }
 0xb15   :  { %v1159_v36 = vpop.f32.mrb[12].mxu0 }
 0xb16   :  { %v1163_v29 = vadd.f32 %v1159_v36, %v1090_v9  ;;  %v3342_v30 = vpop.f32.mrb[13].mxu0 }
 0xb18   :  { %3791 = vtanh.f32 %v1163_v29  ;;  %v3043_v31 = vmul.f32 -1.442695, %v1163_v29 }
 0xb1a   :  { %3793 = vpow2.f32 %v3043_v31 }
 0xb22   :  { %v3792_v28 = vpop.eup %3791 }
 0xb23   :  { %1173 = vrot.lane.b32.xlu1 %v3792_v28, %s3994_s11 }
 0xb24   :  { %v3794_v33 = vpop.eup %3793 }
 0xb25   :  { %v1167_v35 = vadd.f32 1.0, %v3794_v33 }
 0xb27   :  { %3795 = vrcp.f32 %v1167_v35 }
 0xb31   :  { %v3796_v34 = vpop.eup %3795 }
 0xb32   :  { %v1171_v1 = vmul.f32 %v3796_v34, %v1078_v26  ;;  %v1399_v26 = vld [vmem:[#allocation2 + $0xa] sm:$0x3] }
 0xb95   :  { %v1174_v39 = vpop.permute.xlu1 %1173 }
 0xb96   :  { %v1176_v24 = vmul.f32 %v3796_v34, %v1174_v39 }
 0xb98   :  { %1178 = vrot.lane.b32.xlu0 %v1176_v24, %s3993_s1 }
 0xc0a   :  { %v1179_v42 = vpop.permute.xlu0 %1178 }
 0xc0b   :  { %v1181_v38 = vadd.f32 %v1179_v42, %v1171_v1 }
 0xc0d   :  { %3797 = vtanh.f32 %v1181_v38 }
 0xc17   :  { %v3798_v2 = vpop.eup %3797 }
 0xc18   :  { %1184 = vrot.lane.b32.xlu1 %v3798_v2, %s3994_s11 }
 0xc8a   :  { %v1185_v51 = vpop.permute.xlu1 %1184 }
 0xc8b   :  { %v1187_v44 = vmul.f32 %v3796_v34, %v1185_v51 }
 0xc8d   :  { %1189 = vrot.lane.b32.xlu0 %v1187_v44, %s3993_s1 }
 0xcff   :  { %v1190_v45 = vpop.permute.xlu0 %1189 }
 0xd00   :  { %1192 = vst.msk [vmem:[#allocation3 + $0x4] sm:$0x3] %vm985_vm13, %v1190_v45  ;;  %3352 = vmatmul.mubr.msk.f32.vlgmr.msra.gmra.mrb[14].mxu0 %vm101_vm0, %v1190_v45 }
 0xd01   :  { %3630 = vmatpush3.bf16.msra.mxu0 %v4455_v32  ;;  %3373 = vmatprep.mubr.msk.f32.mxu0 %vm3990_vm2, %v3991_v21 }
 0xd02   :  { %3631 = vmatprep.subr.bf16.mxu0 %v3989_v3 }
 0xd05   :  { %3633 = vmatpush3.bf16.msra.mxu0 %v4465_v13 }
 0xd06   :  { %3640 = vmatprep.subr.bf16.mxu0 %v3989_v3 }
 0xdd3   :  { %v1262_v47 = vpop.f32.mrb[14].mxu0 }
 0xdd4   :  { %v1266_v43 = vadd.f32 %v1262_v47, %v1193_v46  ;;  %v3353_v48 = vpop.f32.mrb[15].mxu0 }
 0xdd6   :  { %3799 = vtanh.f32 %v1266_v43  ;;  %v3045_v49 = vmul.f32 -1.442695, %v1266_v43 }
 0xdd8   :  { %3801 = vpow2.f32 %v3045_v49 }
 0xde0   :  { %v3800_v40 = vpop.eup %3799 }
 0xde1   :  { %1276 = vrot.lane.b32.xlu1 %v3800_v40, %s3994_s11 }
 0xde2   :  { %v3802_v53 = vpop.eup %3801 }
 0xde3   :  { %v1270_v54 = vadd.f32 1.0, %v3802_v53 }
 0xde5   :  { %3803 = vrcp.f32 %v1270_v54 }
 0xdef   :  { %v3804_v55 = vpop.eup %3803 }
 0xdf0   :  { %v1274_v59 = vmul.f32 %v3804_v55, %v1181_v38  ;;  %v1502_v38 = vld [vmem:[#allocation2 + $0xc] sm:$0x3] }
 0xe53   :  { %v1277_v57 = vpop.permute.xlu1 %1276 }
 0xe54   :  { %v1279_v11 = vmul.f32 %v3804_v55, %v1277_v57 }
 0xe56   :  { %1281 = vrot.lane.b32.xlu0 %v1279_v11, %s3993_s1 }
 0xec8   :  { %v1282_v63 = vpop.permute.xlu0 %1281 }
 0xec9   :  { %v1284_v12 = vadd.f32 %v1282_v63, %v1274_v59 }
 0xecb   :  { %3805 = vtanh.f32 %v1284_v12 }
 0xed5   :  { %v3806_v4 = vpop.eup %3805 }
 0xed6   :  { %1287 = vrot.lane.b32.xlu1 %v3806_v4, %s3994_s11 }
 0xf48   :  { %v1288_v58 = vpop.permute.xlu1 %1287 }
 0xf49   :  { %v1290_v41 = vmul.f32 %v3804_v55, %v1288_v58 }
 0xf4b   :  { %1292 = vrot.lane.b32.xlu0 %v1290_v41, %s3993_s1 }
 0xfbd   :  { %v1293_v60 = vpop.permute.xlu0 %1292 }
 0xfbe   :  { %1295 = vst.msk [vmem:[#allocation3 + $0x6] sm:$0x3] %vm985_vm13, %v1293_v60  ;;  %3363 = vmatmul.mubr.msk.f32.vlgmr.msra.gmra.mrb[22].mxu1 %vm101_vm0, %v1293_v60 }
 0xfbf   :  { %3636 = vmatpush3.bf16.msra.mxu1 %v4455_v32  ;;  %3384 = vmatprep.mubr.msk.f32.mxu1 %vm3990_vm2, %v3991_v21 }
 0xfc0   :  { %3637 = vmatprep.subr.bf16.mxu1 %v3989_v3 }
 0xfc3   :  { %3639 = vmatpush3.bf16.msra.mxu1 %v4465_v13 }
 0xfc4   :  { %3646 = vmatprep.subr.bf16.mxu1 %v3989_v3 }
0x1091   :  { %v1365_v10 = vpop.f32.mrb[22].mxu1 }
0x1092   :  { %v1369_v19 = vadd.f32 %v1365_v10, %v1296_v50  ;;  %v3364_v7 = vpop.f32.mrb[23].mxu1 }
0x1094   :  { %3807 = vtanh.f32 %v1369_v19  ;;  %v3047_v52 = vmul.f32 -1.442695, %v1369_v19 }
0x1096   :  { %3809 = vpow2.f32 %v3047_v52 }
0x109e   :  { %v3808_v18 = vpop.eup %3807 }
0x109f   :  { %1379 = vrot.lane.b32.xlu1 %v3808_v18, %s3994_s11 }
0x10a0   :  { %v3810_v14 = vpop.eup %3809 }
0x10a1   :  { %v1373_v8 = vadd.f32 1.0, %v3810_v14 }
0x10a3   :  { %3811 = vrcp.f32 %v1373_v8 }
0x10ad   :  { %v3812_v0 = vpop.eup %3811 }
0x10ae   :  { %v1377_v6 = vmul.f32 %v3812_v0, %v1284_v12  ;;  %v1605_v12 = vld [vmem:[#allocation2 + $0xe] sm:$0x3] }
0x1111   :  { %v1380_v15 = vpop.permute.xlu1 %1379 }
0x1112   :  { %v1382_v17 = vmul.f32 %v3812_v0, %v1380_v15 }
0x1114   :  { %1384 = vrot.lane.b32.xlu0 %v1382_v17, %s3993_s1 }
0x1186   :  { %v1385_v20 = vpop.permute.xlu0 %1384 }
0x1187   :  { %v1387_v56 = vadd.f32 %v1385_v20, %v1377_v6 }
0x1189   :  { %3813 = vtanh.f32 %v1387_v56 }
0x1193   :  { %v3814_v5 = vpop.eup %3813 }
0x1194   :  { %1390 = vrot.lane.b32.xlu1 %v3814_v5, %s3994_s11 }
0x1206   :  { %v1391_v23 = vpop.permute.xlu1 %1390 }
0x1207   :  { %v1393_v16 = vmul.f32 %v3812_v0, %v1391_v23 }
0x1209   :  { %1395 = vrot.lane.b32.xlu0 %v1393_v16, %s3993_s1 }
0x127b   :  { %v1396_v25 = vpop.permute.xlu0 %1395 }
0x127c   :  { %1398 = vst.msk [vmem:[#allocation3 + $0x8] sm:$0x3] %vm985_vm13, %v1396_v25  ;;  %3374 = vmatmul.mubr.msk.f32.vlgmr.msra.gmra.mrb[16].mxu0 %vm101_vm0, %v1396_v25 }
0x127d   :  { %3642 = vmatpush3.bf16.msra.mxu0 %v4455_v32  ;;  %3395 = vmatprep.mubr.msk.f32.mxu0 %vm3990_vm2, %v3991_v21 }
0x127e   :  { %3643 = vmatprep.subr.bf16.mxu0 %v3989_v3 }
0x1281   :  { %3645 = vmatpush3.bf16.msra.mxu0 %v4465_v13 }
0x1282   :  { %3652 = vmatprep.subr.bf16.mxu0 %v3989_v3 }
0x134f   :  { %v1468_v62 = vpop.f32.mrb[16].mxu0 }
0x1350   :  { %v1472_v61 = vadd.f32 %v1468_v62, %v1399_v26  ;;  %v3375_v27 = vpop.f32.mrb[17].mxu0 }
0x1352   :  { %3815 = vtanh.f32 %v1472_v61  ;;  %v3049_v9 = vmul.f32 -1.442695, %v1472_v61 }
0x1354   :  { %3817 = vpow2.f32 %v3049_v9 }
0x135c   :  { %v3816_v22 = vpop.eup %3815 }
0x135d   :  { %1482 = vrot.lane.b32.xlu1 %v3816_v22, %s3994_s11 }
0x135e   :  { %v3818_v36 = vpop.eup %3817 }
0x135f   :  { %v1476_v29 = vadd.f32 1.0, %v3818_v36 }
0x1361   :  { %3819 = vrcp.f32 %v1476_v29 }
0x136b   :  { %v3820_v30 = vpop.eup %3819 }
0x136c   :  { %v1480_v33 = vmul.f32 %v3820_v30, %v1387_v56  ;;  %v1708_v56 = vld [vmem:[#allocation2 + $0x10] sm:$0x3] }
0x13cf   :  { %v1483_v28 = vpop.permute.xlu1 %1482 }
0x13d0   :  { %v1485_v31 = vmul.f32 %v3820_v30, %v1483_v28 }
0x13d2   :  { %1487 = vrot.lane.b32.xlu0 %v1485_v31, %s3993_s1 }
0x1444   :  { %v1488_v35 = vpop.permute.xlu0 %1487 }
0x1445   :  { %v1490_v34 = vadd.f32 %v1488_v35, %v1480_v33 }
0x1447   :  { %3821 = vtanh.f32 %v1490_v34 }
0x1451   :  { %v3822_v39 = vpop.eup %3821 }
0x1452   :  { %1493 = vrot.lane.b32.xlu1 %v3822_v39, %s3994_s11 }
0x14c4   :  { %v1494_v24 = vpop.permute.xlu1 %1493 }
0x14c5   :  { %v1496_v1 = vmul.f32 %v3820_v30, %v1494_v24 }
0x14c7   :  { %1498 = vrot.lane.b32.xlu0 %v1496_v1, %s3993_s1 }
0x1539   :  { %v1499_v42 = vpop.permute.xlu0 %1498 }
0x153a   :  { %1501 = vst.msk [vmem:[#allocation3 + $0xa] sm:$0x3] %vm985_vm13, %v1499_v42  ;;  %3385 = vmatmul.mubr.msk.f32.vlgmr.msra.gmra.mrb[24].mxu1 %vm101_vm0, %v1499_v42 }
0x153b   :  { %3648 = vmatpush3.bf16.msra.mxu1 %v4455_v32  ;;  %3406 = vmatprep.mubr.msk.f32.mxu1 %vm3990_vm2, %v3991_v21 }
0x153c   :  { %3649 = vmatprep.subr.bf16.mxu1 %v3989_v3 }
0x153f   :  { %3651 = vmatpush3.bf16.msra.mxu1 %v4465_v13 }
0x1540   :  { %3658 = vmatprep.subr.bf16.mxu1 %v3989_v3 }
0x160d   :  { %v1571_v2 = vpop.f32.mrb[24].mxu1 }
0x160e   :  { %v1575_v51 = vadd.f32 %v1571_v2, %v1502_v38  ;;  %v3386_v44 = vpop.f32.mrb[25].mxu1 }
0x1610   :  { %3823 = vtanh.f32 %v1575_v51  ;;  %v3051_v46 = vmul.f32 -1.442695, %v1575_v51 }
0x1612   :  { %3825 = vpow2.f32 %v3051_v46 }
0x161a   :  { %v3824_v45 = vpop.eup %3823 }
0x161b   :  { %1585 = vrot.lane.b32.xlu1 %v3824_v45, %s3994_s11 }
0x161c   :  { %v3826_v47 = vpop.eup %3825 }
0x161d   :  { %v1579_v43 = vadd.f32 1.0, %v3826_v47 }
0x161f   :  { %3827 = vrcp.f32 %v1579_v43 }
0x1629   :  { %v3828_v48 = vpop.eup %3827 }
0x162a   :  { %v1583_v53 = vmul.f32 %v3828_v48, %v1490_v34  ;;  %v1811_v34 = vld [vmem:[#allocation2 + $0x12] sm:$0x3] }
0x168d   :  { %v1586_v40 = vpop.permute.xlu1 %1585 }
0x168e   :  { %v1588_v49 = vmul.f32 %v3828_v48, %v1586_v40 }
0x1690   :  { %1590 = vrot.lane.b32.xlu0 %v1588_v49, %s3993_s1 }
0x1702   :  { %v1591_v54 = vpop.permute.xlu0 %1590 }
0x1703   :  { %v1593_v55 = vadd.f32 %v1591_v54, %v1583_v53 }
0x1705   :  { %3829 = vtanh.f32 %v1593_v55 }
0x170f   :  { %v3830_v57 = vpop.eup %3829 }
0x1710   :  { %1596 = vrot.lane.b32.xlu1 %v3830_v57, %s3994_s11 }
0x1782   :  { %v1597_v11 = vpop.permute.xlu1 %1596 }
0x1783   :  { %v1599_v59 = vmul.f32 %v3828_v48, %v1597_v11 }
0x1785   :  { %1601 = vrot.lane.b32.xlu0 %v1599_v59, %s3993_s1 }
0x17f7   :  { %v1602_v63 = vpop.permute.xlu0 %1601 }
0x17f8   :  { %1604 = vst.msk [vmem:[#allocation3 + $0xc] sm:$0x3] %vm985_vm13, %v1602_v63  ;;  %3396 = vmatmul.mubr.msk.f32.vlgmr.msra.gmra.mrb[18].mxu0 %vm101_vm0, %v1602_v63 }
0x17f9   :  { %3654 = vmatpush3.bf16.msra.mxu0 %v4455_v32  ;;  %3417 = vmatprep.mubr.msk.f32.mxu0 %vm3990_vm2, %v3991_v21 }
0x17fa   :  { %3655 = vmatprep.subr.bf16.mxu0 %v3989_v3 }
0x17fd   :  { %3657 = vmatpush3.bf16.msra.mxu0 %v4465_v13 }
0x17fe   :  { %3664 = vmatprep.subr.bf16.mxu0 %v3989_v3 }
0x18cb   :  { %v1674_v4 = vpop.f32.mrb[18].mxu0 }
0x18cc   :  { %v1678_v58 = vadd.f32 %v1674_v4, %v1605_v12  ;;  %v3397_v41 = vpop.f32.mrb[19].mxu0 }
0x18ce   :  { %3831 = vtanh.f32 %v1678_v58  ;;  %v3053_v50 = vmul.f32 -1.442695, %v1678_v58 }
0x18d0   :  { %3833 = vpow2.f32 %v3053_v50 }
0x18d8   :  { %v3832_v60 = vpop.eup %3831 }
0x18d9   :  { %1688 = vrot.lane.b32.xlu1 %v3832_v60, %s3994_s11 }
0x18da   :  { %v3834_v10 = vpop.eup %3833 }
0x18db   :  { %v1682_v19 = vadd.f32 1.0, %v3834_v10 }
0x18dd   :  { %3835 = vrcp.f32 %v1682_v19 }
0x18e7   :  { %v3836_v7 = vpop.eup %3835 }
0x18e8   :  { %v1686_v14 = vmul.f32 %v3836_v7, %v1593_v55  ;;  %v1914_v55 = vld [vmem:[#allocation2 + $0x14] sm:$0x3] }
0x194b   :  { %v1689_v18 = vpop.permute.xlu1 %1688 }
0x194c   :  { %v1691_v52 = vmul.f32 %v3836_v7, %v1689_v18 }
0x194e   :  { %1693 = vrot.lane.b32.xlu0 %v1691_v52, %s3993_s1 }
0x19c0   :  { %v1694_v8 = vpop.permute.xlu0 %1693 }
0x19c1   :  { %v1696_v0 = vadd.f32 %v1694_v8, %v1686_v14 }
0x19c3   :  { %3837 = vtanh.f32 %v1696_v0 }
0x19cd   :  { %v3838_v15 = vpop.eup %3837 }
0x19ce   :  { %1699 = vrot.lane.b32.xlu1 %v3838_v15, %s3994_s11 }
0x1a40   :  { %v1700_v17 = vpop.permute.xlu1 %1699 }
0x1a41   :  { %v1702_v6 = vmul.f32 %v3836_v7, %v1700_v17 }
0x1a43   :  { %1704 = vrot.lane.b32.xlu0 %v1702_v6, %s3993_s1 }
0x1ab5   :  { %v1705_v20 = vpop.permute.xlu0 %1704 }
0x1ab6   :  { %1707 = vst.msk [vmem:[#allocation3 + $0xe] sm:$0x3] %vm985_vm13, %v1705_v20  ;;  %3407 = vmatmul.mubr.msk.f32.vlgmr.msra.gmra.mrb[26].mxu1 %vm101_vm0, %v1705_v20 }
0x1ab7   :  { %3660 = vmatpush3.bf16.msra.mxu1 %v4455_v32  ;;  %3428 = vmatprep.mubr.msk.f32.mxu1 %vm3990_vm2, %v3991_v21 }
0x1ab8   :  { %3661 = vmatprep.subr.bf16.mxu1 %v3989_v3 }
0x1abb   :  { %3663 = vmatpush3.bf16.msra.mxu1 %v4465_v13 }
0x1abc   :  { %3670 = vmatprep.subr.bf16.mxu1 %v3989_v3 }
0x1b89   :  { %v1777_v5 = vpop.f32.mrb[26].mxu1 }
0x1b8a   :  { %v1781_v23 = vadd.f32 %v1777_v5, %v1708_v56  ;;  %v3408_v16 = vpop.f32.mrb[27].mxu1 }
0x1b8c   :  { %3839 = vtanh.f32 %v1781_v23  ;;  %v3055_v26 = vmul.f32 -1.442695, %v1781_v23 }
0x1b8e   :  { %3841 = vpow2.f32 %v3055_v26 }
0x1b96   :  { %v3840_v25 = vpop.eup %3839 }
0x1b97   :  { %1791 = vrot.lane.b32.xlu1 %v3840_v25, %s3994_s11 }
0x1b98   :  { %v3842_v62 = vpop.eup %3841 }
0x1b99   :  { %v1785_v61 = vadd.f32 1.0, %v3842_v62 }
0x1b9b   :  { %3843 = vrcp.f32 %v1785_v61 }
0x1ba5   :  { %v3844_v27 = vpop.eup %3843 }
0x1ba6   :  { %v1789_v36 = vmul.f32 %v3844_v27, %v1696_v0  ;;  %v2017_v0 = vld [vmem:[#allocation2 + $0x16] sm:$0x3] }
0x1c09   :  { %v1792_v22 = vpop.permute.xlu1 %1791 }
0x1c0a   :  { %v1794_v9 = vmul.f32 %v3844_v27, %v1792_v22 }
0x1c0c   :  { %1796 = vrot.lane.b32.xlu0 %v1794_v9, %s3993_s1 }
0x1c7e   :  { %v1797_v29 = vpop.permute.xlu0 %1796 }
0x1c7f   :  { %v1799_v30 = vadd.f32 %v1797_v29, %v1789_v36 }
0x1c81   :  { %3845 = vtanh.f32 %v1799_v30 }
0x1c8b   :  { %v3846_v28 = vpop.eup %3845 }
0x1c8c   :  { %1802 = vrot.lane.b32.xlu1 %v3846_v28, %s3994_s11 }
0x1cfe   :  { %v1803_v31 = vpop.permute.xlu1 %1802 }
0x1cff   :  { %v1805_v33 = vmul.f32 %v3844_v27, %v1803_v31 }
0x1d01   :  { %1807 = vrot.lane.b32.xlu0 %v1805_v33, %s3993_s1 }
0x1d73   :  { %v1808_v35 = vpop.permute.xlu0 %1807 }
0x1d74   :  { %1810 = vst.msk [vmem:[#allocation3 + $0x10] sm:$0x3] %vm985_vm13, %v1808_v35  ;;  %3418 = vmatmul.mubr.msk.f32.vlgmr.msra.gmra.mrb[20].mxu0 %vm101_vm0, %v1808_v35 }
0x1d75   :  { %3666 = vmatpush3.bf16.msra.mxu0 %v4455_v32  ;;  %3439 = vmatprep.mubr.msk.f32.mxu0 %vm3990_vm2, %v3991_v21 }
0x1d76   :  { %3667 = vmatprep.subr.bf16.mxu0 %v3989_v3 }
0x1d79   :  { %3669 = vmatpush3.bf16.msra.mxu0 %v4465_v13 }
0x1d7a   :  { %3676 = vmatprep.subr.bf16.mxu0 %v3989_v3 }
0x1e47   :  { %v1880_v39 = vpop.f32.mrb[20].mxu0 }
0x1e48   :  { %v1884_v24 = vadd.f32 %v1880_v39, %v1811_v34  ;;  %v3419_v1 = vpop.f32.mrb[21].mxu0 }
0x1e4a   :  { %3847 = vtanh.f32 %v1884_v24  ;;  %v3057_v38 = vmul.f32 -1.442695, %v1884_v24 }
0x1e4c   :  { %3849 = vpow2.f32 %v3057_v38 }
0x1e54   :  { %v3848_v42 = vpop.eup %3847 }
0x1e55   :  { %1894 = vrot.lane.b32.xlu1 %v3848_v42, %s3994_s11 }
0x1e56   :  { %v3850_v2 = vpop.eup %3849 }
0x1e57   :  { %v1888_v51 = vadd.f32 1.0, %v3850_v2 }
0x1e59   :  { %3851 = vrcp.f32 %v1888_v51 }
0x1e63   :  { %v3852_v44 = vpop.eup %3851 }
0x1e64   :  { %v1892_v47 = vmul.f32 %v3852_v44, %v1799_v30  ;;  %v2120_v30 = vld [vmem:[#allocation2 + $0x18] sm:$0x3] }
0x1ec7   :  { %v1895_v45 = vpop.permute.xlu1 %1894 }
0x1ec8   :  { %v1897_v46 = vmul.f32 %v3852_v44, %v1895_v45 }
0x1eca   :  { %1899 = vrot.lane.b32.xlu0 %v1897_v46, %s3993_s1 }
0x1f3c   :  { %v1900_v43 = vpop.permute.xlu0 %1899 }
0x1f3d   :  { %v1902_v48 = vadd.f32 %v1900_v43, %v1892_v47 }
0x1f3f   :  { %3853 = vtanh.f32 %v1902_v48 }
0x1f49   :  { %v3854_v40 = vpop.eup %3853 }
0x1f4a   :  { %1905 = vrot.lane.b32.xlu1 %v3854_v40, %s3994_s11 }
0x1fbc   :  { %v1906_v49 = vpop.permute.xlu1 %1905 }
0x1fbd   :  { %v1908_v53 = vmul.f32 %v3852_v44, %v1906_v49 }
0x1fbf   :  { %1910 = vrot.lane.b32.xlu0 %v1908_v53, %s3993_s1 }
0x2031   :  { %v1911_v54 = vpop.permute.xlu0 %1910 }
0x2032   :  { %1913 = vst.msk [vmem:[#allocation3 + $0x12] sm:$0x3] %vm985_vm13, %v1911_v54  ;;  %3429 = vmatmul.mubr.msk.f32.vlgmr.msra.gmra.mrb[28].mxu1 %vm101_vm0, %v1911_v54 }
0x2033   :  { %3672 = vmatpush3.bf16.msra.mxu1 %v4455_v32  ;;  %3450 = vmatprep.mubr.msk.f32.mxu1 %vm3990_vm2, %v3991_v21 }
0x2034   :  { %3673 = vmatprep.subr.bf16.mxu1 %v3989_v3 }
0x2037   :  { %3675 = vmatpush3.bf16.msra.mxu1 %v4465_v13 }
0x2038   :  { %3682 = vmatprep.subr.bf16.mxu1 %v3989_v3 }
0x2105   :  { %v1983_v57 = vpop.f32.mrb[28].mxu1 }
0x2106   :  { %v1987_v11 = vadd.f32 %v1983_v57, %v1914_v55  ;;  %v3430_v59 = vpop.f32.mrb[29].mxu1 }
0x2108   :  { %3855 = vtanh.f32 %v1987_v11  ;;  %v3059_v12 = vmul.f32 -1.442695, %v1987_v11 }
0x210a   :  { %3857 = vpow2.f32 %v3059_v12 }
0x2112   :  { %v3856_v63 = vpop.eup %3855 }
0x2113   :  { %1997 = vrot.lane.b32.xlu1 %v3856_v63, %s3994_s11 }
0x2114   :  { %v3858_v4 = vpop.eup %3857 }
0x2115   :  { %v1991_v58 = vadd.f32 1.0, %v3858_v4 }
0x2117   :  { %3859 = vrcp.f32 %v1991_v58 }
0x2121   :  { %v3860_v41 = vpop.eup %3859 }
0x2122   :  { %v1995_v10 = vmul.f32 %v3860_v41, %v1902_v48  ;;  %v2223_v48 = vld [vmem:[#allocation2 + $0x1a] sm:$0x3] }
0x2185   :  { %v1998_v60 = vpop.permute.xlu1 %1997 }
0x2186   :  { %v2000_v50 = vmul.f32 %v3860_v41, %v1998_v60 }
0x2188   :  { %2002 = vrot.lane.b32.xlu0 %v2000_v50, %s3993_s1 }
0x21fa   :  { %v2003_v19 = vpop.permute.xlu0 %2002 }
0x21fb   :  { %v2005_v7 = vadd.f32 %v2003_v19, %v1995_v10 }
0x21fd   :  { %3861 = vtanh.f32 %v2005_v7 }
0x2207   :  { %v3862_v18 = vpop.eup %3861 }
0x2208   :  { %2008 = vrot.lane.b32.xlu1 %v3862_v18, %s3994_s11 }
0x227a   :  { %v2009_v52 = vpop.permute.xlu1 %2008 }
0x227b   :  { %v2011_v14 = vmul.f32 %v3860_v41, %v2009_v52 }
0x227d   :  { %2013 = vrot.lane.b32.xlu0 %v2011_v14, %s3993_s1 }
0x22ef   :  { %v2014_v8 = vpop.permute.xlu0 %2013 }
0x22f0   :  { %2016 = vst.msk [vmem:[#allocation3 + $0x14] sm:$0x3] %vm985_vm13, %v2014_v8  ;;  %3440 = vmatmul.mubr.msk.f32.vlgmr.msra.gmra.mrb[22].mxu0 %vm101_vm0, %v2014_v8 }
0x22f1   :  { %3678 = vmatpush3.bf16.msra.mxu0 %v4455_v32  ;;  %3461 = vmatprep.mubr.msk.f32.mxu0 %vm3990_vm2, %v3991_v21 }
0x22f2   :  { %3679 = vmatprep.subr.bf16.mxu0 %v3989_v3 }
0x22f5   :  { %3681 = vmatpush3.bf16.msra.mxu0 %v4465_v13 }
0x22f6   :  { %3688 = vmatprep.subr.bf16.mxu0 %v3989_v3 }
0x23c3   :  { %v2086_v15 = vpop.f32.mrb[22].mxu0 }
0x23c4   :  { %v2090_v17 = vadd.f32 %v2086_v15, %v2017_v0  ;;  %v3441_v6 = vpop.f32.mrb[23].mxu0 }
0x23c6   :  { %3863 = vtanh.f32 %v2090_v17  ;;  %v3061_v56 = vmul.f32 -1.442695, %v2090_v17 }
0x23c8   :  { %3865 = vpow2.f32 %v3061_v56 }
0x23d0   :  { %v3864_v20 = vpop.eup %3863 }
0x23d1   :  { %2100 = vrot.lane.b32.xlu1 %v3864_v20, %s3994_s11 }
0x23d2   :  { %v3866_v5 = vpop.eup %3865 }
0x23d3   :  { %v2094_v23 = vadd.f32 1.0, %v3866_v5 }
0x23d5   :  { %3867 = vrcp.f32 %v2094_v23 }
0x23df   :  { %v3868_v16 = vpop.eup %3867 }
0x23e0   :  { %v2098_v62 = vmul.f32 %v3868_v16, %v2005_v7  ;;  %v2326_v7 = vld [vmem:[#allocation2 + $0x1c] sm:$0x3] }
0x2443   :  { %v2101_v25 = vpop.permute.xlu1 %2100 }
0x2444   :  { %v2103_v26 = vmul.f32 %v3868_v16, %v2101_v25 }
0x2446   :  { %2105 = vrot.lane.b32.xlu0 %v2103_v26, %s3993_s1 }
0x24b8   :  { %v2106_v61 = vpop.permute.xlu0 %2105 }
0x24b9   :  { %v2108_v27 = vadd.f32 %v2106_v61, %v2098_v62  ;;  %v2429_v62 = vld [vmem:[#allocation2 + $0x1e] sm:$0x3] }
0x24bb   :  { %3869 = vtanh.f32 %v2108_v27 }
0x24c5   :  { %v3870_v22 = vpop.eup %3869 }
0x24c6   :  { %2111 = vrot.lane.b32.xlu1 %v3870_v22, %s3994_s11 }
0x2538   :  { %v2112_v9 = vpop.permute.xlu1 %2111 }
0x2539   :  { %v2114_v36 = vmul.f32 %v3868_v16, %v2112_v9 }
0x253b   :  { %2116 = vrot.lane.b32.xlu0 %v2114_v36, %s3993_s1 }
0x25ad   :  { %v2117_v29 = vpop.permute.xlu0 %2116 }
0x25ae   :  { %2119 = vst.msk [vmem:[#allocation3 + $0x16] sm:$0x3] %vm985_vm13, %v2117_v29  ;;  %3451 = vmatmul.mubr.msk.f32.vlgmr.msra.gmra.mrb[30].mxu1 %vm101_vm0, %v2117_v29 }
0x25af   :  { %3684 = vmatpush3.bf16.msra.mxu1 %v4455_v32  ;;  %3472 = vmatprep.mubr.msk.f32.mxu1 %vm3990_vm2, %v3991_v21 }
0x25b0   :  { %3685 = vmatprep.subr.bf16.mxu1 %v3989_v3 }
0x25b3   :  { %3687 = vmatpush3.bf16.msra.mxu1 %v4465_v13 }
0x25b4   :  { %3694 = vmatprep.subr.bf16.mxu1 %v3989_v3 }
0x2681   :  { %v2189_v28 = vpop.f32.mrb[30].mxu1 }
0x2682   :  { %v2193_v31 = vadd.f32 %v2189_v28, %v2120_v30  ;;  %v3452_v33 = vpop.f32.mrb[31].mxu1 }
0x2684   :  { %3871 = vtanh.f32 %v2193_v31  ;;  %v3063_v34 = vmul.f32 -1.442695, %v2193_v31 }
0x2686   :  { %3873 = vpow2.f32 %v3063_v34 }
0x268e   :  { %v3872_v35 = vpop.eup %3871 }
0x268f   :  { %2203 = vrot.lane.b32.xlu1 %v3872_v35, %s3994_s11 }
0x2690   :  { %v3874_v39 = vpop.eup %3873 }
0x2691   :  { %v2197_v24 = vadd.f32 1.0, %v3874_v39 }
0x2693   :  { %3875 = vrcp.f32 %v2197_v24 }
0x269d   :  { %v3876_v1 = vpop.eup %3875 }
0x269e   :  { %v2201_v2 = vmul.f32 %v3876_v1, %v2108_v27 }
0x2701   :  { %v2204_v42 = vpop.permute.xlu1 %2203 }
0x2702   :  { %v2206_v38 = vmul.f32 %v3876_v1, %v2204_v42 }
0x2704   :  { %2208 = vrot.lane.b32.xlu0 %v2206_v38, %s3993_s1 }
0x2776   :  { %v2209_v51 = vpop.permute.xlu0 %2208 }
0x2777   :  { %v2211_v44 = vadd.f32 %v2209_v51, %v2201_v2  ;;  %v2532_v2 = vld [vmem:[#allocation2 + $0x20] sm:$0x3] }
0x2779   :  { %3877 = vtanh.f32 %v2211_v44 }
0x2783   :  { %v3878_v45 = vpop.eup %3877 }
0x2784   :  { %2214 = vrot.lane.b32.xlu1 %v3878_v45, %s3994_s11 }
0x27f6   :  { %v2215_v46 = vpop.permute.xlu1 %2214 }
0x27f7   :  { %v2217_v47 = vmul.f32 %v3876_v1, %v2215_v46 }
0x27f9   :  { %2219 = vrot.lane.b32.xlu0 %v2217_v47, %s3993_s1 }
0x286b   :  { %v2220_v43 = vpop.permute.xlu0 %2219 }
0x286c   :  { %2222 = vst.msk [vmem:[#allocation3 + $0x18] sm:$0x3] %vm985_vm13, %v2220_v43  ;;  %3462 = vmatmul.mubr.msk.f32.vlgmr.msra.gmra.mrb[24].mxu0 %vm101_vm0, %v2220_v43 }
0x286d   :  { %3690 = vmatpush3.bf16.msra.mxu0 %v4455_v32  ;;  %3483 = vmatprep.mubr.msk.f32.mxu0 %vm3990_vm2, %v3991_v21 }
0x286e   :  { %3691 = vmatprep.subr.bf16.mxu0 %v3989_v3 }
0x2871   :  { %3693 = vmatpush3.bf16.msra.mxu0 %v4465_v13 }
0x2872   :  { %3700 = vmatprep.subr.bf16.mxu0 %v3989_v3 }
0x293f   :  { %v2292_v40 = vpop.f32.mrb[24].mxu0 }
0x2940   :  { %v2296_v49 = vadd.f32 %v2292_v40, %v2223_v48  ;;  %v3463_v53 = vpop.f32.mrb[25].mxu0 }
0x2942   :  { %3879 = vtanh.f32 %v2296_v49  ;;  %v3065_v55 = vmul.f32 -1.442695, %v2296_v49 }
0x2944   :  { %3881 = vpow2.f32 %v3065_v55 }
0x294c   :  { %v3880_v54 = vpop.eup %3879 }
0x294d   :  { %2306 = vrot.lane.b32.xlu1 %v3880_v54, %s3994_s11 }
0x294e   :  { %v3882_v57 = vpop.eup %3881 }
0x294f   :  { %v2300_v11 = vadd.f32 1.0, %v3882_v57 }
0x2951   :  { %3883 = vrcp.f32 %v2300_v11 }
0x295b   :  { %v3884_v59 = vpop.eup %3883 }
0x295c   :  { %v2304_v4 = vmul.f32 %v3884_v59, %v2211_v44 }
0x29bf   :  { %v2307_v63 = vpop.permute.xlu1 %2306 }
0x29c0   :  { %v2309_v12 = vmul.f32 %v3884_v59, %v2307_v63 }
0x29c2   :  { %2311 = vrot.lane.b32.xlu0 %v2309_v12, %s3993_s1 }
0x2a34   :  { %v2312_v58 = vpop.permute.xlu0 %2311 }
0x2a35   :  { %v2314_v41 = vadd.f32 %v2312_v58, %v2304_v4  ;;  %v2642_v58 = vld [vmem:[#allocation3 + $0x8] sm:$0xff] }
0x2a37   :  { %3885 = vtanh.f32 %v2314_v41 }
0x2a41   :  { %v3886_v60 = vpop.eup %3885 }
0x2a42   :  { %2317 = vrot.lane.b32.xlu1 %v3886_v60, %s3994_s11  ;;  %v2643_v60 = vld [vmem:[#allocation3 + $0x10] sm:$0xff] }
0x2ab4   :  { %v2318_v50 = vpop.permute.xlu1 %2317 }
0x2ab5   :  { %v2320_v10 = vmul.f32 %v3884_v59, %v2318_v50  ;;  %v2641_v59 = vld [vmem:[#allocation3] sm:$0xff]  ;;  %v2654_v50 = vsel %vm101_vm0, %v2643_v60, 0.0 }
0x2ab6   :  { %v2648_v63 = vsel %vm101_vm0, %v2641_v59, 0.0 }
0x2ab7   :  { %2322 = vrot.lane.b32.xlu0 %v2320_v10, %s3993_s1 }
0x2b29   :  { %v2323_v19 = vpop.permute.xlu0 %2322 }
0x2b2a   :  { %2325 = vst.msk [vmem:[#allocation3 + $0x1a] sm:$0x3] %vm985_vm13, %v2323_v19  ;;  %3473 = vmatmul.mubr.msk.f32.vlgmr.msra.gmra.mrb[32].mxu1 %vm101_vm0, %v2323_v19 }
0x2b2b   :  { %3696 = vmatpush3.bf16.msra.mxu1 %v4455_v32  ;;  %3494 = vmatprep.mubr.msk.f32.mxu1 %vm3990_vm2, %v3991_v21 }
0x2b2c   :  { %3697 = vmatprep.subr.bf16.mxu1 %v3989_v3 }
0x2b2f   :  { %3699 = vmatpush3.bf16.msra.mxu1 %v4465_v13 }
0x2bfd   :  { %v2395_v18 = vpop.f32.mrb[32].mxu1 }
0x2bfe   :  { %v2399_v52 = vadd.f32 %v2395_v18, %v2326_v7  ;;  %v3474_v14 = vpop.f32.mrb[33].mxu1 }
0x2c00   :  { %3887 = vtanh.f32 %v2399_v52  ;;  %v3067_v0 = vmul.f32 -1.442695, %v2399_v52 }
0x2c02   :  { %3889 = vpow2.f32 %v3067_v0 }
0x2c0a   :  { %v3888_v8 = vpop.eup %3887 }
0x2c0b   :  { %2409 = vrot.lane.b32.xlu1 %v3888_v8, %s3994_s11 }
0x2c0c   :  { %v3890_v15 = vpop.eup %3889 }
0x2c0d   :  { %v2403_v17 = vadd.f32 1.0, %v3890_v15 }
0x2c0f   :  { %3891 = vrcp.f32 %v2403_v17 }
0x2c19   :  { %v3892_v32 = vpop.eup %3891 }
0x2c1a   :  { %v2407_v56 = vmul.f32 %v3892_v32, %v2314_v41  ;;  %v2651_v41 = vsel %vm101_vm0, %v2642_v58, 0.0 }
0x2c7d   :  { %v2410_v6 = vpop.permute.xlu1 %2409 }
0x2c7e   :  { %v2412_v20 = vmul.f32 %v3892_v32, %v2410_v6  ;;  %v2872_v6 = vld [vmem:[%s4922_s16 + $0x8] sm:$0xff] }
0x2c80   :  { %2414 = vrot.lane.b32.xlu0 %v2412_v20, %s3993_s1 }
0x2cf2   :  { %v2415_v13 = vpop.permute.xlu0 %2414 }
0x2cf3   :  { %v2417_v5 = vadd.f32 %v2415_v13, %v2407_v56  ;;  %v2873_v56 = vld [vmem:[%s4922_s16 + $0x10] sm:$0xff]  ;;  %v2874_v13 = vld [vmem:[%s4922_s16 + $0x18] sm:$0xff] }
0x2cf5   :  { %3893 = vtanh.f32 %v2417_v5 }
0x2cff   :  { %v3894_v23 = vpop.eup %3893 }
0x2d00   :  { %2420 = vrot.lane.b32.xlu1 %v3894_v23, %s3994_s11 }
0x2d72   :  { %v2421_v16 = vpop.permute.xlu1 %2420 }
0x2d73   :  { %v2423_v25 = vmul.f32 %v3892_v32, %v2421_v16  ;;  %v2871_v32 = vld [vmem:[%s4922_s16] sm:$0xff]  ;;  %s3995_s16 = smov 96  }
0x2d74   :  { %v3701_v20 = vpack.c.bf16 %v2872_v6, %v2871_v32 }
0x2d75   :  { %2425 = vrot.lane.b32.xlu0 %v2423_v25, %s3993_s1 }
0x2de7   :  { %v2426_v26 = vpop.permute.xlu0 %2425 }
0x2de8   :  { %2428 = vst.msk [vmem:[#allocation3 + $0x1c] sm:$0x3] %vm985_vm13, %v2426_v26  ;;  %3484 = vmatmul.mubr.msk.f32.vlgmr.msra.gmra.mrb[26].mxu0 %vm101_vm0, %v2426_v26 }
0x2de9   :  { %3505 = vmatprep.mubr.msk.f32.mxu0 %vm3990_vm2, %v3991_v21  ;;  %3702 = vmatpush3.bf16.msra.mxu0 %v3701_v20 }
0x2dea   :  { %3703 = vmatprep.subr.bf16.mxu0 %v3989_v3 }
0x2ebb   :  { %v2498_v61 = vpop.f32.mrb[26].mxu0 }
0x2ebc   :  { %v2502_v27 = vadd.f32 %v2498_v61, %v2429_v62  ;;  %v3485_v22 = vpop.f32.mrb[27].mxu0 }
0x2ebe   :  { %3895 = vtanh.f32 %v2502_v27  ;;  %v3069_v36 = vmul.f32 -1.442695, %v2502_v27 }
0x2ec0   :  { %3897 = vpow2.f32 %v3069_v36 }
0x2ec8   :  { %v3896_v9 = vpop.eup %3895 }
0x2ec9   :  { %2512 = vrot.lane.b32.xlu1 %v3896_v9, %s3994_s11 }
0x2eca   :  { %v3898_v29 = vpop.eup %3897 }
0x2ecb   :  { %v2506_v30 = vadd.f32 1.0, %v3898_v29 }
0x2ecd   :  { %3899 = vrcp.f32 %v2506_v30 }
0x2ed7   :  { %v3900_v28 = vpop.eup %3899 }
0x2ed8   :  { %v2510_v35 = vmul.f32 %v3900_v28, %v2417_v5  ;;  %v3704_v5 = vpack.c.bf16 %v2874_v13, %v2873_v56 }
0x2eda   :  { %3705 = vmatpush3.bf16.msra.mxu0 %v3704_v5 }
0x2f3b   :  { %v2513_v31 = vpop.permute.xlu1 %2512 }
0x2f3c   :  { %v2515_v33 = vmul.f32 %v3900_v28, %v2513_v31 }
0x2f3e   :  { %2517 = vrot.lane.b32.xlu0 %v2515_v33, %s3993_s1 }
0x2fb0   :  { %v2518_v34 = vpop.permute.xlu0 %2517 }
0x2fb1   :  { %v2520_v39 = vadd.f32 %v2518_v34, %v2510_v35 }
0x2fb3   :  { %3901 = vtanh.f32 %v2520_v39 }
0x2fbd   :  { %v3902_v24 = vpop.eup %3901 }
0x2fbe   :  { %2523 = vrot.lane.b32.xlu1 %v3902_v24, %s3994_s11  ;;  %v4790_v24 = vld [vmem:[%s4920_s14] ss:$0 sm:$0xff] }
0x3030   :  { %v2524_v1 = vpop.permute.xlu1 %2523 }
0x3031   :  { %v2526_v42 = vmul.f32 %v3900_v28, %v2524_v1 }
0x3033   :  { %2528 = vrot.lane.b32.xlu0 %v2526_v42, %s3993_s1  ;;  %v4795_v42 = vld [vmem:[%s4921_s15] ss:$0 sm:$0xff] }
0x30a5   :  { %v2529_v38 = vpop.permute.xlu0 %2528 }
0x30a6   :  { %2531 = vst.msk [vmem:[#allocation3 + $0x1e] sm:$0x3] %vm985_vm13, %v2529_v38  ;;  %3495 = vmatmul.mubr.msk.f32.vlgmr.msra.gmra.mrb[34].mxu1 %vm101_vm0, %v2529_v38 }
0x30ad   :  { %v2644_v10 = vld [vmem:[#allocation3 + $0x18] sm:$0xff] }
0x30ae   :  { %v2657_v19 = vsel %vm101_vm0, %v2644_v10, 0.0 }
0x3179   :  { %v2601_v51 = vpop.f32.mrb[34].mxu1 }
0x317a   :  { %v2605_v44 = vadd.f32 %v2601_v51, %v2532_v2  ;;  %v3496_v45 = vpop.f32.mrb[35].mxu1 }
0x317c   :  { %3903 = vtanh.f32 %v2605_v44  ;;  %v3071_v47 = vmul.f32 -1.442695, %v2605_v44 }
0x317e   :  { %3905 = vpow2.f32 %v3071_v47 }
0x3186   :  { %v3904_v46 = vpop.eup %3903 }
0x3187   :  { %2615 = vrot.lane.b32.xlu1 %v3904_v46, %s3994_s11 }
0x3188   :  { %v3906_v43 = vpop.eup %3905 }
0x3189   :  { %v2609_v48 = vadd.f32 1.0, %v3906_v43 }
0x318b   :  { %3907 = vrcp.f32 %v2609_v48 }
0x3195   :  { %v3908_v40 = vpop.eup %3907 }
0x3196   :  { %v2613_v54 = vmul.f32 %v3908_v40, %v2520_v39 }
0x31f9   :  { %v2616_v49 = vpop.permute.xlu1 %2615 }
0x31fa   :  { %v2618_v53 = vmul.f32 %v3908_v40, %v2616_v49 }
0x31fc   :  { %2620 = vrot.lane.b32.xlu0 %v2618_v53, %s3993_s1 }
0x326e   :  { %v2621_v55 = vpop.permute.xlu0 %2620 }
0x326f   :  { %v2623_v57 = vadd.f32 %v2621_v55, %v2613_v54 }
0x3271   :  { %3909 = vtanh.f32 %v2623_v57 }
0x327b   :  { %v3910_v11 = vpop.eup %3909 }
0x327c   :  { %2626 = vrot.lane.b32.xlu1 %v3910_v11, %s3994_s11 }
0x32a0   :  { %2649 = vadd.xlane.f32.xlu1 %v2648_v63 }
0x32ee   :  { %v2627_v12 = vpop.permute.xlu1 %2626 }
0x32ef   :  { %v2629_v4 = vmul.f32 %v3908_v40, %v2627_v12 }
0x32f1   :  { %2631 = vrot.lane.b32.xlu0 %v2629_v4, %s3993_s1  ;;  %s3996_s1 = smov [#allocation4]  }
0x32f2   :  { %s3002_s10 = sshll.u32 %s3996_s1, 4  ;;  %s3003_s10 = int_to_ptr.vmem [resolvable:$true] %s3002_s10 }
0x32f3   :  { %s3941_s5 = scalar_lea.vmem %s3003_s10, 32  ;;  %p3946_p1 = scmp.lt.s32.totalorder %s3003_s10, %s3003_s10 }
0x32f4   :  { %p3942_p0 = scmp.ne.s32.totalorder %s3003_s10, %s3941_s5  ;;  %p3947_p2 = scmp.lt.s32.totalorder %s3941_s5, %s3941_s5 }
0x32f6   :  { %p3948_p3 = por %p3947_p2, %p3946_p1 }
0x32f8   :  { %p3949_p4 = pnand %p3948_p3, %p3942_p0 }
0x3310   :  { %2652 = vadd.xlane.f32.xlu0 %v2651_v41 }
0x3314   :  { %2655 = vadd.xlane.f32.xlu0 %v2654_v50 }
0x3318   :  { %2658 = vadd.xlane.f32.xlu0 %v2657_v19 }
0x332d   :  { %v2650_v7 = vpop.xlane.xlu1 %2649 }
0x332e   :  { %v2664_v18 = vmul.f32 0.03125, %v2650_v7 }
0x3330   :  { %v2669_v52 = vsub.f32 %v2641_v59, %v2664_v18 }
0x3332   :  { %v2674_v14 = vmul.f32 %v2669_v52, %v2669_v52 }
0x3334   :  { %v2679_v8 = vsel %vm101_vm0, %v2674_v14, 0.0 }
0x3335   :  { %2680 = vadd.xlane.f32.xlu0 %v2679_v8 }
0x3363   :  { %v2632_v0 = vpop.permute.xlu0 %2631 }
0x3364   :  { %2634 = vst.msk [vmem:[#allocation3 + $0x20] sm:$0x3] %vm985_vm13, %v2632_v0  ;;  %2635 = vst.msk [vmem:[#allocation4] sm:$0x3] %vm985_vm13, %v2632_v0 }
0x336b   :  { %v4755_v15 = vld [vmem:[#allocation3 + $0x20] sm:$0x3] }
0x336c   :  { %v2660_v17 = vsel %vm985_vm13, %v4755_v15, 0.0 }
0x336d   :  { %2661 = vadd.xlane.f32.xlu1 %v2660_v17 }
0x339d   :  { %v2653_v23 = vpop.xlane.xlu0 %2652 }
0x339e   :  { %v2665_v16 = vmul.f32 0.03125, %v2653_v23 }
0x33a0   :  { %v4772_v25 = vsub.f32 %v2642_v58, %v2665_v16 }
0x33a1   :  { %v2656_v26 = vpop.xlane.xlu0 %2655 }
0x33a2   :  { %v2666_v62 = vmul.f32 0.03125, %v2656_v26  ;;  %v2675_v61 = vmul.f32 %v4772_v25, %v4772_v25 }
0x33a4   :  { %v4776_v3 = vsub.f32 %v2643_v60, %v2666_v62  ;;  %v2682_v27 = vsel %vm101_vm0, %v2675_v61, 0.0 }
0x33a5   :  { %2683 = vadd.xlane.f32.xlu1 %v2682_v27  ;;  %v2659_v22 = vpop.xlane.xlu0 %2658 }
0x33a6   :  { %v2667_v9 = vmul.f32 0.03125, %v2659_v22  ;;  %v2676_v36 = vmul.f32 %v4776_v3, %v4776_v3 }
0x33a8   :  { %v4781_v29 = vsub.f32 %v2644_v10, %v2667_v9  ;;  %v2685_v30 = vsel %vm101_vm0, %v2676_v36, 0.0 }
0x33a9   :  { %2686 = vadd.xlane.f32.xlu0 %v2685_v30 }
0x33aa   :  { %v2677_v28 = vmul.f32 %v4781_v29, %v4781_v29 }
0x33ac   :  { %v2688_v31 = vsel %vm101_vm0, %v2677_v28, 0.0 }
0x33ad   :  { %2689 = vadd.xlane.f32.xlu1 %v2688_v31 }
0x33be   :  { %2637 = vrot.lane.b32.xlu1 %v2623_v57, %s3995_s16 }
0x33c2   :  { %v2681_v33 = vpop.xlane.xlu0 %2680 }
0x33c3   :  { %v2694_v35 = vmul.f32 0.03125, %v2681_v33 }
0x33c5   :  { %v2699_v34 = vadd.f32 1e-05, %v2694_v35 }
0x33c7   :  { %3911 = vrsqrt.f32 %v2699_v34 }
0x33d1   :  { %v3912_v39 = vpop.eup %3911 }
0x33d2   :  { %v2709_v1 = vmul.f32 %v3912_v39, %v2669_v52 }
0x33d4   :  { %v2720_v38 = vmul.f32 %v4790_v24, %v2709_v1 }
0x33d6   :  { %v2731_v2 = vadd.f32 %v4795_v42, %v2720_v38 }
0x33d8   :  { %v2741_v51 = vmul.f32 0.70710677, %v2731_v2  ;;  %v2736_v14 = vmul.f32 0.5, %v2731_v2 }
0x33da   :  { %v2756_v44 = vand.u32 2147483647, %v2741_v51  ;;  %vm2746_vm14 = vcmp.ge.f32.partialorder %v2741_v51, 0.0 }
0x33db   :  { %v2751_v7 = vsel %vm2746_vm14, 1.0, %v3992_v37 }
0x33dc   :  { %v2761_v45 = vmul.f32 0.3275911, %v2756_v44  ;;  %v2826_v47 = vsub.f32 0.0, %v2756_v44 }
0x33de   :  { %v2766_v46 = vadd.f32 1.0, %v2761_v45  ;;  %v2831_v48 = vmul.f32 %v2826_v47, %v2756_v44 }
0x33e0   :  { %3913 = vrcp.f32 %v2766_v46  ;;  %v2836_v53 = vmul.f32 1.442695, %v2831_v48 }
0x33e2   :  { %3915 = vpow2.f32 %v2836_v53 }
0x33ea   :  { %v3914_v43 = vpop.eup %3913 }
0x33eb   :  { %v2781_v40 = vmul.f32 1.0614054, %v3914_v43 }
0x33ec   :  { %v3916_v41 = vpop.eup %3915 }
0x33ed   :  { %v2786_v49 = vadd.f32 -1.4531521, %v2781_v40 }
0x33ef   :  { %v2791_v54 = vmul.f32 %v3914_v43, %v2786_v49 }
0x33f1   :  { %v2796_v55 = vadd.f32 1.4214138, %v2791_v54 }
0x33f3   :  { %v2801_v57 = vmul.f32 %v3914_v43, %v2796_v55 }
0x33f5   :  { %v2806_v11 = vadd.f32 -0.28449672, %v2801_v57 }
0x33f7   :  { %v2811_v59 = vmul.f32 %v3914_v43, %v2806_v11 }
0x33f9   :  { %v2816_v63 = vadd.f32 0.2548296, %v2811_v59 }
0x33fa   :  { %v2662_v12 = vpop.xlane.xlu1 %2661 }
0x33fb   :  { %v2668_v4 = vmul.f32 0.03125, %v2662_v12  ;;  %v2821_v58 = vmul.f32 %v3914_v43, %v2816_v63 }
0x33fd   :  { %v4800_v60 = vsub.f32 %v4755_v15, %v2668_v4  ;;  %v2846_v50 = vmul.f32 %v3916_v41, %v2821_v58 }
0x33ff   :  { %v2678_v10 = vmul.f32 %v4800_v60, %v4800_v60  ;;  %v2851_v19 = vsub.f32 1.0, %v2846_v50 }
0x3401   :  { %v2691_v18 = vsel %vm985_vm13, %v2678_v10, 0.0  ;;  %v2856_v52 = vmul.f32 %v2851_v19, %v2751_v7 }
0x3402   :  { %2692 = vadd.xlane.f32.xlu0 %v2691_v18 }
0x3403   :  { %v2861_v8 = vadd.f32 1.0, %v2856_v52 }
0x3405   :  { %v2866_v0 = vmul.f32 %v2861_v8, %v2736_v14 }
0x3407   :  { %3506 = vmatmul.mubr.msk.f32.vlgmr.msra.gmra.mrb[28].mxu0 %vm101_vm0, %v2866_v0 }
0x3408   :  { %3508 = vmatprep.mubr.msk.f32.mxu0 %vm3990_vm2, %v3991_v21 }
0x3432   :  { %v2684_v15 = vpop.xlane.xlu1 %2683 }
0x3433   :  { %v2695_v17 = vmul.f32 0.03125, %v2684_v15 }
0x3435   :  { %v2700_v32 = vadd.f32 1e-05, %v2695_v17 }
0x3436   :  { %v2687_v6 = vpop.xlane.xlu0 %2686 }
0x3437   :  { %3917 = vrsqrt.f32 %v2700_v32  ;;  %v2696_v20 = vmul.f32 0.03125, %v2687_v6 }
0x3439   :  { %v2701_v56 = vadd.f32 1e-05, %v2696_v20 }
0x343a   :  { %v2690_v13 = vpop.xlane.xlu1 %2689 }
0x343b   :  { %3919 = vrsqrt.f32 %v2701_v56  ;;  %v2697_v5 = vmul.f32 0.03125, %v2690_v13 }
0x343d   :  { %v2702_v23 = vadd.f32 1e-05, %v2697_v5 }
0x343e   :  { %v2638_v16 = vpop.permute.xlu1 %2637 }
0x343f   :  { %3921 = vrsqrt.f32 %v2702_v23  ;;  %2640 = vst.msk [vmem:[#allocation6] sm:$0x3] %vm985_vm13, %v2638_v16 }
0x3441   :  { %v3918_v26 = vpop.eup %3917 }
0x3442   :  { %v2710_v62 = vmul.f32 %v3918_v26, %v4772_v25 }
0x3444   :  { %v2721_v61 = vmul.f32 %v4790_v24, %v2710_v62 }
0x3445   :  { %v3920_v27 = vpop.eup %3919 }
0x3446   :  { %v2711_v22 = vmul.f32 %v3920_v27, %v4776_v3  ;;  %v4814_v9 = vadd.f32 %v4795_v42, %v2721_v61 }
0x3448   :  { %v4817_v36 = vmul.f32 0.70710677, %v4814_v9  ;;  %v2722_v30 = vmul.f32 %v4790_v24, %v2711_v22 }
0x3449   :  { %v3922_v28 = vpop.eup %3921 }
0x344a   :  { %v2712_v31 = vmul.f32 %v3922_v28, %v4781_v29  ;;  %v2757_v33 = vand.u32 2147483647, %v4817_v36  ;;  %v4823_v25 = vadd.f32 %v4795_v42, %v2722_v30  ;;  %vm2747_vm15 = vcmp.ge.f32.partialorder %v4817_v36, 0.0 }
0x344b   :  { %v2752_v30 = vsel %vm2747_vm15, 1.0, %v3992_v37 }
0x344c   :  { %v2762_v35 = vmul.f32 0.3275911, %v2757_v33  ;;  %v4826_v34 = vmul.f32 0.70710677, %v4823_v25  ;;  %v2723_v3 = vmul.f32 %v4790_v24, %v2712_v31  ;;  %v2827_v46 = vsub.f32 0.0, %v2757_v33 }
0x344e   :  { %v2767_v39 = vadd.f32 1.0, %v2762_v35  ;;  %v2758_v1 = vand.u32 2147483647, %v4826_v34  ;;  %v4831_v38 = vadd.f32 %v4795_v42, %v2723_v3  ;;  %v2832_v48 = vmul.f32 %v2827_v46, %v2757_v33 }
0x344f   :  { %vm2748_vm1 = vcmp.ge.f32.partialorder %v4826_v34, 0.0  ;;  %v2737_v3 = vmul.f32 0.5, %v4814_v9 }
0x3450   :  { %3923 = vrcp.f32 %v2767_v39  ;;  %v2763_v2 = vmul.f32 0.3275911, %v2758_v1  ;;  %v4834_v29 = vmul.f32 0.70710677, %v4831_v38  ;;  %v2828_v40 = vsub.f32 0.0, %v2758_v1 }
0x3451   :  { %v2838_v55 = vmul.f32 1.442695, %v2832_v48  ;;  %v2753_v36 = vsel %vm2748_vm1, 1.0, %v3992_v37 }
0x3452   :  { %v2768_v51 = vadd.f32 1.0, %v2763_v2  ;;  %v2759_v44 = vand.u32 2147483647, %v4834_v29  ;;  %v2833_v57 = vmul.f32 %v2828_v40, %v2758_v1  ;;  %vm2749_vm3 = vcmp.ge.f32.partialorder %v4834_v29, 0.0 }
0x3453   :  { %v2754_v48 = vsel %vm2749_vm3, 1.0, %v3992_v37  ;;  %v2739_v29 = vmul.f32 0.5, %v4831_v38 }
0x3454   :  { %3925 = vrcp.f32 %v2768_v51  ;;  %v2764_v45 = vmul.f32 0.3275911, %v2759_v44  ;;  %v2829_v63 = vsub.f32 0.0, %v2759_v44  ;;  %v2840_v58 = vmul.f32 1.442695, %v2833_v57 }
0x3456   :  { %v2769_v47 = vadd.f32 1.0, %v2764_v45  ;;  %v2834_v19 = vmul.f32 %v2829_v63, %v2759_v44 }
0x3458   :  { %3927 = vrcp.f32 %v2769_v47  ;;  %v2842_v15 = vmul.f32 1.442695, %v2834_v19  ;;  %v2738_v47 = vmul.f32 0.5, %v4823_v25 }
0x3459   :  { %3929 = vpow2.f32 %v2838_v55 }
0x345a   :  { %v3924_v43 = vpop.eup %3923  ;;  %3931 = vpow2.f32 %v2840_v58 }
0x345b   :  { %v2782_v49 = vmul.f32 1.0614054, %v3924_v43  ;;  %3933 = vpow2.f32 %v2842_v15 }
0x345d   :  { %v2787_v53 = vadd.f32 -1.4531521, %v2782_v49 }
0x345e   :  { %v3926_v54 = vpop.eup %3925 }
0x345f   :  { %v2792_v11 = vmul.f32 %v3924_v43, %v2787_v53  ;;  %v2783_v59 = vmul.f32 1.0614054, %v3926_v54 }
0x3461   :  { %v2797_v12 = vadd.f32 1.4214138, %v2792_v11  ;;  %v2788_v4 = vadd.f32 -1.4531521, %v2783_v59 }
0x3462   :  { %v3928_v41 = vpop.eup %3927 }
0x3463   :  { %v2802_v50 = vmul.f32 %v3924_v43, %v2797_v12  ;;  %v2793_v10 = vmul.f32 %v3926_v54, %v2788_v4  ;;  %v2784_v7 = vmul.f32 1.0614054, %v3928_v41  ;;  %v3930_v5 = vpop.eup %3929 }
0x3464   :  { %v3932_v22 = vpop.eup %3931 }
0x3465   :  { %v2807_v18 = vadd.f32 -0.28449672, %v2802_v50  ;;  %v2798_v52 = vadd.f32 1.4214138, %v2793_v10  ;;  %v2789_v14 = vadd.f32 -1.4531521, %v2784_v7  ;;  %v3934_v51 = vpop.eup %3933 }
0x3467   :  { %v2812_v8 = vmul.f32 %v3924_v43, %v2807_v18  ;;  %v2803_v0 = vmul.f32 %v3926_v54, %v2798_v52  ;;  %v2794_v17 = vmul.f32 %v3928_v41, %v2789_v14 }
0x3469   :  { %v2817_v32 = vadd.f32 0.2548296, %v2812_v8  ;;  %v2808_v6 = vadd.f32 -0.28449672, %v2803_v0  ;;  %v2799_v20 = vadd.f32 1.4214138, %v2794_v17 }
0x346b   :  { %v2822_v56 = vmul.f32 %v3924_v43, %v2817_v32  ;;  %v2813_v13 = vmul.f32 %v3926_v54, %v2808_v6  ;;  %v2804_v23 = vmul.f32 %v3928_v41, %v2799_v20 }
0x346d   :  { %v2847_v16 = vmul.f32 %v3930_v5, %v2822_v56  ;;  %v2818_v26 = vadd.f32 0.2548296, %v2813_v13  ;;  %v2809_v62 = vadd.f32 -0.28449672, %v2804_v23  ;;  %v3074_v5 = vld [vmem:[%s4923_s17] ss:$0 sm:$0xff] }
0x346f   :  { %v2852_v61 = vsub.f32 1.0, %v2847_v16  ;;  %v2823_v27 = vmul.f32 %v3926_v54, %v2818_v26  ;;  %v2814_v28 = vmul.f32 %v3928_v41, %v2809_v62 }
0x3471   :  { %v2857_v31 = vmul.f32 %v2852_v61, %v2752_v30  ;;  %v2848_v33 = vmul.f32 %v3932_v22, %v2823_v27  ;;  %v2819_v35 = vadd.f32 0.2548296, %v2814_v28 }
0x3473   :  { %v2862_v39 = vadd.f32 1.0, %v2857_v31  ;;  %v2853_v1 = vsub.f32 1.0, %v2848_v33  ;;  %v2824_v2 = vmul.f32 %v3928_v41, %v2819_v35 }
0x3475   :  { %v2867_v44 = vmul.f32 %v2862_v39, %v2737_v3  ;;  %v2858_v45 = vmul.f32 %v2853_v1, %v2753_v36  ;;  %v2849_v46 = vmul.f32 %v3934_v51, %v2824_v2 }
0x3477   :  { %3509 = vmatmul.mubr.msk.f32.gmra.mrb[30].mxu0 %vm101_vm0, %v2867_v44  ;;  %v2863_v34 = vadd.f32 1.0, %v2858_v45  ;;  %v2854_v9 = vsub.f32 1.0, %v2849_v46 }
0x3478   :  { %3511 = vmatprep.mubr.msk.f32.mxu0 %vm3990_vm2, %v3991_v21 }
0x3479   :  { %v2868_v43 = vmul.f32 %v2863_v34, %v2738_v47  ;;  %v2859_v40 = vmul.f32 %v2854_v9, %v2754_v48 }
0x347b   :  { %3512 = vmatmul.mubr.msk.f32.gmra.mrb[32].mxu0 %vm101_vm0, %v2868_v43  ;;  %v2864_v49 = vadd.f32 1.0, %v2859_v40 }
0x347c   :  { %3514 = vmatprep.mubr.msk.f32.mxu0 %vm3990_vm2, %v3991_v21 }
0x347d   :  { %v2869_v53 = vmul.f32 %v2864_v49, %v2739_v29 }
0x347f   :  { %3515 = vmatmul.mubr.msk.f32.gmra.mrb[34].mxu0 %vm101_vm0, %v2869_v53 }
0x3480   :  { %3517 = vmatprep.mubr.msk.f32.mxu0 %vm3990_vm2, %v3991_v21 }
0x348f   :  { %v2693_v25 = vpop.xlane.xlu0 %2692 }
0x3490   :  { %v2698_v54 = vmul.f32 0.03125, %v2693_v25 }
0x3492   :  { %v2703_v55 = vadd.f32 1e-05, %v2698_v54 }
0x3494   :  { %3935 = vrsqrt.f32 %v2703_v55 }
0x349e   :  { %v3936_v57 = vpop.eup %3935 }
0x349f   :  { %v2713_v11 = vmul.f32 %v3936_v57, %v4800_v60 }
0x34a1   :  { %v2724_v59 = vmul.f32 %v4790_v24, %v2713_v11 }
0x34a3   :  { %v2735_v63 = vadd.f32 %v4795_v42, %v2724_v59 }
0x34a5   :  { %v2745_v12 = vmul.f32 0.70710677, %v2735_v63  ;;  %v2740_v20 = vmul.f32 0.5, %v2735_v63 }
0x34a7   :  { %v2760_v38 = vand.u32 2147483647, %v2745_v12  ;;  %vm2750_vm2 = vcmp.ge.f32.partialorder %v2745_v12, 0.0 }
0x34a8   :  { %v2755_v32 = vsel %vm2750_vm2, 1.0, %v3992_v37 }
0x34a9   :  { %v2765_v4 = vmul.f32 0.3275911, %v2760_v38  ;;  %v2830_v41 = vsub.f32 0.0, %v2760_v38 }
0x34ab   :  { %v2770_v58 = vadd.f32 1.0, %v2765_v4  ;;  %v2835_v10 = vmul.f32 %v2830_v41, %v2760_v38 }
0x34ad   :  { %3937 = vrcp.f32 %v2770_v58  ;;  %v2844_v7 = vmul.f32 1.442695, %v2835_v10 }
0x34af   :  { %3939 = vpow2.f32 %v2844_v7 }
0x34b7   :  { %v3938_v50 = vpop.eup %3937 }
0x34b8   :  { %v2785_v21 = vmul.f32 1.0614054, %v3938_v50 }
0x34b9   :  { %v3940_v42 = vpop.eup %3939 }
0x34ba   :  { %v2790_v19 = vadd.f32 -1.4531521, %v2785_v21 }
0x34bc   :  { %v2795_v18 = vmul.f32 %v3938_v50, %v2790_v19 }
0x34be   :  { %v2800_v52 = vadd.f32 1.4214138, %v2795_v18 }
0x34c0   :  { %v2805_v14 = vmul.f32 %v3938_v50, %v2800_v52 }
0x34c2   :  { %v2810_v60 = vadd.f32 -0.28449672, %v2805_v14 }
0x34c4   :  { %v2815_v8 = vmul.f32 %v3938_v50, %v2810_v60 }
0x34c6   :  { %v2820_v24 = vadd.f32 0.2548296, %v2815_v8 }
0x34c8   :  { %v2825_v0 = vmul.f32 %v3938_v50, %v2820_v24 }
0x34ca   :  { %v2850_v15 = vmul.f32 %v3940_v42, %v2825_v0 }
0x34cc   :  { %v2855_v17 = vsub.f32 1.0, %v2850_v15 }
0x34ce   :  { %v2860_v6 = vmul.f32 %v2855_v17, %v2755_v32 }
0x34d0   :  { %v2865_v56 = vadd.f32 1.0, %v2860_v6 }
0x34d2   :  { %v2870_v13 = vmul.f32 %v2865_v56, %v2740_v20 }
0x34d4   :  { %3518 = vmatmul.mubr.msk.f32.gmra.mrb[36].mxu0 %vm101_vm0, %v2870_v13 }
0x34da   :  { %v2963_v23 = vpop.f32.mrb[28].mxu0 }
0x34db   :  { %v2964_v16 = vadd.f32 %v3074_v5, %v2963_v23  ;;  %v3507_v26 = vpop.f32.mrb[29].mxu0 }
0x34dd   :  { %2988 = vst.msk [vmem:[%s4924_s18] sm:$0xff] %vm2987_vm4, %v2964_v16 }
0x34de   :  { %3952 = shalt.err (!%p3949_p4)
}
0x34df   :  { %s3953_s8 = scalar_lea.hbm %s4925_s19, 32 }
0x34e0   :  { %p3954_p5 = scmp.ne.s32.totalorder %s4925_s19, %s3953_s8  ;;  %p3957_p6 = scmp.lt.u32.totalorder %s3953_s8, %s4925_s19 }
0x34e2   :  { %p3959_p7 = pnand %p3957_p6, %p3954_p5 }
0x34e4   :  { %3962 = shalt.err (!%p3959_p7)
}
0x34e5   :  { %3005 = dma.vmem_to_hbm [thread:$0]  %s3003_s10, 32, %s4925_s19, [#allocation5]  }
0x34e6   :  { %s3963_s22 = scalar_lea.vmem %s3013_s4, 32  ;;  %p3968_p9 = scmp.lt.s32.totalorder %s3013_s4, %s3013_s4 }
0x34e7   :  { %p3964_p8 = scmp.ne.s32.totalorder %s3013_s4, %s3963_s22  ;;  %p3969_p10 = scmp.lt.s32.totalorder %s3963_s22, %s3963_s22 }
0x34e9   :  { %p3970_p11 = por %p3969_p10, %p3968_p9 }
0x34eb   :  { %p3971_p12 = pnand %p3970_p11, %p3964_p8 }
0x34ed   :  { %3974 = shalt.err (!%p3971_p12)
}
0x34ee   :  { %s3975_s6 = scalar_lea.hbm %s4926_s20, 32 }
0x34ef   :  { %p3976_p13 = scmp.ne.s32.totalorder %s4926_s20, %s3975_s6  ;;  %p3979_p0 = scmp.lt.u32.totalorder %s3975_s6, %s4926_s20 }
0x34f1   :  { %p3981_p1 = pnand %p3979_p0, %p3976_p13 }
0x34f3   :  { %3984 = shalt.err (!%p3981_p1)
}
0x34f4   :  { %3015 = dma.vmem_to_hbm [thread:$0]  %s3013_s4, 32, %s4926_s20, [#allocation7]   ;;  %vm2992_vm0 = vcmask 123904  }
0x354a   :  { %v2968_v37 = vpop.f32.mrb[30].mxu0 }
0x354b   :  { %v2969_v62 = vadd.f32 %v3074_v5, %v2968_v37  ;;  %v3510_v61 = vpop.f32.mrb[31].mxu0 }
0x354d   :  { %2989 = vst.msk [vmem:[%s4924_s18 + $0x8] sm:$0xff] %vm2987_vm4, %v2969_v62 }
0x354e   :  { %v2973_v27 = vpop.f32.mrb[32].mxu0 }
0x354f   :  { %v2974_v22 = vadd.f32 %v3074_v5, %v2973_v27  ;;  %v3513_v30 = vpop.f32.mrb[33].mxu0 }
0x3551   :  { %2990 = vst.msk [vmem:[%s4924_s18 + $0x10] sm:$0xff] %vm2987_vm4, %v2974_v22 }
0x3552   :  { %v2978_v28 = vpop.f32.mrb[34].mxu0 }
0x3553   :  { %v2979_v31 = vadd.f32 %v3074_v5, %v2978_v28  ;;  %v3516_v33 = vpop.f32.mrb[35].mxu0 }
0x3555   :  { %2991 = vst.msk [vmem:[%s4924_s18 + $0x18] sm:$0xff] %vm2987_vm4, %v2979_v31 }
0x35a7   :  { %v2983_v35 = vpop.f32.mrb[36].mxu0 }
0x35a8   :  { %v2984_v3 = vadd.f32 %v3074_v5, %v2983_v35  ;;  %v3519_v39 = vpop.f32.mrb[37].mxu0 }
0x35aa   :  { %2993 = vst.msk [vmem:[%s4924_s18 + $0x20] sm:$0x3] %vm2992_vm0, %v2984_v3 }
0x35ab   :  { %3985 = dma.done.wait [#allocation5], 32  }
0x35ac   :  { %3986 = vsyncadd [#allocation5], 4294967264 }
0x35ad   :  { %3987 = dma.done.wait [#allocation7], 32  }
0x35ae   :  { %3988 = vsyncadd [#allocation7], 4294967264 }
0x35af   :  { %3024 = vsyncpa [#allocation5], 1 }
0x35b0   :  { %3025 = vsyncpa [#allocation7], 1 }

</bundles_post_ra>
